<compile_context>
chip_gen: v6e
topology: v6e:2x2x1
jax: 0.10.0
libtpu: 0.0.40
codegen_flags: <defaults>
</compile_context>

<pallas_src>
import functools
import math

import jax
import jax.numpy as jnp
import numpy as np
from jax import lax
from jax.experimental import pallas as pl
from jax.experimental.pallas import tpu as pltpu


def _round_up(n, m):
    return ((n + m - 1) // m) * m


def _itemsize(dt):
    return jnp.dtype(dt).itemsize


# ----------------------------------------------------------------------------
# Single-buffered residency for constant-index operands (weights / biases).
# Falls back to the default (double-buffered) BlockSpec if this JAX build does
# not expose pl.Buffered / pipeline_mode.
# ----------------------------------------------------------------------------
def _probe_buffered():
    if not hasattr(pl, "Buffered"):
        return False
    try:
        pl.BlockSpec((8, 128), lambda *_: (0, 0), pipeline_mode=pl.Buffered(1))
        return True
    except Exception:
        return False


_SINGLE_BUFFER_WEIGHTS = _probe_buffered()


def _resident_spec(shape):
    idx = lambda *_: (0,) * len(shape)
    if _SINGLE_BUFFER_WEIGHTS:
        return pl.BlockSpec(shape, idx, pipeline_mode=pl.Buffered(1))
    return pl.BlockSpec(shape, idx)


# ----------------------------------------------------------------------------
# Fused kernel: all LSTM layers + FC head for one (batch-tile, sequence-chunk).
# ----------------------------------------------------------------------------
def _make_fused_kernel(L, T, bt, Hp, Op, cdt, unroll):
    """L layers, T timesteps/chunk, bt batch rows, Hp/Op padded feature dims."""

    def recurrence(gx_get, w_hh_ref, h_ref, c_ref, emit):
        # Hoist the recurrent weight load out of the time loop; W_hh stays f32
        # so the carried state never round-trips through bf16.
        w_hh = w_hh_ref[...]

        def step(t, carry):
            h, c = carry
            gates = gx_get(t) + jnp.dot(h, w_hh,
                                        preferred_element_type=jnp.float32)
            # PyTorch gate order i, f, g, o.  Hp is a multiple of 128 so every
            # slice is lane-aligned.  Sigmoid via the tanh identity -> all four
            # gate nonlinearities are EUP tanh pushes (no exp+recip pairs).
            i_g = 0.5 + 0.5 * jnp.tanh(0.5 * gates[:, 0 * Hp:1 * Hp])
            f_g = 0.5 + 0.5 * jnp.tanh(0.5 * gates[:, 1 * Hp:2 * Hp])
            g_g = jnp.tanh(gates[:, 2 * Hp:3 * Hp])
            o_g = 0.5 + 0.5 * jnp.tanh(0.5 * gates[:, 3 * Hp:4 * Hp])
            c_new = f_g * c + i_g * g_g
            h_new = o_g * jnp.tanh(c_new)
            emit(t, h_new)
            return (h_new, c_new)

        h_fin, c_fin = lax.fori_loop(0, T, step, (h_ref[...], c_ref[...]),
                                     unroll=unroll)
        h_ref[...] = h_fin
        c_ref[...] = c_fin

    def kernel(*refs):
        pos = 0
        gx0_ref = refs[pos]; pos += 1                       # (T, bt, 4Hp) f32
        w_hh = refs[pos:pos + L]; pos += L                  # L x (Hp, 4Hp) f32
        w_ih = refs[pos:pos + L - 1]; pos += L - 1          # (Hp, 4Hp) cdt
        bias = refs[pos:pos + L - 1]; pos += L - 1          # (1, 4Hp) f32
        fc_w_ref = refs[pos]; fc_b_ref = refs[pos + 1]; pos += 2
        out_ref = refs[pos]; pos += 1                       # (T, bt, Op)
        h_refs = refs[pos:pos + L]; pos += L                # (bt, Hp) f32
        c_refs = refs[pos:pos + L]; pos += L                # (bt, Hp) f32
        act_ref = refs[pos]; pos += 1                       # (T*bt, Hp) cdt
        gx_ref = refs[pos] if L > 1 else None               # (T*bt, 4Hp) f32

        # h/c carry across sequence chunks; reset at the start of each
        # batch-tile's chunk sweep.
        @pl.when(pl.program_id(1) == 0)
        def _():
            for l in range(L):
                h_refs[l][...] = jnp.zeros_like(h_refs[l])
                c_refs[l][...] = jnp.zeros_like(c_refs[l])

        def emit(t, h_new):
            r0 = pl.multiple_of(t * bt, bt)
            act_ref[pl.ds(r0, bt), :] = h_new.astype(cdt)

        # ---- layer 0: gate pre-activations streamed from HBM (projection +
        #      fused bias hoisted to XLA; no Din padding anywhere).
        recurrence(lambda t: gx0_ref[t], w_hh[0], h_refs[0], c_refs[0], emit)

        # ---- layers 1..L-1: chunk-wide hoisted input projection (one big MXU
        #      matmul), then the serial recurrence overwrites act_ref in place.
        for l in range(1, L):
            gx_ref[...] = (jnp.dot(act_ref[...], w_ih[l - 1][...],
                                   preferred_element_type=jnp.float32)
                           + bias[l - 1][...])

            def gx_get(t):
                r0 = pl.multiple_of(t * bt, bt)
                return gx_ref[pl.ds(r0, bt), :]

            recurrence(gx_get, w_hh[l], h_refs[l], c_refs[l], emit)

        # ---- fused FC head: one matmul over the whole chunk, lane-dense
        #      (padded) output emitted in the compute dtype.
        y = (jnp.dot(act_ref[...], fc_w_ref[...],
                     preferred_element_type=jnp.float32) + fc_b_ref[...])
        out_ref[...] = y.astype(out_ref.dtype).reshape(T, bt, Op)

    return kernel


# ----------------------------------------------------------------------------
# Parameter preparation (PyTorch layout -> padded / transposed kernel layout)
# ----------------------------------------------------------------------------
def _prepare_params(params, H, Hp, O, Op, cdt):
    w_ih_list, w_hh_list, b_list = [], [], []
    for li, (w_ih, w_hh, b_ih, b_hh) in enumerate(params["lstm"]):
        din = w_ih.shape[1]
        # Layer 0 keeps its true input width (its projection runs in XLA);
        # deeper layers are padded to Hp for lane-dense in-kernel matmuls.
        w_ih_p = jnp.zeros((din if li == 0 else Hp, 4 * Hp), jnp.float32)
        w_hh_p = jnp.zeros((Hp, 4 * Hp), jnp.float32)
        b_p = jnp.zeros((1, 4 * Hp), jnp.float32)
        for g in range(4):                      # gate order i, f, g, o
            col = slice(g * Hp, g * Hp + H)
            row = slice(g * H, (g + 1) * H)
            w_ih_p = w_ih_p.at[:din, col].set(w_ih[row, :].T)
            w_hh_p = w_hh_p.at[:H, col].set(w_hh[row, :].T)
            b_p = b_p.at[0, col].set(b_ih[row] + b_hh[row])
        w_hh_list.append(w_hh_p)                              # stays f32
        b_list.append(b_p)                                    # stays f32
        w_ih_list.append(w_ih_p if li == 0 else w_ih_p.astype(cdt))
    fc_w = jnp.zeros((Hp, Op), jnp.float32).at[:H, :O].set(
        params["fc_w"].T).astype(cdt)
    fc_b = jnp.zeros((1, Op), jnp.float32).at[0, :O].set(params["fc_b"])
    return w_ih_list, w_hh_list, b_list, fc_w, fc_b


# ----------------------------------------------------------------------------
# Full forward (equivalent of LSTM.forward):  out = fc(lstm(x)[0])
# ----------------------------------------------------------------------------
def lstm_model_forward(x, params, *, s_chunk=None, compute_dtype=jnp.float32,
                       batch_tile=None):
    """x: (B, S, input_dim) -> (B, S, output_dim)."""
    B, S, Din = x.shape
    H = params["lstm"][0][1].shape[1]          # w_hh: (4H, H)
    O = params["fc_w"].shape[0]
    L = len(params["lstm"])

    cdt = jnp.dtype(compute_dtype)
    two_byte = cdt.itemsize == 2
    sub = 16 if two_byte else 8                # full (packed) sublane tile
    Hp = _round_up(H, 128)                     # lane-dense gates / stores
    Op = _round_up(O, 128)
    out_dtype = cdt if two_byte else jnp.float32

    # ---- batch tiling: fill MXU rows (up to 128/instance); additional tiles
    #      go to a leading "parallel" grid axis (2nd TensorCore on v7x).
    Bp = _round_up(B, sub)
    bt = Bp if batch_tile is None else _round_up(int(batch_tile), sub)
    bt = min(bt, max(sub, 128))
    n_btiles = pl.cdiv(Bp, bt)
    Bp_total = n_btiles * bt

    # ---- sequence chunking: target >=256 rows per chunk at realistic sizes,
    #      but never pad a short sequence just to hit the target.
    if s_chunk is None:
        T = max(1, min(max(8, pl.cdiv(256, bt)), S))
    else:
        T = max(1, int(s_chunk))

    # ---- itemized VMEM accounting (actual buffer multiplicities).
    it_c, it_o = _itemsize(cdt), _itemsize(out_dtype)
    weights_bytes = (L * Hp * 4 * Hp * 4                  # W_hh kept f32
                     + (L - 1) * Hp * 4 * Hp * it_c       # W_ih, layers >= 1
                     + (L - 1) * 4 * Hp * 4               # fused biases
                     + Hp * Op * it_c + Op * 4)           # FC head
    w_mult = 1 if _SINGLE_BUFFER_WEIGHTS else 2
    state_bytes = 2 * L * bt * Hp * 4                     # h/c carries

    def total_bytes(t):
        gx0_blk = t * bt * 4 * Hp * 4                     # streamed layer-0 proj
        out_blk = t * bt * Op * it_o
        act = t * bt * Hp * it_c
        gxs = t * bt * 4 * Hp * 4 if L > 1 else 0
        return (w_mult * weights_bytes + state_bytes
                + 2 * gx0_blk + 2 * out_blk + act + gxs)  # in/out double-buffered

    # Generation-aware budget: ~3/4 of per-core VMEM (~48 MiB on v7x's 64 MiB,
    # ~96 MiB on v5e/v6e's 128 MiB).
    try:
        vmem_cap = int(pltpu.get_tpu_info().vmem_capacity_bytes)
    except Exception:
        vmem_cap = 64 << 20                               # conservative (v7x)
    budget = (vmem_cap * 3) // 4
    margin = 4 << 20                                      # compiler scratch
    while T > 8 and total_bytes(T) + margin > budget:
        T = max(8, T // 2)
    vmem_limit = int(min(budget, max(16 << 20, (total_bytes(T) * 3) // 2 + margin)))

    Sp = _round_up(S, T)
    n_chunks = Sp // T

    # Fixed partial unroll of the serial recurrence (avoid the T<=16 flip and
    # full-unroll vreg spill at large Hp).
    unroll = 8 if bt * 4 * Hp * 4 <= (32 << 10) else 4
    unroll = max(1, min(unroll, T))

    # ---- parameters and the XLA-hoisted layer-0 projection.
    w_ih_list, w_hh_list, b_list, fc_w, fc_b = _prepare_params(
        params, H, Hp, O, Op, cdt)

    x_tm = jnp.transpose(x, (1, 0, 2)).astype(jnp.float32)       # (S, B, Din)
    x_tm = jnp.pad(x_tm, ((0, Sp - S), (0, Bp_total - B), (0, 0)))
    gx0 = jnp.einsum("sbd,dg->sbg", x_tm, w_ih_list[0]) + b_list[0][None]
    # gx0: (Sp, Bp_total, 4Hp) f32 — layer-0 gate pre-activations (+ bias).

    kernel = _make_fused_kernel(L, T, bt, Hp, Op, cdt, unroll)

    in_specs = [pl.BlockSpec((T, bt, 4 * Hp), lambda j, s: (s, j, 0))]
    in_specs += [_resident_spec((Hp, 4 * Hp)) for _ in range(L)]       # W_hh
    in_specs += [_resident_spec((Hp, 4 * Hp)) for _ in range(L - 1)]   # W_ih
    in_specs += [_resident_spec((1, 4 * Hp)) for _ in range(L - 1)]    # biases
    in_specs += [_resident_spec((Hp, Op)), _resident_spec((1, Op))]    # FC head

    scratch = ([pltpu.VMEM((bt, Hp), jnp.float32) for _ in range(2 * L)]
               + [pltpu.VMEM((T * bt, Hp), cdt)])
    if L > 1:
        scratch.append(pltpu.VMEM((T * bt, 4 * Hp), jnp.float32))

    out = pl.pallas_call(
        kernel,
        out_shape=jax.ShapeDtypeStruct((Sp, Bp_total, Op), out_dtype),
        grid=(n_btiles, n_chunks),
        in_specs=in_specs,
        out_specs=pl.BlockSpec((T, bt, Op), lambda j, s: (s, j, 0)),
        scratch_shapes=scratch,
        compiler_params=pltpu.CompilerParams(
            # batch tiles are independent (megacore on v7x); h/c carry across
            # sequence chunks so that axis must stay sequential.
            dimension_semantics=("parallel", "arbitrary"),
            vmem_limit_bytes=vmem_limit,
        ),
    )(gx0, *w_hh_list, *w_ih_list[1:], *b_list[1:], fc_w, fc_b)

    out = out[:S, :B, :O].astype(jnp.float32)
    return jnp.transpose(out, (1, 0, 2))


# ----------------------------------------------------------------------------
# Deterministic init with the same shapes/layout as nn.LSTM / nn.Linear
# ----------------------------------------------------------------------------
def init_params(key, input_dim, hidden_dim, num_layers, output_dim):
    k = 1.0 / math.sqrt(hidden_dim)
    lstm = []
    din = input_dim
    for _ in range(num_layers):
        key, k1, k2, k3, k4 = jax.random.split(key, 5)
        w_ih = jax.random.uniform(k1, (4 * hidden_dim, din), jnp.float32, -k, k)
        w_hh = jax.random.uniform(k2, (4 * hidden_dim, hidden_dim), jnp.float32, -k, k)
        b_ih = jax.random.uniform(k3, (4 * hidden_dim,), jnp.float32, -k, k)
        b_hh = jax.random.uniform(k4, (4 * hidden_dim,), jnp.float32, -k, k)
        lstm.append((w_ih, w_hh, b_ih, b_hh))
        din = hidden_dim
    key, k1, k2 = jax.random.split(key, 3)
    fc_w = jax.random.uniform(k1, (output_dim, hidden_dim), jnp.float32, -k, k)
    fc_b = jax.random.uniform(k2, (output_dim,), jnp.float32, -k, k)
    return {"lstm": lstm, "fc_w": fc_w, "fc_b": fc_b}


# ----------------------------------------------------------------------------
# Pure-JAX reference
# ----------------------------------------------------------------------------
def ref_forward(x, params):
    B = x.shape[0]
    H = params["lstm"][0][1].shape[1]
    y = x
    for (w_ih, w_hh, b_ih, b_hh) in params["lstm"]:
        w_ih_t, w_hh_t, b = w_ih.T, w_hh.T, (b_ih + b_hh)[None, :]

        def step(carry, x_t, w_ih_t=w_ih_t, w_hh_t=w_hh_t, b=b):
            h, c = carry
            gates = x_t @ w_ih_t + h @ w_hh_t + b
            i = jax.nn.sigmoid(gates[:, :H])
            f = jax.nn.sigmoid(gates[:, H:2 * H])
            g = jnp.tanh(gates[:, 2 * H:3 * H])
            o = jax.nn.sigmoid(gates[:, 3 * H:])
            c = f * c + i * g
            h = o * jnp.tanh(c)
            return (h, c), h

        h0 = jnp.zeros((B, H), jnp.float32)
        c0 = jnp.zeros((B, H), jnp.float32)
        _, ys = lax.scan(step, (h0, c0), jnp.transpose(y, (1, 0, 2)))
        y = jnp.transpose(ys, (1, 0, 2))
    return y @ params["fc_w"].T + params["fc_b"][None, None, :]


# ----------------------------------------------------------------------------
if __name__ == "__main__":
    batch, seq = 2, 8
    input_dim, hidden_dim, num_layers, output_dim = 4, 32, 2, 2

    key = jax.random.PRNGKey(0)
    key, kx = jax.random.split(key)
    x = jax.random.normal(kx, (batch, seq, input_dim), jnp.float32)
    params = init_params(key, input_dim, hidden_dim, num_layers, output_dim)

    ref = jax.block_until_ready(ref_forward(x, params))

    # f32 compute path: tight tolerance.
    fwd_f32 = jax.jit(functools.partial(lstm_model_forward,
                                        compute_dtype=jnp.float32))
    out = jax.block_until_ready(fwd_f32(x, params))
    assert out.shape == (batch, seq, output_dim)
    np.testing.assert_allclose(np.asarray(out), np.asarray(ref),
                               rtol=2e-5, atol=2e-5)

    # bf16 compute path (worth enabling on v5e as well as v6e/v7x): matmul
    # operands / inter-layer activations / FC writeback in bf16, gates, state
    # and the recurrent h@W_hh stay f32.
    fwd_bf16 = jax.jit(functools.partial(lstm_model_forward,
                                         compute_dtype=jnp.bfloat16))
    out_bf16 = jax.block_until_ready(fwd_bf16(x, params))
    np.testing.assert_allclose(np.asarray(out_bf16), np.asarray(ref),
                               rtol=5e-2, atol=5e-2)

    print("KERNEL_OK")
</pallas_src>

<mosaic_0001>
module attributes {stable_mosaic.version = 11 : i64} {
  func.func @kernel(%arg0: i32, %arg1: i32, %arg2: memref<8x8x512xf32, #tpu.memory_space<vmem>>, %arg3: memref<128x512xf32, #tpu.memory_space<vmem>>, %arg4: memref<128x512xf32, #tpu.memory_space<vmem>>, %arg5: memref<128x512xf32, #tpu.memory_space<vmem>>, %arg6: memref<1x512xf32, #tpu.memory_space<vmem>>, %arg7: memref<128x128xf32, #tpu.memory_space<vmem>>, %arg8: memref<1x128xf32, #tpu.memory_space<vmem>>, %arg9: memref<8x8x128xf32, #tpu.memory_space<vmem>>, %arg10: memref<8x128xf32, #tpu.memory_space<vmem>>, %arg11: memref<8x128xf32, #tpu.memory_space<vmem>>, %arg12: memref<8x128xf32, #tpu.memory_space<vmem>>, %arg13: memref<8x128xf32, #tpu.memory_space<vmem>>, %arg14: memref<64x128xf32, #tpu.memory_space<vmem>>, %arg15: memref<64x512xf32, #tpu.memory_space<vmem>>) attributes {dimension_semantics = [#tpu.dimension_semantics<parallel>, #tpu.dimension_semantics<arbitrary>], iteration_bounds = array<i64: 1, 1>, scalar_prefetch = 0 : i64, scratch_operands = 6 : i64, tpu.core_type = #tpu.core_type<tc>, window_params = [{transform_indices = @transform_0, window_bounds = array<i64: 8, 8, 512>}, {pipeline_mode = #tpu.pipeline_mode<synchronous>, transform_indices = @transform_1, window_bounds = array<i64: 128, 512>}, {pipeline_mode = #tpu.pipeline_mode<synchronous>, transform_indices = @transform_2, window_bounds = array<i64: 128, 512>}, {pipeline_mode = #tpu.pipeline_mode<synchronous>, transform_indices = @transform_3, window_bounds = array<i64: 128, 512>}, {pipeline_mode = #tpu.pipeline_mode<synchronous>, transform_indices = @transform_4, window_bounds = array<i64: 1, 512>}, {pipeline_mode = #tpu.pipeline_mode<synchronous>, transform_indices = @transform_5, window_bounds = array<i64: 128, 128>}, {pipeline_mode = #tpu.pipeline_mode<synchronous>, transform_indices = @transform_6, window_bounds = array<i64: 1, 128>}, {transform_indices = @transform_7, window_bounds = array<i64: 8, 8, 128>}]} {
    %c0_i32 = arith.constant 0 : i32
    %0 = arith.cmpi eq, %arg1, %c0_i32 : i32
    %1 = arith.extui %0 : i1 to i32
    %c0_i32_0 = arith.constant 0 : i32
    %2 = arith.cmpi ne, %1, %c0_i32_0 : i32
    scf.if %2 {
      %cst_272 = arith.constant 0.000000e+00 : f32
      %676 = vector.broadcast %cst_272 : f32 to vector<8x128xf32>
      %c0_273 = arith.constant 0 : index
      %c0_274 = arith.constant 0 : index
      %677 = vector.load %arg10[%c0_273, %c0_274] : memref<8x128xf32, #tpu.memory_space<vmem>>, vector<8x128xf32>
      tpu.vector_store %arg10[%c0_273, %c0_274], %676 {strides = array<i32>} : memref<8x128xf32, #tpu.memory_space<vmem>>, vector<8x128xf32>,
      %cst_275 = arith.constant 0.000000e+00 : f32
      %678 = vector.broadcast %cst_275 : f32 to vector<8x128xf32>
      %c0_276 = arith.constant 0 : index
      %c0_277 = arith.constant 0 : index
      %679 = vector.load %arg12[%c0_276, %c0_277] : memref<8x128xf32, #tpu.memory_space<vmem>>, vector<8x128xf32>
      tpu.vector_store %arg12[%c0_276, %c0_277], %678 {strides = array<i32>} : memref<8x128xf32, #tpu.memory_space<vmem>>, vector<8x128xf32>,
      %cst_278 = arith.constant 0.000000e+00 : f32
      %680 = vector.broadcast %cst_278 : f32 to vector<8x128xf32>
      %c0_279 = arith.constant 0 : index
      %c0_280 = arith.constant 0 : index
      %681 = vector.load %arg11[%c0_279, %c0_280] : memref<8x128xf32, #tpu.memory_space<vmem>>, vector<8x128xf32>
      tpu.vector_store %arg11[%c0_279, %c0_280], %680 {strides = array<i32>} : memref<8x128xf32, #tpu.memory_space<vmem>>, vector<8x128xf32>,
      %cst_281 = arith.constant 0.000000e+00 : f32
      %682 = vector.broadcast %cst_281 : f32 to vector<8x128xf32>
      %c0_282 = arith.constant 0 : index
      %c0_283 = arith.constant 0 : index
      %683 = vector.load %arg13[%c0_282, %c0_283] : memref<8x128xf32, #tpu.memory_space<vmem>>, vector<8x128xf32>
      tpu.vector_store %arg13[%c0_282, %c0_283], %682 {strides = array<i32>} : memref<8x128xf32, #tpu.memory_space<vmem>>, vector<8x128xf32>,
    } else {
    }
    %c0 = arith.constant 0 : index
    %c0_1 = arith.constant 0 : index
    %3 = vector.load %arg3[%c0, %c0_1] : memref<128x512xf32, #tpu.memory_space<vmem>>, vector<128x512xf32>
    %c0_2 = arith.constant 0 : index
    %c0_3 = arith.constant 0 : index
    %4 = vector.load %arg10[%c0_2, %c0_3] : memref<8x128xf32, #tpu.memory_space<vmem>>, vector<8x128xf32>
    %c0_4 = arith.constant 0 : index
    %c0_5 = arith.constant 0 : index
    %5 = vector.load %arg12[%c0_4, %c0_5] : memref<8x128xf32, #tpu.memory_space<vmem>>, vector<8x128xf32>
    %c0_i32_6 = arith.constant 0 : i32
    %6 = arith.index_cast %c0_i32_6 : i32 to index
    %c0_7 = arith.constant 0 : index
    %c0_8 = arith.constant 0 : index
    %7 = vector.load %arg2[%6, %c0_7, %c0_8] : memref<8x8x512xf32, #tpu.memory_space<vmem>>, vector<1x8x512xf32>
    %8 = vector.shape_cast %7 : vector<1x8x512xf32> to vector<8x512xf32>
    %cst = arith.constant dense<0.000000e+00> : vector<8x512xf32>
    %9 = tpu.matmul %4, %3, %cst {dimension_numbers = #tpu.dot_dimension_numbers<[1], [0], [0], [1], [0, 0, 1, 1], [], []>} : vector<8x128xf32>, vector<128x512xf32>, vector<8x512xf32> -> vector<8x512xf32>
    %10 = arith.addf %8, %9 : vector<8x512xf32>
    %11 = vector.extract_strided_slice %10 {offsets = [0, 0], sizes = [8, 128], strides = [1, 1]} : vector<8x512xf32> to vector<8x128xf32>
    %cst_9 = arith.constant 5.000000e-01 : f32
    %12 = vector.broadcast %cst_9 : f32 to vector<8x128xf32>
    %13 = arith.mulf %12, %11 : vector<8x128xf32>
    %14 = math.tanh %13 : vector<8x128xf32>
    %cst_10 = arith.constant 5.000000e-01 : f32
    %15 = vector.broadcast %cst_10 : f32 to vector<8x128xf32>
    %16 = arith.mulf %15, %14 : vector<8x128xf32>
    %cst_11 = arith.constant 5.000000e-01 : f32
    %17 = vector.broadcast %cst_11 : f32 to vector<8x128xf32>
    %18 = arith.addf %17, %16 : vector<8x128xf32>
    %19 = vector.extract_strided_slice %10 {offsets = [0, 128], sizes = [8, 128], strides = [1, 1]} : vector<8x512xf32> to vector<8x128xf32>
    %cst_12 = arith.constant 5.000000e-01 : f32
    %20 = vector.broadcast %cst_12 : f32 to vector<8x128xf32>
    %21 = arith.mulf %20, %19 : vector<8x128xf32>
    %22 = math.tanh %21 : vector<8x128xf32>
    %cst_13 = arith.constant 5.000000e-01 : f32
    %23 = vector.broadcast %cst_13 : f32 to vector<8x128xf32>
    %24 = arith.mulf %23, %22 : vector<8x128xf32>
    %cst_14 = arith.constant 5.000000e-01 : f32
    %25 = vector.broadcast %cst_14 : f32 to vector<8x128xf32>
    %26 = arith.addf %25, %24 : vector<8x128xf32>
    %27 = vector.extract_strided_slice %10 {offsets = [0, 256], sizes = [8, 128], strides = [1, 1]} : vector<8x512xf32> to vector<8x128xf32>
    %28 = math.tanh %27 : vector<8x128xf32>
    %29 = vector.extract_strided_slice %10 {offsets = [0, 384], sizes = [8, 128], strides = [1, 1]} : vector<8x512xf32> to vector<8x128xf32>
    %cst_15 = arith.constant 5.000000e-01 : f32
    %30 = vector.broadcast %cst_15 : f32 to vector<8x128xf32>
    %31 = arith.mulf %30, %29 : vector<8x128xf32>
    %32 = math.tanh %31 : vector<8x128xf32>
    %cst_16 = arith.constant 5.000000e-01 : f32
    %33 = vector.broadcast %cst_16 : f32 to vector<8x128xf32>
    %34 = arith.mulf %33, %32 : vector<8x128xf32>
    %cst_17 = arith.constant 5.000000e-01 : f32
    %35 = vector.broadcast %cst_17 : f32 to vector<8x128xf32>
    %36 = arith.addf %35, %34 : vector<8x128xf32>
    %37 = arith.mulf %26, %5 : vector<8x128xf32>
    %38 = arith.mulf %18, %28 : vector<8x128xf32>
    %39 = arith.addf %37, %38 : vector<8x128xf32>
    %40 = math.tanh %39 : vector<8x128xf32>
    %41 = arith.mulf %36, %40 : vector<8x128xf32>
    %c8_i32 = arith.constant 8 : i32
    %42 = arith.muli %c0_i32_6, %c8_i32 : i32
    %43 = tpu.assume_multiple %42, 8 : i32
    %44 = arith.index_cast %43 : i32 to index
    %c0_18 = arith.constant 0 : index
    %45 = vector.load %arg14[%44, %c0_18] : memref<64x128xf32, #tpu.memory_space<vmem>>, vector<8x128xf32>
    tpu.vector_store %arg14[%44, %c0_18], %41 {strides = array<i32>} : memref<64x128xf32, #tpu.memory_space<vmem>>, vector<8x128xf32>,
    %c1_i32 = arith.constant 1 : i32
    %46 = arith.index_cast %c1_i32 : i32 to index
    %c0_19 = arith.constant 0 : index
    %c0_20 = arith.constant 0 : index
    %47 = vector.load %arg2[%46, %c0_19, %c0_20] : memref<8x8x512xf32, #tpu.memory_space<vmem>>, vector<1x8x512xf32>
    %48 = vector.shape_cast %47 : vector<1x8x512xf32> to vector<8x512xf32>
    %cst_21 = arith.constant dense<0.000000e+00> : vector<8x512xf32>
    %49 = tpu.matmul %41, %3, %cst_21 {dimension_numbers = #tpu.dot_dimension_numbers<[1], [0], [0], [1], [0, 0, 1, 1], [], []>} : vector<8x128xf32>, vector<128x512xf32>, vector<8x512xf32> -> vector<8x512xf32>
    %50 = arith.addf %48, %49 : vector<8x512xf32>
    %51 = vector.extract_strided_slice %50 {offsets = [0, 0], sizes = [8, 128], strides = [1, 1]} : vector<8x512xf32> to vector<8x128xf32>
    %cst_22 = arith.constant 5.000000e-01 : f32
    %52 = vector.broadcast %cst_22 : f32 to vector<8x128xf32>
    %53 = arith.mulf %52, %51 : vector<8x128xf32>
    %54 = math.tanh %53 : vector<8x128xf32>
    %cst_23 = arith.constant 5.000000e-01 : f32
    %55 = vector.broadcast %cst_23 : f32 to vector<8x128xf32>
    %56 = arith.mulf %55, %54 : vector<8x128xf32>
    %cst_24 = arith.constant 5.000000e-01 : f32
    %57 = vector.broadcast %cst_24 : f32 to vector<8x128xf32>
    %58 = arith.addf %57, %56 : vector<8x128xf32>
    %59 = vector.extract_strided_slice %50 {offsets = [0, 128], sizes = [8, 128], strides = [1, 1]} : vector<8x512xf32> to vector<8x128xf32>
    %cst_25 = arith.constant 5.000000e-01 : f32
    %60 = vector.broadcast %cst_25 : f32 to vector<8x128xf32>
    %61 = arith.mulf %60, %59 : vector<8x128xf32>
    %62 = math.tanh %61 : vector<8x128xf32>
    %cst_26 = arith.constant 5.000000e-01 : f32
    %63 = vector.broadcast %cst_26 : f32 to vector<8x128xf32>
    %64 = arith.mulf %63, %62 : vector<8x128xf32>
    %cst_27 = arith.constant 5.000000e-01 : f32
    %65 = vector.broadcast %cst_27 : f32 to vector<8x128xf32>
    %66 = arith.addf %65, %64 : vector<8x128xf32>
    %67 = vector.extract_strided_slice %50 {offsets = [0, 256], sizes = [8, 128], strides = [1, 1]} : vector<8x512xf32> to vector<8x128xf32>
    %68 = math.tanh %67 : vector<8x128xf32>
    %69 = vector.extract_strided_slice %50 {offsets = [0, 384], sizes = [8, 128], strides = [1, 1]} : vector<8x512xf32> to vector<8x128xf32>
    %cst_28 = arith.constant 5.000000e-01 : f32
    %70 = vector.broadcast %cst_28 : f32 to vector<8x128xf32>
    %71 = arith.mulf %70, %69 : vector<8x128xf32>
    %72 = math.tanh %71 : vector<8x128xf32>
    %cst_29 = arith.constant 5.000000e-01 : f32
    %73 = vector.broadcast %cst_29 : f32 to vector<8x128xf32>
    %74 = arith.mulf %73, %72 : vector<8x128xf32>
    %cst_30 = arith.constant 5.000000e-01 : f32
    %75 = vector.broadcast %cst_30 : f32 to vector<8x128xf32>
    %76 = arith.addf %75, %74 : vector<8x128xf32>
    %77 = arith.mulf %66, %39 : vector<8x128xf32>
    %78 = arith.mulf %58, %68 : vector<8x128xf32>
    %79 = arith.addf %77, %78 : vector<8x128xf32>
    %80 = math.tanh %79 : vector<8x128xf32>
    %81 = arith.mulf %76, %80 : vector<8x128xf32>
    %c8_i32_31 = arith.constant 8 : i32
    %82 = arith.muli %c1_i32, %c8_i32_31 : i32
    %83 = tpu.assume_multiple %82, 8 : i32
    %84 = arith.index_cast %83 : i32 to index
    %c0_32 = arith.constant 0 : index
    %85 = vector.load %arg14[%84, %c0_32] : memref<64x128xf32, #tpu.memory_space<vmem>>, vector<8x128xf32>
    tpu.vector_store %arg14[%84, %c0_32], %81 {strides = array<i32>} : memref<64x128xf32, #tpu.memory_space<vmem>>, vector<8x128xf32>,
    %c2_i32 = arith.constant 2 : i32
    %86 = arith.index_cast %c2_i32 : i32 to index
    %c0_33 = arith.constant 0 : index
    %c0_34 = arith.constant 0 : index
    %87 = vector.load %arg2[%86, %c0_33, %c0_34] : memref<8x8x512xf32, #tpu.memory_space<vmem>>, vector<1x8x512xf32>
    %88 = vector.shape_cast %87 : vector<1x8x512xf32> to vector<8x512xf32>
    %cst_35 = arith.constant dense<0.000000e+00> : vector<8x512xf32>
    %89 = tpu.matmul %81, %3, %cst_35 {dimension_numbers = #tpu.dot_dimension_numbers<[1], [0], [0], [1], [0, 0, 1, 1], [], []>} : vector<8x128xf32>, vector<128x512xf32>, vector<8x512xf32> -> vector<8x512xf32>
    %90 = arith.addf %88, %89 : vector<8x512xf32>
    %91 = vector.extract_strided_slice %90 {offsets = [0, 0], sizes = [8, 128], strides = [1, 1]} : vector<8x512xf32> to vector<8x128xf32>
    %cst_36 = arith.constant 5.000000e-01 : f32
    %92 = vector.broadcast %cst_36 : f32 to vector<8x128xf32>
    %93 = arith.mulf %92, %91 : vector<8x128xf32>
    %94 = math.tanh %93 : vector<8x128xf32>
    %cst_37 = arith.constant 5.000000e-01 : f32
    %95 = vector.broadcast %cst_37 : f32 to vector<8x128xf32>
    %96 = arith.mulf %95, %94 : vector<8x128xf32>
    %cst_38 = arith.constant 5.000000e-01 : f32
    %97 = vector.broadcast %cst_38 : f32 to vector<8x128xf32>
    %98 = arith.addf %97, %96 : vector<8x128xf32>
    %99 = vector.extract_strided_slice %90 {offsets = [0, 128], sizes = [8, 128], strides = [1, 1]} : vector<8x512xf32> to vector<8x128xf32>
    %cst_39 = arith.constant 5.000000e-01 : f32
    %100 = vector.broadcast %cst_39 : f32 to vector<8x128xf32>
    %101 = arith.mulf %100, %99 : vector<8x128xf32>
    %102 = math.tanh %101 : vector<8x128xf32>
    %cst_40 = arith.constant 5.000000e-01 : f32
    %103 = vector.broadcast %cst_40 : f32 to vector<8x128xf32>
    %104 = arith.mulf %103, %102 : vector<8x128xf32>
    %cst_41 = arith.constant 5.000000e-01 : f32
    %105 = vector.broadcast %cst_41 : f32 to vector<8x128xf32>
    %106 = arith.addf %105, %104 : vector<8x128xf32>
    %107 = vector.extract_strided_slice %90 {offsets = [0, 256], sizes = [8, 128], strides = [1, 1]} : vector<8x512xf32> to vector<8x128xf32>
    %108 = math.tanh %107 : vector<8x128xf32>
    %109 = vector.extract_strided_slice %90 {offsets = [0, 384], sizes = [8, 128], strides = [1, 1]} : vector<8x512xf32> to vector<8x128xf32>
    %cst_42 = arith.constant 5.000000e-01 : f32
    %110 = vector.broadcast %cst_42 : f32 to vector<8x128xf32>
    %111 = arith.mulf %110, %109 : vector<8x128xf32>
    %112 = math.tanh %111 : vector<8x128xf32>
    %cst_43 = arith.constant 5.000000e-01 : f32
    %113 = vector.broadcast %cst_43 : f32 to vector<8x128xf32>
    %114 = arith.mulf %113, %112 : vector<8x128xf32>
    %cst_44 = arith.constant 5.000000e-01 : f32
    %115 = vector.broadcast %cst_44 : f32 to vector<8x128xf32>
    %116 = arith.addf %115, %114 : vector<8x128xf32>
    %117 = arith.mulf %106, %79 : vector<8x128xf32>
    %118 = arith.mulf %98, %108 : vector<8x128xf32>
    %119 = arith.addf %117, %118 : vector<8x128xf32>
    %120 = math.tanh %119 : vector<8x128xf32>
    %121 = arith.mulf %116, %120 : vector<8x128xf32>
    %c8_i32_45 = arith.constant 8 : i32
    %122 = arith.muli %c2_i32, %c8_i32_45 : i32
    %123 = tpu.assume_multiple %122, 8 : i32
    %124 = arith.index_cast %123 : i32 to index
    %c0_46 = arith.constant 0 : index
    %125 = vector.load %arg14[%124, %c0_46] : memref<64x128xf32, #tpu.memory_space<vmem>>, vector<8x128xf32>
    tpu.vector_store %arg14[%124, %c0_46], %121 {strides = array<i32>} : memref<64x128xf32, #tpu.memory_space<vmem>>, vector<8x128xf32>,
    %c3_i32 = arith.constant 3 : i32
    %126 = arith.index_cast %c3_i32 : i32 to index
    %c0_47 = arith.constant 0 : index
    %c0_48 = arith.constant 0 : index
    %127 = vector.load %arg2[%126, %c0_47, %c0_48] : memref<8x8x512xf32, #tpu.memory_space<vmem>>, vector<1x8x512xf32>
    %128 = vector.shape_cast %127 : vector<1x8x512xf32> to vector<8x512xf32>
    %cst_49 = arith.constant dense<0.000000e+00> : vector<8x512xf32>
    %129 = tpu.matmul %121, %3, %cst_49 {dimension_numbers = #tpu.dot_dimension_numbers<[1], [0], [0], [1], [0, 0, 1, 1], [], []>} : vector<8x128xf32>, vector<128x512xf32>, vector<8x512xf32> -> vector<8x512xf32>
    %130 = arith.addf %128, %129 : vector<8x512xf32>
    %131 = vector.extract_strided_slice %130 {offsets = [0, 0], sizes = [8, 128], strides = [1, 1]} : vector<8x512xf32> to vector<8x128xf32>
    %cst_50 = arith.constant 5.000000e-01 : f32
    %132 = vector.broadcast %cst_50 : f32 to vector<8x128xf32>
    %133 = arith.mulf %132, %131 : vector<8x128xf32>
    %134 = math.tanh %133 : vector<8x128xf32>
    %cst_51 = arith.constant 5.000000e-01 : f32
    %135 = vector.broadcast %cst_51 : f32 to vector<8x128xf32>
    %136 = arith.mulf %135, %134 : vector<8x128xf32>
    %cst_52 = arith.constant 5.000000e-01 : f32
    %137 = vector.broadcast %cst_52 : f32 to vector<8x128xf32>
    %138 = arith.addf %137, %136 : vector<8x128xf32>
    %139 = vector.extract_strided_slice %130 {offsets = [0, 128], sizes = [8, 128], strides = [1, 1]} : vector<8x512xf32> to vector<8x128xf32>
    %cst_53 = arith.constant 5.000000e-01 : f32
    %140 = vector.broadcast %cst_53 : f32 to vector<8x128xf32>
    %141 = arith.mulf %140, %139 : vector<8x128xf32>
    %142 = math.tanh %141 : vector<8x128xf32>
    %cst_54 = arith.constant 5.000000e-01 : f32
    %143 = vector.broadcast %cst_54 : f32 to vector<8x128xf32>
    %144 = arith.mulf %143, %142 : vector<8x128xf32>
    %cst_55 = arith.constant 5.000000e-01 : f32
    %145 = vector.broadcast %cst_55 : f32 to vector<8x128xf32>
    %146 = arith.addf %145, %144 : vector<8x128xf32>
    %147 = vector.extract_strided_slice %130 {offsets = [0, 256], sizes = [8, 128], strides = [1, 1]} : vector<8x512xf32> to vector<8x128xf32>
    %148 = math.tanh %147 : vector<8x128xf32>
    %149 = vector.extract_strided_slice %130 {offsets = [0, 384], sizes = [8, 128], strides = [1, 1]} : vector<8x512xf32> to vector<8x128xf32>
    %cst_56 = arith.constant 5.000000e-01 : f32
    %150 = vector.broadcast %cst_56 : f32 to vector<8x128xf32>
    %151 = arith.mulf %150, %149 : vector<8x128xf32>
    %152 = math.tanh %151 : vector<8x128xf32>
    %cst_57 = arith.constant 5.000000e-01 : f32
    %153 = vector.broadcast %cst_57 : f32 to vector<8x128xf32>
    %154 = arith.mulf %153, %152 : vector<8x128xf32>
    %cst_58 = arith.constant 5.000000e-01 : f32
    %155 = vector.broadcast %cst_58 : f32 to vector<8x128xf32>
    %156 = arith.addf %155, %154 : vector<8x128xf32>
    %157 = arith.mulf %146, %119 : vector<8x128xf32>
    %158 = arith.mulf %138, %148 : vector<8x128xf32>
    %159 = arith.addf %157, %158 : vector<8x128xf32>
    %160 = math.tanh %159 : vector<8x128xf32>
    %161 = arith.mulf %156, %160 : vector<8x128xf32>
    %c8_i32_59 = arith.constant 8 : i32
    %162 = arith.muli %c3_i32, %c8_i32_59 : i32
    %163 = tpu.assume_multiple %162, 8 : i32
    %164 = arith.index_cast %163 : i32 to index
    %c0_60 = arith.constant 0 : index
    %165 = vector.load %arg14[%164, %c0_60] : memref<64x128xf32, #tpu.memory_space<vmem>>, vector<8x128xf32>
    tpu.vector_store %arg14[%164, %c0_60], %161 {strides = array<i32>} : memref<64x128xf32, #tpu.memory_space<vmem>>, vector<8x128xf32>,
    %c4_i32 = arith.constant 4 : i32
    %166 = arith.index_cast %c4_i32 : i32 to index
    %c0_61 = arith.constant 0 : index
    %c0_62 = arith.constant 0 : index
    %167 = vector.load %arg2[%166, %c0_61, %c0_62] : memref<8x8x512xf32, #tpu.memory_space<vmem>>, vector<1x8x512xf32>
    %168 = vector.shape_cast %167 : vector<1x8x512xf32> to vector<8x512xf32>
    %cst_63 = arith.constant dense<0.000000e+00> : vector<8x512xf32>
    %169 = tpu.matmul %161, %3, %cst_63 {dimension_numbers = #tpu.dot_dimension_numbers<[1], [0], [0], [1], [0, 0, 1, 1], [], []>} : vector<8x128xf32>, vector<128x512xf32>, vector<8x512xf32> -> vector<8x512xf32>
    %170 = arith.addf %168, %169 : vector<8x512xf32>
    %171 = vector.extract_strided_slice %170 {offsets = [0, 0], sizes = [8, 128], strides = [1, 1]} : vector<8x512xf32> to vector<8x128xf32>
    %cst_64 = arith.constant 5.000000e-01 : f32
    %172 = vector.broadcast %cst_64 : f32 to vector<8x128xf32>
    %173 = arith.mulf %172, %171 : vector<8x128xf32>
    %174 = math.tanh %173 : vector<8x128xf32>
    %cst_65 = arith.constant 5.000000e-01 : f32
    %175 = vector.broadcast %cst_65 : f32 to vector<8x128xf32>
    %176 = arith.mulf %175, %174 : vector<8x128xf32>
    %cst_66 = arith.constant 5.000000e-01 : f32
    %177 = vector.broadcast %cst_66 : f32 to vector<8x128xf32>
    %178 = arith.addf %177, %176 : vector<8x128xf32>
    %179 = vector.extract_strided_slice %170 {offsets = [0, 128], sizes = [8, 128], strides = [1, 1]} : vector<8x512xf32> to vector<8x128xf32>
    %cst_67 = arith.constant 5.000000e-01 : f32
    %180 = vector.broadcast %cst_67 : f32 to vector<8x128xf32>
    %181 = arith.mulf %180, %179 : vector<8x128xf32>
    %182 = math.tanh %181 : vector<8x128xf32>
    %cst_68 = arith.constant 5.000000e-01 : f32
    %183 = vector.broadcast %cst_68 : f32 to vector<8x128xf32>
    %184 = arith.mulf %183, %182 : vector<8x128xf32>
    %cst_69 = arith.constant 5.000000e-01 : f32
    %185 = vector.broadcast %cst_69 : f32 to vector<8x128xf32>
    %186 = arith.addf %185, %184 : vector<8x128xf32>
    %187 = vector.extract_strided_slice %170 {offsets = [0, 256], sizes = [8, 128], strides = [1, 1]} : vector<8x512xf32> to vector<8x128xf32>
    %188 = math.tanh %187 : vector<8x128xf32>
    %189 = vector.extract_strided_slice %170 {offsets = [0, 384], sizes = [8, 128], strides = [1, 1]} : vector<8x512xf32> to vector<8x128xf32>
    %cst_70 = arith.constant 5.000000e-01 : f32
    %190 = vector.broadcast %cst_70 : f32 to vector<8x128xf32>
    %191 = arith.mulf %190, %189 : vector<8x128xf32>
    %192 = math.tanh %191 : vector<8x128xf32>
    %cst_71 = arith.constant 5.000000e-01 : f32
    %193 = vector.broadcast %cst_71 : f32 to vector<8x128xf32>
    %194 = arith.mulf %193, %192 : vector<8x128xf32>
    %cst_72 = arith.constant 5.000000e-01 : f32
    %195 = vector.broadcast %cst_72 : f32 to vector<8x128xf32>
    %196 = arith.addf %195, %194 : vector<8x128xf32>
    %197 = arith.mulf %186, %159 : vector<8x128xf32>
    %198 = arith.mulf %178, %188 : vector<8x128xf32>
    %199 = arith.addf %197, %198 : vector<8x128xf32>
    %200 = math.tanh %199 : vector<8x128xf32>
    %201 = arith.mulf %196, %200 : vector<8x128xf32>
    %c8_i32_73 = arith.constant 8 : i32
    %202 = arith.muli %c4_i32, %c8_i32_73 : i32
    %203 = tpu.assume_multiple %202, 8 : i32
    %204 = arith.index_cast %203 : i32 to index
    %c0_74 = arith.constant 0 : index
    %205 = vector.load %arg14[%204, %c0_74] : memref<64x128xf32, #tpu.memory_space<vmem>>, vector<8x128xf32>
    tpu.vector_store %arg14[%204, %c0_74], %201 {strides = array<i32>} : memref<64x128xf32, #tpu.memory_space<vmem>>, vector<8x128xf32>,
    %c5_i32 = arith.constant 5 : i32
    %206 = arith.index_cast %c5_i32 : i32 to index
    %c0_75 = arith.constant 0 : index
    %c0_76 = arith.constant 0 : index
    %207 = vector.load %arg2[%206, %c0_75, %c0_76] : memref<8x8x512xf32, #tpu.memory_space<vmem>>, vector<1x8x512xf32>
    %208 = vector.shape_cast %207 : vector<1x8x512xf32> to vector<8x512xf32>
    %cst_77 = arith.constant dense<0.000000e+00> : vector<8x512xf32>
    %209 = tpu.matmul %201, %3, %cst_77 {dimension_numbers = #tpu.dot_dimension_numbers<[1], [0], [0], [1], [0, 0, 1, 1], [], []>} : vector<8x128xf32>, vector<128x512xf32>, vector<8x512xf32> -> vector<8x512xf32>
    %210 = arith.addf %208, %209 : vector<8x512xf32>
    %211 = vector.extract_strided_slice %210 {offsets = [0, 0], sizes = [8, 128], strides = [1, 1]} : vector<8x512xf32> to vector<8x128xf32>
    %cst_78 = arith.constant 5.000000e-01 : f32
    %212 = vector.broadcast %cst_78 : f32 to vector<8x128xf32>
    %213 = arith.mulf %212, %211 : vector<8x128xf32>
    %214 = math.tanh %213 : vector<8x128xf32>
    %cst_79 = arith.constant 5.000000e-01 : f32
    %215 = vector.broadcast %cst_79 : f32 to vector<8x128xf32>
    %216 = arith.mulf %215, %214 : vector<8x128xf32>
    %cst_80 = arith.constant 5.000000e-01 : f32
    %217 = vector.broadcast %cst_80 : f32 to vector<8x128xf32>
    %218 = arith.addf %217, %216 : vector<8x128xf32>
    %219 = vector.extract_strided_slice %210 {offsets = [0, 128], sizes = [8, 128], strides = [1, 1]} : vector<8x512xf32> to vector<8x128xf32>
    %cst_81 = arith.constant 5.000000e-01 : f32
    %220 = vector.broadcast %cst_81 : f32 to vector<8x128xf32>
    %221 = arith.mulf %220, %219 : vector<8x128xf32>
    %222 = math.tanh %221 : vector<8x128xf32>
    %cst_82 = arith.constant 5.000000e-01 : f32
    %223 = vector.broadcast %cst_82 : f32 to vector<8x128xf32>
    %224 = arith.mulf %223, %222 : vector<8x128xf32>
    %cst_83 = arith.constant 5.000000e-01 : f32
    %225 = vector.broadcast %cst_83 : f32 to vector<8x128xf32>
    %226 = arith.addf %225, %224 : vector<8x128xf32>
    %227 = vector.extract_strided_slice %210 {offsets = [0, 256], sizes = [8, 128], strides = [1, 1]} : vector<8x512xf32> to vector<8x128xf32>
    %228 = math.tanh %227 : vector<8x128xf32>
    %229 = vector.extract_strided_slice %210 {offsets = [0, 384], sizes = [8, 128], strides = [1, 1]} : vector<8x512xf32> to vector<8x128xf32>
    %cst_84 = arith.constant 5.000000e-01 : f32
    %230 = vector.broadcast %cst_84 : f32 to vector<8x128xf32>
    %231 = arith.mulf %230, %229 : vector<8x128xf32>
    %232 = math.tanh %231 : vector<8x128xf32>
    %cst_85 = arith.constant 5.000000e-01 : f32
    %233 = vector.broadcast %cst_85 : f32 to vector<8x128xf32>
    %234 = arith.mulf %233, %232 : vector<8x128xf32>
    %cst_86 = arith.constant 5.000000e-01 : f32
    %235 = vector.broadcast %cst_86 : f32 to vector<8x128xf32>
    %236 = arith.addf %235, %234 : vector<8x128xf32>
    %237 = arith.mulf %226, %199 : vector<8x128xf32>
    %238 = arith.mulf %218, %228 : vector<8x128xf32>
    %239 = arith.addf %237, %238 : vector<8x128xf32>
    %240 = math.tanh %239 : vector<8x128xf32>
    %241 = arith.mulf %236, %240 : vector<8x128xf32>
    %c8_i32_87 = arith.constant 8 : i32
    %242 = arith.muli %c5_i32, %c8_i32_87 : i32
    %243 = tpu.assume_multiple %242, 8 : i32
    %244 = arith.index_cast %243 : i32 to index
    %c0_88 = arith.constant 0 : index
    %245 = vector.load %arg14[%244, %c0_88] : memref<64x128xf32, #tpu.memory_space<vmem>>, vector<8x128xf32>
    tpu.vector_store %arg14[%244, %c0_88], %241 {strides = array<i32>} : memref<64x128xf32, #tpu.memory_space<vmem>>, vector<8x128xf32>,
    %c6_i32 = arith.constant 6 : i32
    %246 = arith.index_cast %c6_i32 : i32 to index
    %c0_89 = arith.constant 0 : index
    %c0_90 = arith.constant 0 : index
    %247 = vector.load %arg2[%246, %c0_89, %c0_90] : memref<8x8x512xf32, #tpu.memory_space<vmem>>, vector<1x8x512xf32>
    %248 = vector.shape_cast %247 : vector<1x8x512xf32> to vector<8x512xf32>
    %cst_91 = arith.constant dense<0.000000e+00> : vector<8x512xf32>
    %249 = tpu.matmul %241, %3, %cst_91 {dimension_numbers = #tpu.dot_dimension_numbers<[1], [0], [0], [1], [0, 0, 1, 1], [], []>} : vector<8x128xf32>, vector<128x512xf32>, vector<8x512xf32> -> vector<8x512xf32>
    %250 = arith.addf %248, %249 : vector<8x512xf32>
    %251 = vector.extract_strided_slice %250 {offsets = [0, 0], sizes = [8, 128], strides = [1, 1]} : vector<8x512xf32> to vector<8x128xf32>
    %cst_92 = arith.constant 5.000000e-01 : f32
    %252 = vector.broadcast %cst_92 : f32 to vector<8x128xf32>
    %253 = arith.mulf %252, %251 : vector<8x128xf32>
    %254 = math.tanh %253 : vector<8x128xf32>
    %cst_93 = arith.constant 5.000000e-01 : f32
    %255 = vector.broadcast %cst_93 : f32 to vector<8x128xf32>
    %256 = arith.mulf %255, %254 : vector<8x128xf32>
    %cst_94 = arith.constant 5.000000e-01 : f32
    %257 = vector.broadcast %cst_94 : f32 to vector<8x128xf32>
    %258 = arith.addf %257, %256 : vector<8x128xf32>
    %259 = vector.extract_strided_slice %250 {offsets = [0, 128], sizes = [8, 128], strides = [1, 1]} : vector<8x512xf32> to vector<8x128xf32>
    %cst_95 = arith.constant 5.000000e-01 : f32
    %260 = vector.broadcast %cst_95 : f32 to vector<8x128xf32>
    %261 = arith.mulf %260, %259 : vector<8x128xf32>
    %262 = math.tanh %261 : vector<8x128xf32>
    %cst_96 = arith.constant 5.000000e-01 : f32
    %263 = vector.broadcast %cst_96 : f32 to vector<8x128xf32>
    %264 = arith.mulf %263, %262 : vector<8x128xf32>
    %cst_97 = arith.constant 5.000000e-01 : f32
    %265 = vector.broadcast %cst_97 : f32 to vector<8x128xf32>
    %266 = arith.addf %265, %264 : vector<8x128xf32>
    %267 = vector.extract_strided_slice %250 {offsets = [0, 256], sizes = [8, 128], strides = [1, 1]} : vector<8x512xf32> to vector<8x128xf32>
    %268 = math.tanh %267 : vector<8x128xf32>
    %269 = vector.extract_strided_slice %250 {offsets = [0, 384], sizes = [8, 128], strides = [1, 1]} : vector<8x512xf32> to vector<8x128xf32>
    %cst_98 = arith.constant 5.000000e-01 : f32
    %270 = vector.broadcast %cst_98 : f32 to vector<8x128xf32>
    %271 = arith.mulf %270, %269 : vector<8x128xf32>
    %272 = math.tanh %271 : vector<8x128xf32>
    %cst_99 = arith.constant 5.000000e-01 : f32
    %273 = vector.broadcast %cst_99 : f32 to vector<8x128xf32>
    %274 = arith.mulf %273, %272 : vector<8x128xf32>
    %cst_100 = arith.constant 5.000000e-01 : f32
    %275 = vector.broadcast %cst_100 : f32 to vector<8x128xf32>
    %276 = arith.addf %275, %274 : vector<8x128xf32>
    %277 = arith.mulf %266, %239 : vector<8x128xf32>
    %278 = arith.mulf %258, %268 : vector<8x128xf32>
    %279 = arith.addf %277, %278 : vector<8x128xf32>
    %280 = math.tanh %279 : vector<8x128xf32>
    %281 = arith.mulf %276, %280 : vector<8x128xf32>
    %c8_i32_101 = arith.constant 8 : i32
    %282 = arith.muli %c6_i32, %c8_i32_101 : i32
    %283 = tpu.assume_multiple %282, 8 : i32
    %284 = arith.index_cast %283 : i32 to index
    %c0_102 = arith.constant 0 : index
    %285 = vector.load %arg14[%284, %c0_102] : memref<64x128xf32, #tpu.memory_space<vmem>>, vector<8x128xf32>
    tpu.vector_store %arg14[%284, %c0_102], %281 {strides = array<i32>} : memref<64x128xf32, #tpu.memory_space<vmem>>, vector<8x128xf32>,
    %c7_i32 = arith.constant 7 : i32
    %286 = arith.index_cast %c7_i32 : i32 to index
    %c0_103 = arith.constant 0 : index
    %c0_104 = arith.constant 0 : index
    %287 = vector.load %arg2[%286, %c0_103, %c0_104] : memref<8x8x512xf32, #tpu.memory_space<vmem>>, vector<1x8x512xf32>
    %288 = vector.shape_cast %287 : vector<1x8x512xf32> to vector<8x512xf32>
    %cst_105 = arith.constant dense<0.000000e+00> : vector<8x512xf32>
    %289 = tpu.matmul %281, %3, %cst_105 {dimension_numbers = #tpu.dot_dimension_numbers<[1], [0], [0], [1], [0, 0, 1, 1], [], []>} : vector<8x128xf32>, vector<128x512xf32>, vector<8x512xf32> -> vector<8x512xf32>
    %290 = arith.addf %288, %289 : vector<8x512xf32>
    %291 = vector.extract_strided_slice %290 {offsets = [0, 0], sizes = [8, 128], strides = [1, 1]} : vector<8x512xf32> to vector<8x128xf32>
    %cst_106 = arith.constant 5.000000e-01 : f32
    %292 = vector.broadcast %cst_106 : f32 to vector<8x128xf32>
    %293 = arith.mulf %292, %291 : vector<8x128xf32>
    %294 = math.tanh %293 : vector<8x128xf32>
    %cst_107 = arith.constant 5.000000e-01 : f32
    %295 = vector.broadcast %cst_107 : f32 to vector<8x128xf32>
    %296 = arith.mulf %295, %294 : vector<8x128xf32>
    %cst_108 = arith.constant 5.000000e-01 : f32
    %297 = vector.broadcast %cst_108 : f32 to vector<8x128xf32>
    %298 = arith.addf %297, %296 : vector<8x128xf32>
    %299 = vector.extract_strided_slice %290 {offsets = [0, 128], sizes = [8, 128], strides = [1, 1]} : vector<8x512xf32> to vector<8x128xf32>
    %cst_109 = arith.constant 5.000000e-01 : f32
    %300 = vector.broadcast %cst_109 : f32 to vector<8x128xf32>
    %301 = arith.mulf %300, %299 : vector<8x128xf32>
    %302 = math.tanh %301 : vector<8x128xf32>
    %cst_110 = arith.constant 5.000000e-01 : f32
    %303 = vector.broadcast %cst_110 : f32 to vector<8x128xf32>
    %304 = arith.mulf %303, %302 : vector<8x128xf32>
    %cst_111 = arith.constant 5.000000e-01 : f32
    %305 = vector.broadcast %cst_111 : f32 to vector<8x128xf32>
    %306 = arith.addf %305, %304 : vector<8x128xf32>
    %307 = vector.extract_strided_slice %290 {offsets = [0, 256], sizes = [8, 128], strides = [1, 1]} : vector<8x512xf32> to vector<8x128xf32>
    %308 = math.tanh %307 : vector<8x128xf32>
    %309 = vector.extract_strided_slice %290 {offsets = [0, 384], sizes = [8, 128], strides = [1, 1]} : vector<8x512xf32> to vector<8x128xf32>
    %cst_112 = arith.constant 5.000000e-01 : f32
    %310 = vector.broadcast %cst_112 : f32 to vector<8x128xf32>
    %311 = arith.mulf %310, %309 : vector<8x128xf32>
    %312 = math.tanh %311 : vector<8x128xf32>
    %cst_113 = arith.constant 5.000000e-01 : f32
    %313 = vector.broadcast %cst_113 : f32 to vector<8x128xf32>
    %314 = arith.mulf %313, %312 : vector<8x128xf32>
    %cst_114 = arith.constant 5.000000e-01 : f32
    %315 = vector.broadcast %cst_114 : f32 to vector<8x128xf32>
    %316 = arith.addf %315, %314 : vector<8x128xf32>
    %317 = arith.mulf %306, %279 : vector<8x128xf32>
    %318 = arith.mulf %298, %308 : vector<8x128xf32>
    %319 = arith.addf %317, %318 : vector<8x128xf32>
    %320 = math.tanh %319 : vector<8x128xf32>
    %321 = arith.mulf %316, %320 : vector<8x128xf32>
    %c8_i32_115 = arith.constant 8 : i32
    %322 = arith.muli %c7_i32, %c8_i32_115 : i32
    %323 = tpu.assume_multiple %322, 8 : i32
    %324 = arith.index_cast %323 : i32 to index
    %c0_116 = arith.constant 0 : index
    %325 = vector.load %arg14[%324, %c0_116] : memref<64x128xf32, #tpu.memory_space<vmem>>, vector<8x128xf32>
    tpu.vector_store %arg14[%324, %c0_116], %321 {strides = array<i32>} : memref<64x128xf32, #tpu.memory_space<vmem>>, vector<8x128xf32>,
    %c8_i32_117 = arith.constant 8 : i32
    %c0_118 = arith.constant 0 : index
    %c0_119 = arith.constant 0 : index
    %326 = vector.load %arg10[%c0_118, %c0_119] : memref<8x128xf32, #tpu.memory_space<vmem>>, vector<8x128xf32>
    tpu.vector_store %arg10[%c0_118, %c0_119], %321 {strides = array<i32>} : memref<8x128xf32, #tpu.memory_space<vmem>>, vector<8x128xf32>,
    %c0_120 = arith.constant 0 : index
    %c0_121 = arith.constant 0 : index
    %327 = vector.load %arg12[%c0_120, %c0_121] : memref<8x128xf32, #tpu.memory_space<vmem>>, vector<8x128xf32>
    tpu.vector_store %arg12[%c0_120, %c0_121], %319 {strides = array<i32>} : memref<8x128xf32, #tpu.memory_space<vmem>>, vector<8x128xf32>,
    %c0_122 = arith.constant 0 : index
    %c0_123 = arith.constant 0 : index
    %328 = vector.load %arg14[%c0_122, %c0_123] : memref<64x128xf32, #tpu.memory_space<vmem>>, vector<64x128xf32>
    %c0_124 = arith.constant 0 : index
    %c0_125 = arith.constant 0 : index
    %329 = vector.load %arg5[%c0_124, %c0_125] : memref<128x512xf32, #tpu.memory_space<vmem>>, vector<128x512xf32>
    %cst_126 = arith.constant dense<0.000000e+00> : vector<64x512xf32>
    %330 = tpu.matmul %328, %329, %cst_126 {dimension_numbers = #tpu.dot_dimension_numbers<[1], [0], [0], [1], [0, 0, 1, 1], [], []>} : vector<64x128xf32>, vector<128x512xf32>, vector<64x512xf32> -> vector<64x512xf32>
    %c0_127 = arith.constant 0 : index
    %c0_128 = arith.constant 0 : index
    %331 = vector.load %arg6[%c0_127, %c0_128] : memref<1x512xf32, #tpu.memory_space<vmem>>, vector<1x512xf32>
    %332 = vector.broadcast %331 : vector<1x512xf32> to vector<64x512xf32>
    %333 = arith.addf %330, %332 : vector<64x512xf32>
    %c0_129 = arith.constant 0 : index
    %c0_130 = arith.constant 0 : index
    %334 = vector.load %arg15[%c0_129, %c0_130] : memref<64x512xf32, #tpu.memory_space<vmem>>, vector<64x512xf32>
    tpu.vector_store %arg15[%c0_129, %c0_130], %333 {strides = array<i32>} : memref<64x512xf32, #tpu.memory_space<vmem>>, vector<64x512xf32>,
    %c0_131 = arith.constant 0 : index
    %c0_132 = arith.constant 0 : index
    %335 = vector.load %arg4[%c0_131, %c0_132] : memref<128x512xf32, #tpu.memory_space<vmem>>, vector<128x512xf32>
    %c0_133 = arith.constant 0 : index
    %c0_134 = arith.constant 0 : index
    %336 = vector.load %arg11[%c0_133, %c0_134] : memref<8x128xf32, #tpu.memory_space<vmem>>, vector<8x128xf32>
    %c0_135 = arith.constant 0 : index
    %c0_136 = arith.constant 0 : index
    %337 = vector.load %arg13[%c0_135, %c0_136] : memref<8x128xf32, #tpu.memory_space<vmem>>, vector<8x128xf32>
    %c0_i32_137 = arith.constant 0 : i32
    %c8_i32_138 = arith.constant 8 : i32
    %338 = arith.muli %c0_i32_137, %c8_i32_138 : i32
    %339 = tpu.assume_multiple %338, 8 : i32
    %340 = arith.index_cast %339 : i32 to index
    %c0_139 = arith.constant 0 : index
    %341 = vector.load %arg15[%340, %c0_139] : memref<64x512xf32, #tpu.memory_space<vmem>>, vector<8x512xf32>
    %cst_140 = arith.constant dense<0.000000e+00> : vector<8x512xf32>
    %342 = tpu.matmul %336, %335, %cst_140 {dimension_numbers = #tpu.dot_dimension_numbers<[1], [0], [0], [1], [0, 0, 1, 1], [], []>} : vector<8x128xf32>, vector<128x512xf32>, vector<8x512xf32> -> vector<8x512xf32>
    %343 = arith.addf %341, %342 : vector<8x512xf32>
    %344 = vector.extract_strided_slice %343 {offsets = [0, 0], sizes = [8, 128], strides = [1, 1]} : vector<8x512xf32> to vector<8x128xf32>
    %cst_141 = arith.constant 5.000000e-01 : f32
    %345 = vector.broadcast %cst_141 : f32 to vector<8x128xf32>
    %346 = arith.mulf %345, %344 : vector<8x128xf32>
    %347 = math.tanh %346 : vector<8x128xf32>
    %cst_142 = arith.constant 5.000000e-01 : f32
    %348 = vector.broadcast %cst_142 : f32 to vector<8x128xf32>
    %349 = arith.mulf %348, %347 : vector<8x128xf32>
    %cst_143 = arith.constant 5.000000e-01 : f32
    %350 = vector.broadcast %cst_143 : f32 to vector<8x128xf32>
    %351 = arith.addf %350, %349 : vector<8x128xf32>
    %352 = vector.extract_strided_slice %343 {offsets = [0, 128], sizes = [8, 128], strides = [1, 1]} : vector<8x512xf32> to vector<8x128xf32>
    %cst_144 = arith.constant 5.000000e-01 : f32
    %353 = vector.broadcast %cst_144 : f32 to vector<8x128xf32>
    %354 = arith.mulf %353, %352 : vector<8x128xf32>
    %355 = math.tanh %354 : vector<8x128xf32>
    %cst_145 = arith.constant 5.000000e-01 : f32
    %356 = vector.broadcast %cst_145 : f32 to vector<8x128xf32>
    %357 = arith.mulf %356, %355 : vector<8x128xf32>
    %cst_146 = arith.constant 5.000000e-01 : f32
    %358 = vector.broadcast %cst_146 : f32 to vector<8x128xf32>
    %359 = arith.addf %358, %357 : vector<8x128xf32>
    %360 = vector.extract_strided_slice %343 {offsets = [0, 256], sizes = [8, 128], strides = [1, 1]} : vector<8x512xf32> to vector<8x128xf32>
    %361 = math.tanh %360 : vector<8x128xf32>
    %362 = vector.extract_strided_slice %343 {offsets = [0, 384], sizes = [8, 128], strides = [1, 1]} : vector<8x512xf32> to vector<8x128xf32>
    %cst_147 = arith.constant 5.000000e-01 : f32
    %363 = vector.broadcast %cst_147 : f32 to vector<8x128xf32>
    %364 = arith.mulf %363, %362 : vector<8x128xf32>
    %365 = math.tanh %364 : vector<8x128xf32>
    %cst_148 = arith.constant 5.000000e-01 : f32
    %366 = vector.broadcast %cst_148 : f32 to vector<8x128xf32>
    %367 = arith.mulf %366, %365 : vector<8x128xf32>
    %cst_149 = arith.constant 5.000000e-01 : f32
    %368 = vector.broadcast %cst_149 : f32 to vector<8x128xf32>
    %369 = arith.addf %368, %367 : vector<8x128xf32>
    %370 = arith.mulf %359, %337 : vector<8x128xf32>
    %371 = arith.mulf %351, %361 : vector<8x128xf32>
    %372 = arith.addf %370, %371 : vector<8x128xf32>
    %373 = math.tanh %372 : vector<8x128xf32>
    %374 = arith.mulf %369, %373 : vector<8x128xf32>
    %c8_i32_150 = arith.constant 8 : i32
    %375 = arith.muli %c0_i32_137, %c8_i32_150 : i32
    %376 = tpu.assume_multiple %375, 8 : i32
    %377 = arith.index_cast %376 : i32 to index
    %c0_151 = arith.constant 0 : index
    %378 = vector.load %arg14[%377, %c0_151] : memref<64x128xf32, #tpu.memory_space<vmem>>, vector<8x128xf32>
    tpu.vector_store %arg14[%377, %c0_151], %374 {strides = array<i32>} : memref<64x128xf32, #tpu.memory_space<vmem>>, vector<8x128xf32>,
    %c1_i32_152 = arith.constant 1 : i32
    %c8_i32_153 = arith.constant 8 : i32
    %379 = arith.muli %c1_i32_152, %c8_i32_153 : i32
    %380 = tpu.assume_multiple %379, 8 : i32
    %381 = arith.index_cast %380 : i32 to index
    %c0_154 = arith.constant 0 : index
    %382 = vector.load %arg15[%381, %c0_154] : memref<64x512xf32, #tpu.memory_space<vmem>>, vector<8x512xf32>
    %cst_155 = arith.constant dense<0.000000e+00> : vector<8x512xf32>
    %383 = tpu.matmul %374, %335, %cst_155 {dimension_numbers = #tpu.dot_dimension_numbers<[1], [0], [0], [1], [0, 0, 1, 1], [], []>} : vector<8x128xf32>, vector<128x512xf32>, vector<8x512xf32> -> vector<8x512xf32>
    %384 = arith.addf %382, %383 : vector<8x512xf32>
    %385 = vector.extract_strided_slice %384 {offsets = [0, 0], sizes = [8, 128], strides = [1, 1]} : vector<8x512xf32> to vector<8x128xf32>
    %cst_156 = arith.constant 5.000000e-01 : f32
    %386 = vector.broadcast %cst_156 : f32 to vector<8x128xf32>
    %387 = arith.mulf %386, %385 : vector<8x128xf32>
    %388 = math.tanh %387 : vector<8x128xf32>
    %cst_157 = arith.constant 5.000000e-01 : f32
    %389 = vector.broadcast %cst_157 : f32 to vector<8x128xf32>
    %390 = arith.mulf %389, %388 : vector<8x128xf32>
    %cst_158 = arith.constant 5.000000e-01 : f32
    %391 = vector.broadcast %cst_158 : f32 to vector<8x128xf32>
    %392 = arith.addf %391, %390 : vector<8x128xf32>
    %393 = vector.extract_strided_slice %384 {offsets = [0, 128], sizes = [8, 128], strides = [1, 1]} : vector<8x512xf32> to vector<8x128xf32>
    %cst_159 = arith.constant 5.000000e-01 : f32
    %394 = vector.broadcast %cst_159 : f32 to vector<8x128xf32>
    %395 = arith.mulf %394, %393 : vector<8x128xf32>
    %396 = math.tanh %395 : vector<8x128xf32>
    %cst_160 = arith.constant 5.000000e-01 : f32
    %397 = vector.broadcast %cst_160 : f32 to vector<8x128xf32>
    %398 = arith.mulf %397, %396 : vector<8x128xf32>
    %cst_161 = arith.constant 5.000000e-01 : f32
    %399 = vector.broadcast %cst_161 : f32 to vector<8x128xf32>
    %400 = arith.addf %399, %398 : vector<8x128xf32>
    %401 = vector.extract_strided_slice %384 {offsets = [0, 256], sizes = [8, 128], strides = [1, 1]} : vector<8x512xf32> to vector<8x128xf32>
    %402 = math.tanh %401 : vector<8x128xf32>
    %403 = vector.extract_strided_slice %384 {offsets = [0, 384], sizes = [8, 128], strides = [1, 1]} : vector<8x512xf32> to vector<8x128xf32>
    %cst_162 = arith.constant 5.000000e-01 : f32
    %404 = vector.broadcast %cst_162 : f32 to vector<8x128xf32>
    %405 = arith.mulf %404, %403 : vector<8x128xf32>
    %406 = math.tanh %405 : vector<8x128xf32>
    %cst_163 = arith.constant 5.000000e-01 : f32
    %407 = vector.broadcast %cst_163 : f32 to vector<8x128xf32>
    %408 = arith.mulf %407, %406 : vector<8x128xf32>
    %cst_164 = arith.constant 5.000000e-01 : f32
    %409 = vector.broadcast %cst_164 : f32 to vector<8x128xf32>
    %410 = arith.addf %409, %408 : vector<8x128xf32>
    %411 = arith.mulf %400, %372 : vector<8x128xf32>
    %412 = arith.mulf %392, %402 : vector<8x128xf32>
    %413 = arith.addf %411, %412 : vector<8x128xf32>
    %414 = math.tanh %413 : vector<8x128xf32>
    %415 = arith.mulf %410, %414 : vector<8x128xf32>
    %c8_i32_165 = arith.constant 8 : i32
    %416 = arith.muli %c1_i32_152, %c8_i32_165 : i32
    %417 = tpu.assume_multiple %416, 8 : i32
    %418 = arith.index_cast %417 : i32 to index
    %c0_166 = arith.constant 0 : index
    %419 = vector.load %arg14[%418, %c0_166] : memref<64x128xf32, #tpu.memory_space<vmem>>, vector<8x128xf32>
    tpu.vector_store %arg14[%418, %c0_166], %415 {strides = array<i32>} : memref<64x128xf32, #tpu.memory_space<vmem>>, vector<8x128xf32>,
    %c2_i32_167 = arith.constant 2 : i32
    %c8_i32_168 = arith.constant 8 : i32
    %420 = arith.muli %c2_i32_167, %c8_i32_168 : i32
    %421 = tpu.assume_multiple %420, 8 : i32
    %422 = arith.index_cast %421 : i32 to index
    %c0_169 = arith.constant 0 : index
    %423 = vector.load %arg15[%422, %c0_169] : memref<64x512xf32, #tpu.memory_space<vmem>>, vector<8x512xf32>
    %cst_170 = arith.constant dense<0.000000e+00> : vector<8x512xf32>
    %424 = tpu.matmul %415, %335, %cst_170 {dimension_numbers = #tpu.dot_dimension_numbers<[1], [0], [0], [1], [0, 0, 1, 1], [], []>} : vector<8x128xf32>, vector<128x512xf32>, vector<8x512xf32> -> vector<8x512xf32>
    %425 = arith.addf %423, %424 : vector<8x512xf32>
    %426 = vector.extract_strided_slice %425 {offsets = [0, 0], sizes = [8, 128], strides = [1, 1]} : vector<8x512xf32> to vector<8x128xf32>
    %cst_171 = arith.constant 5.000000e-01 : f32
    %427 = vector.broadcast %cst_171 : f32 to vector<8x128xf32>
    %428 = arith.mulf %427, %426 : vector<8x128xf32>
    %429 = math.tanh %428 : vector<8x128xf32>
    %cst_172 = arith.constant 5.000000e-01 : f32
    %430 = vector.broadcast %cst_172 : f32 to vector<8x128xf32>
    %431 = arith.mulf %430, %429 : vector<8x128xf32>
    %cst_173 = arith.constant 5.000000e-01 : f32
    %432 = vector.broadcast %cst_173 : f32 to vector<8x128xf32>
    %433 = arith.addf %432, %431 : vector<8x128xf32>
    %434 = vector.extract_strided_slice %425 {offsets = [0, 128], sizes = [8, 128], strides = [1, 1]} : vector<8x512xf32> to vector<8x128xf32>
    %cst_174 = arith.constant 5.000000e-01 : f32
    %435 = vector.broadcast %cst_174 : f32 to vector<8x128xf32>
    %436 = arith.mulf %435, %434 : vector<8x128xf32>
    %437 = math.tanh %436 : vector<8x128xf32>
    %cst_175 = arith.constant 5.000000e-01 : f32
    %438 = vector.broadcast %cst_175 : f32 to vector<8x128xf32>
    %439 = arith.mulf %438, %437 : vector<8x128xf32>
    %cst_176 = arith.constant 5.000000e-01 : f32
    %440 = vector.broadcast %cst_176 : f32 to vector<8x128xf32>
    %441 = arith.addf %440, %439 : vector<8x128xf32>
    %442 = vector.extract_strided_slice %425 {offsets = [0, 256], sizes = [8, 128], strides = [1, 1]} : vector<8x512xf32> to vector<8x128xf32>
    %443 = math.tanh %442 : vector<8x128xf32>
    %444 = vector.extract_strided_slice %425 {offsets = [0, 384], sizes = [8, 128], strides = [1, 1]} : vector<8x512xf32> to vector<8x128xf32>
    %cst_177 = arith.constant 5.000000e-01 : f32
    %445 = vector.broadcast %cst_177 : f32 to vector<8x128xf32>
    %446 = arith.mulf %445, %444 : vector<8x128xf32>
    %447 = math.tanh %446 : vector<8x128xf32>
    %cst_178 = arith.constant 5.000000e-01 : f32
    %448 = vector.broadcast %cst_178 : f32 to vector<8x128xf32>
    %449 = arith.mulf %448, %447 : vector<8x128xf32>
    %cst_179 = arith.constant 5.000000e-01 : f32
    %450 = vector.broadcast %cst_179 : f32 to vector<8x128xf32>
    %451 = arith.addf %450, %449 : vector<8x128xf32>
    %452 = arith.mulf %441, %413 : vector<8x128xf32>
    %453 = arith.mulf %433, %443 : vector<8x128xf32>
    %454 = arith.addf %452, %453 : vector<8x128xf32>
    %455 = math.tanh %454 : vector<8x128xf32>
    %456 = arith.mulf %451, %455 : vector<8x128xf32>
    %c8_i32_180 = arith.constant 8 : i32
    %457 = arith.muli %c2_i32_167, %c8_i32_180 : i32
    %458 = tpu.assume_multiple %457, 8 : i32
    %459 = arith.index_cast %458 : i32 to index
    %c0_181 = arith.constant 0 : index
    %460 = vector.load %arg14[%459, %c0_181] : memref<64x128xf32, #tpu.memory_space<vmem>>, vector<8x128xf32>
    tpu.vector_store %arg14[%459, %c0_181], %456 {strides = array<i32>} : memref<64x128xf32, #tpu.memory_space<vmem>>, vector<8x128xf32>,
    %c3_i32_182 = arith.constant 3 : i32
    %c8_i32_183 = arith.constant 8 : i32
    %461 = arith.muli %c3_i32_182, %c8_i32_183 : i32
    %462 = tpu.assume_multiple %461, 8 : i32
    %463 = arith.index_cast %462 : i32 to index
    %c0_184 = arith.constant 0 : index
    %464 = vector.load %arg15[%463, %c0_184] : memref<64x512xf32, #tpu.memory_space<vmem>>, vector<8x512xf32>
    %cst_185 = arith.constant dense<0.000000e+00> : vector<8x512xf32>
    %465 = tpu.matmul %456, %335, %cst_185 {dimension_numbers = #tpu.dot_dimension_numbers<[1], [0], [0], [1], [0, 0, 1, 1], [], []>} : vector<8x128xf32>, vector<128x512xf32>, vector<8x512xf32> -> vector<8x512xf32>
    %466 = arith.addf %464, %465 : vector<8x512xf32>
    %467 = vector.extract_strided_slice %466 {offsets = [0, 0], sizes = [8, 128], strides = [1, 1]} : vector<8x512xf32> to vector<8x128xf32>
    %cst_186 = arith.constant 5.000000e-01 : f32
    %468 = vector.broadcast %cst_186 : f32 to vector<8x128xf32>
    %469 = arith.mulf %468, %467 : vector<8x128xf32>
    %470 = math.tanh %469 : vector<8x128xf32>
    %cst_187 = arith.constant 5.000000e-01 : f32
    %471 = vector.broadcast %cst_187 : f32 to vector<8x128xf32>
    %472 = arith.mulf %471, %470 : vector<8x128xf32>
    %cst_188 = arith.constant 5.000000e-01 : f32
    %473 = vector.broadcast %cst_188 : f32 to vector<8x128xf32>
    %474 = arith.addf %473, %472 : vector<8x128xf32>
    %475 = vector.extract_strided_slice %466 {offsets = [0, 128], sizes = [8, 128], strides = [1, 1]} : vector<8x512xf32> to vector<8x128xf32>
    %cst_189 = arith.constant 5.000000e-01 : f32
    %476 = vector.broadcast %cst_189 : f32 to vector<8x128xf32>
    %477 = arith.mulf %476, %475 : vector<8x128xf32>
    %478 = math.tanh %477 : vector<8x128xf32>
    %cst_190 = arith.constant 5.000000e-01 : f32
    %479 = vector.broadcast %cst_190 : f32 to vector<8x128xf32>
    %480 = arith.mulf %479, %478 : vector<8x128xf32>
    %cst_191 = arith.constant 5.000000e-01 : f32
    %481 = vector.broadcast %cst_191 : f32 to vector<8x128xf32>
    %482 = arith.addf %481, %480 : vector<8x128xf32>
    %483 = vector.extract_strided_slice %466 {offsets = [0, 256], sizes = [8, 128], strides = [1, 1]} : vector<8x512xf32> to vector<8x128xf32>
    %484 = math.tanh %483 : vector<8x128xf32>
    %485 = vector.extract_strided_slice %466 {offsets = [0, 384], sizes = [8, 128], strides = [1, 1]} : vector<8x512xf32> to vector<8x128xf32>
    %cst_192 = arith.constant 5.000000e-01 : f32
    %486 = vector.broadcast %cst_192 : f32 to vector<8x128xf32>
    %487 = arith.mulf %486, %485 : vector<8x128xf32>
    %488 = math.tanh %487 : vector<8x128xf32>
    %cst_193 = arith.constant 5.000000e-01 : f32
    %489 = vector.broadcast %cst_193 : f32 to vector<8x128xf32>
    %490 = arith.mulf %489, %488 : vector<8x128xf32>
    %cst_194 = arith.constant 5.000000e-01 : f32
    %491 = vector.broadcast %cst_194 : f32 to vector<8x128xf32>
    %492 = arith.addf %491, %490 : vector<8x128xf32>
    %493 = arith.mulf %482, %454 : vector<8x128xf32>
    %494 = arith.mulf %474, %484 : vector<8x128xf32>
    %495 = arith.addf %493, %494 : vector<8x128xf32>
    %496 = math.tanh %495 : vector<8x128xf32>
    %497 = arith.mulf %492, %496 : vector<8x128xf32>
    %c8_i32_195 = arith.constant 8 : i32
    %498 = arith.muli %c3_i32_182, %c8_i32_195 : i32
    %499 = tpu.assume_multiple %498, 8 : i32
    %500 = arith.index_cast %499 : i32 to index
    %c0_196 = arith.constant 0 : index
    %501 = vector.load %arg14[%500, %c0_196] : memref<64x128xf32, #tpu.memory_space<vmem>>, vector<8x128xf32>
    tpu.vector_store %arg14[%500, %c0_196], %497 {strides = array<i32>} : memref<64x128xf32, #tpu.memory_space<vmem>>, vector<8x128xf32>,
    %c4_i32_197 = arith.constant 4 : i32
    %c8_i32_198 = arith.constant 8 : i32
    %502 = arith.muli %c4_i32_197, %c8_i32_198 : i32
    %503 = tpu.assume_multiple %502, 8 : i32
    %504 = arith.index_cast %503 : i32 to index
    %c0_199 = arith.constant 0 : index
    %505 = vector.load %arg15[%504, %c0_199] : memref<64x512xf32, #tpu.memory_space<vmem>>, vector<8x512xf32>
    %cst_200 = arith.constant dense<0.000000e+00> : vector<8x512xf32>
    %506 = tpu.matmul %497, %335, %cst_200 {dimension_numbers = #tpu.dot_dimension_numbers<[1], [0], [0], [1], [0, 0, 1, 1], [], []>} : vector<8x128xf32>, vector<128x512xf32>, vector<8x512xf32> -> vector<8x512xf32>
    %507 = arith.addf %505, %506 : vector<8x512xf32>
    %508 = vector.extract_strided_slice %507 {offsets = [0, 0], sizes = [8, 128], strides = [1, 1]} : vector<8x512xf32> to vector<8x128xf32>
    %cst_201 = arith.constant 5.000000e-01 : f32
    %509 = vector.broadcast %cst_201 : f32 to vector<8x128xf32>
    %510 = arith.mulf %509, %508 : vector<8x128xf32>
    %511 = math.tanh %510 : vector<8x128xf32>
    %cst_202 = arith.constant 5.000000e-01 : f32
    %512 = vector.broadcast %cst_202 : f32 to vector<8x128xf32>
    %513 = arith.mulf %512, %511 : vector<8x128xf32>
    %cst_203 = arith.constant 5.000000e-01 : f32
    %514 = vector.broadcast %cst_203 : f32 to vector<8x128xf32>
    %515 = arith.addf %514, %513 : vector<8x128xf32>
    %516 = vector.extract_strided_slice %507 {offsets = [0, 128], sizes = [8, 128], strides = [1, 1]} : vector<8x512xf32> to vector<8x128xf32>
    %cst_204 = arith.constant 5.000000e-01 : f32
    %517 = vector.broadcast %cst_204 : f32 to vector<8x128xf32>
    %518 = arith.mulf %517, %516 : vector<8x128xf32>
    %519 = math.tanh %518 : vector<8x128xf32>
    %cst_205 = arith.constant 5.000000e-01 : f32
    %520 = vector.broadcast %cst_205 : f32 to vector<8x128xf32>
    %521 = arith.mulf %520, %519 : vector<8x128xf32>
    %cst_206 = arith.constant 5.000000e-01 : f32
    %522 = vector.broadcast %cst_206 : f32 to vector<8x128xf32>
    %523 = arith.addf %522, %521 : vector<8x128xf32>
    %524 = vector.extract_strided_slice %507 {offsets = [0, 256], sizes = [8, 128], strides = [1, 1]} : vector<8x512xf32> to vector<8x128xf32>
    %525 = math.tanh %524 : vector<8x128xf32>
    %526 = vector.extract_strided_slice %507 {offsets = [0, 384], sizes = [8, 128], strides = [1, 1]} : vector<8x512xf32> to vector<8x128xf32>
    %cst_207 = arith.constant 5.000000e-01 : f32
    %527 = vector.broadcast %cst_207 : f32 to vector<8x128xf32>
    %528 = arith.mulf %527, %526 : vector<8x128xf32>
    %529 = math.tanh %528 : vector<8x128xf32>
    %cst_208 = arith.constant 5.000000e-01 : f32
    %530 = vector.broadcast %cst_208 : f32 to vector<8x128xf32>
    %531 = arith.mulf %530, %529 : vector<8x128xf32>
    %cst_209 = arith.constant 5.000000e-01 : f32
    %532 = vector.broadcast %cst_209 : f32 to vector<8x128xf32>
    %533 = arith.addf %532, %531 : vector<8x128xf32>
    %534 = arith.mulf %523, %495 : vector<8x128xf32>
    %535 = arith.mulf %515, %525 : vector<8x128xf32>
    %536 = arith.addf %534, %535 : vector<8x128xf32>
    %537 = math.tanh %536 : vector<8x128xf32>
    %538 = arith.mulf %533, %537 : vector<8x128xf32>
    %c8_i32_210 = arith.constant 8 : i32
    %539 = arith.muli %c4_i32_197, %c8_i32_210 : i32
    %540 = tpu.assume_multiple %539, 8 : i32
    %541 = arith.index_cast %540 : i32 to index
    %c0_211 = arith.constant 0 : index
    %542 = vector.load %arg14[%541, %c0_211] : memref<64x128xf32, #tpu.memory_space<vmem>>, vector<8x128xf32>
    tpu.vector_store %arg14[%541, %c0_211], %538 {strides = array<i32>} : memref<64x128xf32, #tpu.memory_space<vmem>>, vector<8x128xf32>,
    %c5_i32_212 = arith.constant 5 : i32
    %c8_i32_213 = arith.constant 8 : i32
    %543 = arith.muli %c5_i32_212, %c8_i32_213 : i32
    %544 = tpu.assume_multiple %543, 8 : i32
    %545 = arith.index_cast %544 : i32 to index
    %c0_214 = arith.constant 0 : index
    %546 = vector.load %arg15[%545, %c0_214] : memref<64x512xf32, #tpu.memory_space<vmem>>, vector<8x512xf32>
    %cst_215 = arith.constant dense<0.000000e+00> : vector<8x512xf32>
    %547 = tpu.matmul %538, %335, %cst_215 {dimension_numbers = #tpu.dot_dimension_numbers<[1], [0], [0], [1], [0, 0, 1, 1], [], []>} : vector<8x128xf32>, vector<128x512xf32>, vector<8x512xf32> -> vector<8x512xf32>
    %548 = arith.addf %546, %547 : vector<8x512xf32>
    %549 = vector.extract_strided_slice %548 {offsets = [0, 0], sizes = [8, 128], strides = [1, 1]} : vector<8x512xf32> to vector<8x128xf32>
    %cst_216 = arith.constant 5.000000e-01 : f32
    %550 = vector.broadcast %cst_216 : f32 to vector<8x128xf32>
    %551 = arith.mulf %550, %549 : vector<8x128xf32>
    %552 = math.tanh %551 : vector<8x128xf32>
    %cst_217 = arith.constant 5.000000e-01 : f32
    %553 = vector.broadcast %cst_217 : f32 to vector<8x128xf32>
    %554 = arith.mulf %553, %552 : vector<8x128xf32>
    %cst_218 = arith.constant 5.000000e-01 : f32
    %555 = vector.broadcast %cst_218 : f32 to vector<8x128xf32>
    %556 = arith.addf %555, %554 : vector<8x128xf32>
    %557 = vector.extract_strided_slice %548 {offsets = [0, 128], sizes = [8, 128], strides = [1, 1]} : vector<8x512xf32> to vector<8x128xf32>
    %cst_219 = arith.constant 5.000000e-01 : f32
    %558 = vector.broadcast %cst_219 : f32 to vector<8x128xf32>
    %559 = arith.mulf %558, %557 : vector<8x128xf32>
    %560 = math.tanh %559 : vector<8x128xf32>
    %cst_220 = arith.constant 5.000000e-01 : f32
    %561 = vector.broadcast %cst_220 : f32 to vector<8x128xf32>
    %562 = arith.mulf %561, %560 : vector<8x128xf32>
    %cst_221 = arith.constant 5.000000e-01 : f32
    %563 = vector.broadcast %cst_221 : f32 to vector<8x128xf32>
    %564 = arith.addf %563, %562 : vector<8x128xf32>
    %565 = vector.extract_strided_slice %548 {offsets = [0, 256], sizes = [8, 128], strides = [1, 1]} : vector<8x512xf32> to vector<8x128xf32>
    %566 = math.tanh %565 : vector<8x128xf32>
    %567 = vector.extract_strided_slice %548 {offsets = [0, 384], sizes = [8, 128], strides = [1, 1]} : vector<8x512xf32> to vector<8x128xf32>
    %cst_222 = arith.constant 5.000000e-01 : f32
    %568 = vector.broadcast %cst_222 : f32 to vector<8x128xf32>
    %569 = arith.mulf %568, %567 : vector<8x128xf32>
    %570 = math.tanh %569 : vector<8x128xf32>
    %cst_223 = arith.constant 5.000000e-01 : f32
    %571 = vector.broadcast %cst_223 : f32 to vector<8x128xf32>
    %572 = arith.mulf %571, %570 : vector<8x128xf32>
    %cst_224 = arith.constant 5.000000e-01 : f32
    %573 = vector.broadcast %cst_224 : f32 to vector<8x128xf32>
    %574 = arith.addf %573, %572 : vector<8x128xf32>
    %575 = arith.mulf %564, %536 : vector<8x128xf32>
    %576 = arith.mulf %556, %566 : vector<8x128xf32>
    %577 = arith.addf %575, %576 : vector<8x128xf32>
    %578 = math.tanh %577 : vector<8x128xf32>
    %579 = arith.mulf %574, %578 : vector<8x128xf32>
    %c8_i32_225 = arith.constant 8 : i32
    %580 = arith.muli %c5_i32_212, %c8_i32_225 : i32
    %581 = tpu.assume_multiple %580, 8 : i32
    %582 = arith.index_cast %581 : i32 to index
    %c0_226 = arith.constant 0 : index
    %583 = vector.load %arg14[%582, %c0_226] : memref<64x128xf32, #tpu.memory_space<vmem>>, vector<8x128xf32>
    tpu.vector_store %arg14[%582, %c0_226], %579 {strides = array<i32>} : memref<64x128xf32, #tpu.memory_space<vmem>>, vector<8x128xf32>,
    %c6_i32_227 = arith.constant 6 : i32
    %c8_i32_228 = arith.constant 8 : i32
    %584 = arith.muli %c6_i32_227, %c8_i32_228 : i32
    %585 = tpu.assume_multiple %584, 8 : i32
    %586 = arith.index_cast %585 : i32 to index
    %c0_229 = arith.constant 0 : index
    %587 = vector.load %arg15[%586, %c0_229] : memref<64x512xf32, #tpu.memory_space<vmem>>, vector<8x512xf32>
    %cst_230 = arith.constant dense<0.000000e+00> : vector<8x512xf32>
    %588 = tpu.matmul %579, %335, %cst_230 {dimension_numbers = #tpu.dot_dimension_numbers<[1], [0], [0], [1], [0, 0, 1, 1], [], []>} : vector<8x128xf32>, vector<128x512xf32>, vector<8x512xf32> -> vector<8x512xf32>
    %589 = arith.addf %587, %588 : vector<8x512xf32>
    %590 = vector.extract_strided_slice %589 {offsets = [0, 0], sizes = [8, 128], strides = [1, 1]} : vector<8x512xf32> to vector<8x128xf32>
    %cst_231 = arith.constant 5.000000e-01 : f32
    %591 = vector.broadcast %cst_231 : f32 to vector<8x128xf32>
    %592 = arith.mulf %591, %590 : vector<8x128xf32>
    %593 = math.tanh %592 : vector<8x128xf32>
    %cst_232 = arith.constant 5.000000e-01 : f32
    %594 = vector.broadcast %cst_232 : f32 to vector<8x128xf32>
    %595 = arith.mulf %594, %593 : vector<8x128xf32>
    %cst_233 = arith.constant 5.000000e-01 : f32
    %596 = vector.broadcast %cst_233 : f32 to vector<8x128xf32>
    %597 = arith.addf %596, %595 : vector<8x128xf32>
    %598 = vector.extract_strided_slice %589 {offsets = [0, 128], sizes = [8, 128], strides = [1, 1]} : vector<8x512xf32> to vector<8x128xf32>
    %cst_234 = arith.constant 5.000000e-01 : f32
    %599 = vector.broadcast %cst_234 : f32 to vector<8x128xf32>
    %600 = arith.mulf %599, %598 : vector<8x128xf32>
    %601 = math.tanh %600 : vector<8x128xf32>
    %cst_235 = arith.constant 5.000000e-01 : f32
    %602 = vector.broadcast %cst_235 : f32 to vector<8x128xf32>
    %603 = arith.mulf %602, %601 : vector<8x128xf32>
    %cst_236 = arith.constant 5.000000e-01 : f32
    %604 = vector.broadcast %cst_236 : f32 to vector<8x128xf32>
    %605 = arith.addf %604, %603 : vector<8x128xf32>
    %606 = vector.extract_strided_slice %589 {offsets = [0, 256], sizes = [8, 128], strides = [1, 1]} : vector<8x512xf32> to vector<8x128xf32>
    %607 = math.tanh %606 : vector<8x128xf32>
    %608 = vector.extract_strided_slice %589 {offsets = [0, 384], sizes = [8, 128], strides = [1, 1]} : vector<8x512xf32> to vector<8x128xf32>
    %cst_237 = arith.constant 5.000000e-01 : f32
    %609 = vector.broadcast %cst_237 : f32 to vector<8x128xf32>
    %610 = arith.mulf %609, %608 : vector<8x128xf32>
    %611 = math.tanh %610 : vector<8x128xf32>
    %cst_238 = arith.constant 5.000000e-01 : f32
    %612 = vector.broadcast %cst_238 : f32 to vector<8x128xf32>
    %613 = arith.mulf %612, %611 : vector<8x128xf32>
    %cst_239 = arith.constant 5.000000e-01 : f32
    %614 = vector.broadcast %cst_239 : f32 to vector<8x128xf32>
    %615 = arith.addf %614, %613 : vector<8x128xf32>
    %616 = arith.mulf %605, %577 : vector<8x128xf32>
    %617 = arith.mulf %597, %607 : vector<8x128xf32>
    %618 = arith.addf %616, %617 : vector<8x128xf32>
    %619 = math.tanh %618 : vector<8x128xf32>
    %620 = arith.mulf %615, %619 : vector<8x128xf32>
    %c8_i32_240 = arith.constant 8 : i32
    %621 = arith.muli %c6_i32_227, %c8_i32_240 : i32
    %622 = tpu.assume_multiple %621, 8 : i32
    %623 = arith.index_cast %622 : i32 to index
    %c0_241 = arith.constant 0 : index
    %624 = vector.load %arg14[%623, %c0_241] : memref<64x128xf32, #tpu.memory_space<vmem>>, vector<8x128xf32>
    tpu.vector_store %arg14[%623, %c0_241], %620 {strides = array<i32>} : memref<64x128xf32, #tpu.memory_space<vmem>>, vector<8x128xf32>,
    %c7_i32_242 = arith.constant 7 : i32
    %c8_i32_243 = arith.constant 8 : i32
    %625 = arith.muli %c7_i32_242, %c8_i32_243 : i32
    %626 = tpu.assume_multiple %625, 8 : i32
    %627 = arith.index_cast %626 : i32 to index
    %c0_244 = arith.constant 0 : index
    %628 = vector.load %arg15[%627, %c0_244] : memref<64x512xf32, #tpu.memory_space<vmem>>, vector<8x512xf32>
    %cst_245 = arith.constant dense<0.000000e+00> : vector<8x512xf32>
    %629 = tpu.matmul %620, %335, %cst_245 {dimension_numbers = #tpu.dot_dimension_numbers<[1], [0], [0], [1], [0, 0, 1, 1], [], []>} : vector<8x128xf32>, vector<128x512xf32>, vector<8x512xf32> -> vector<8x512xf32>
    %630 = arith.addf %628, %629 : vector<8x512xf32>
    %631 = vector.extract_strided_slice %630 {offsets = [0, 0], sizes = [8, 128], strides = [1, 1]} : vector<8x512xf32> to vector<8x128xf32>
    %cst_246 = arith.constant 5.000000e-01 : f32
    %632 = vector.broadcast %cst_246 : f32 to vector<8x128xf32>
    %633 = arith.mulf %632, %631 : vector<8x128xf32>
    %634 = math.tanh %633 : vector<8x128xf32>
    %cst_247 = arith.constant 5.000000e-01 : f32
    %635 = vector.broadcast %cst_247 : f32 to vector<8x128xf32>
    %636 = arith.mulf %635, %634 : vector<8x128xf32>
    %cst_248 = arith.constant 5.000000e-01 : f32
    %637 = vector.broadcast %cst_248 : f32 to vector<8x128xf32>
    %638 = arith.addf %637, %636 : vector<8x128xf32>
    %639 = vector.extract_strided_slice %630 {offsets = [0, 128], sizes = [8, 128], strides = [1, 1]} : vector<8x512xf32> to vector<8x128xf32>
    %cst_249 = arith.constant 5.000000e-01 : f32
    %640 = vector.broadcast %cst_249 : f32 to vector<8x128xf32>
    %641 = arith.mulf %640, %639 : vector<8x128xf32>
    %642 = math.tanh %641 : vector<8x128xf32>
    %cst_250 = arith.constant 5.000000e-01 : f32
    %643 = vector.broadcast %cst_250 : f32 to vector<8x128xf32>
    %644 = arith.mulf %643, %642 : vector<8x128xf32>
    %cst_251 = arith.constant 5.000000e-01 : f32
    %645 = vector.broadcast %cst_251 : f32 to vector<8x128xf32>
    %646 = arith.addf %645, %644 : vector<8x128xf32>
    %647 = vector.extract_strided_slice %630 {offsets = [0, 256], sizes = [8, 128], strides = [1, 1]} : vector<8x512xf32> to vector<8x128xf32>
    %648 = math.tanh %647 : vector<8x128xf32>
    %649 = vector.extract_strided_slice %630 {offsets = [0, 384], sizes = [8, 128], strides = [1, 1]} : vector<8x512xf32> to vector<8x128xf32>
    %cst_252 = arith.constant 5.000000e-01 : f32
    %650 = vector.broadcast %cst_252 : f32 to vector<8x128xf32>
    %651 = arith.mulf %650, %649 : vector<8x128xf32>
    %652 = math.tanh %651 : vector<8x128xf32>
    %cst_253 = arith.constant 5.000000e-01 : f32
    %653 = vector.broadcast %cst_253 : f32 to vector<8x128xf32>
    %654 = arith.mulf %653, %652 : vector<8x128xf32>
    %cst_254 = arith.constant 5.000000e-01 : f32
    %655 = vector.broadcast %cst_254 : f32 to vector<8x128xf32>
    %656 = arith.addf %655, %654 : vector<8x128xf32>
    %657 = arith.mulf %646, %618 : vector<8x128xf32>
    %658 = arith.mulf %638, %648 : vector<8x128xf32>
    %659 = arith.addf %657, %658 : vector<8x128xf32>
    %660 = math.tanh %659 : vector<8x128xf32>
    %661 = arith.mulf %656, %660 : vector<8x128xf32>
    %c8_i32_255 = arith.constant 8 : i32
    %662 = arith.muli %c7_i32_242, %c8_i32_255 : i32
    %663 = tpu.assume_multiple %662, 8 : i32
    %664 = arith.index_cast %663 : i32 to index
    %c0_256 = arith.constant 0 : index
    %665 = vector.load %arg14[%664, %c0_256] : memref<64x128xf32, #tpu.memory_space<vmem>>, vector<8x128xf32>
    tpu.vector_store %arg14[%664, %c0_256], %661 {strides = array<i32>} : memref<64x128xf32, #tpu.memory_space<vmem>>, vector<8x128xf32>,
    %c8_i32_257 = arith.constant 8 : i32
    %c0_258 = arith.constant 0 : index
    %c0_259 = arith.constant 0 : index
    %666 = vector.load %arg11[%c0_258, %c0_259] : memref<8x128xf32, #tpu.memory_space<vmem>>, vector<8x128xf32>
    tpu.vector_store %arg11[%c0_258, %c0_259], %661 {strides = array<i32>} : memref<8x128xf32, #tpu.memory_space<vmem>>, vector<8x128xf32>,
    %c0_260 = arith.constant 0 : index
    %c0_261 = arith.constant 0 : index
    %667 = vector.load %arg13[%c0_260, %c0_261] : memref<8x128xf32, #tpu.memory_space<vmem>>, vector<8x128xf32>
    tpu.vector_store %arg13[%c0_260, %c0_261], %659 {strides = array<i32>} : memref<8x128xf32, #tpu.memory_space<vmem>>, vector<8x128xf32>,
    %c0_262 = arith.constant 0 : index
    %c0_263 = arith.constant 0 : index
    %668 = vector.load %arg14[%c0_262, %c0_263] : memref<64x128xf32, #tpu.memory_space<vmem>>, vector<64x128xf32>
    %c0_264 = arith.constant 0 : index
    %c0_265 = arith.constant 0 : index
    %669 = vector.load %arg7[%c0_264, %c0_265] : memref<128x128xf32, #tpu.memory_space<vmem>>, vector<128x128xf32>
    %cst_266 = arith.constant dense<0.000000e+00> : vector<64x128xf32>
    %670 = tpu.matmul %668, %669, %cst_266 {dimension_numbers = #tpu.dot_dimension_numbers<[1], [0], [0], [1], [0, 0, 1, 1], [], []>} : vector<64x128xf32>, vector<128x128xf32>, vector<64x128xf32> -> vector<64x128xf32>
    %c0_267 = arith.constant 0 : index
    %c0_268 = arith.constant 0 : index
    %671 = vector.load %arg8[%c0_267, %c0_268] : memref<1x128xf32, #tpu.memory_space<vmem>>, vector<1x128xf32>
    %672 = vector.broadcast %671 : vector<1x128xf32> to vector<64x128xf32>
    %673 = arith.addf %670, %672 : vector<64x128xf32>
    %674 = vector.shape_cast %673 : vector<64x128xf32> to vector<8x8x128xf32>
    %c0_269 = arith.constant 0 : index
    %c0_270 = arith.constant 0 : index
    %c0_271 = arith.constant 0 : index
    %675 = vector.load %arg9[%c0_269, %c0_270, %c0_271] : memref<8x8x128xf32, #tpu.memory_space<vmem>>, vector<8x8x128xf32>
    tpu.vector_store %arg9[%c0_269, %c0_270, %c0_271], %674 {strides = array<i32>} : memref<8x8x128xf32, #tpu.memory_space<vmem>>, vector<8x8x128xf32>,
    return
  }
  func.func @transform_0(%arg0: i32, %arg1: i32) -> (i32, i32, i32) {
    %c0_i32 = arith.constant 0 : i32
    %c0_i32_0 = arith.constant 0 : i32
    return %arg1, %arg0, %c0_i32 : i32, i32, i32
  }
  func.func @transform_1(%arg0: i32, %arg1: i32) -> (i32, i32) {
    %c0_i32 = arith.constant 0 : i32
    %c0_i32_0 = arith.constant 0 : i32
    %c0_i32_1 = arith.constant 0 : i32
    return %c0_i32, %c0_i32_0 : i32, i32
  }
  func.func @transform_2(%arg0: i32, %arg1: i32) -> (i32, i32) {
    %c0_i32 = arith.constant 0 : i32
    %c0_i32_0 = arith.constant 0 : i32
    %c0_i32_1 = arith.constant 0 : i32
    return %c0_i32, %c0_i32_0 : i32, i32
  }
  func.func @transform_3(%arg0: i32, %arg1: i32) -> (i32, i32) {
    %c0_i32 = arith.constant 0 : i32
    %c0_i32_0 = arith.constant 0 : i32
    %c0_i32_1 = arith.constant 0 : i32
    return %c0_i32, %c0_i32_0 : i32, i32
  }
  func.func @transform_4(%arg0: i32, %arg1: i32) -> (i32, i32) {
    %c0_i32 = arith.constant 0 : i32
    %c0_i32_0 = arith.constant 0 : i32
    %c0_i32_1 = arith.constant 0 : i32
    return %c0_i32, %c0_i32_0 : i32, i32
  }
  func.func @transform_5(%arg0: i32, %arg1: i32) -> (i32, i32) {
    %c0_i32 = arith.constant 0 : i32
    %c0_i32_0 = arith.constant 0 : i32
    %c0_i32_1 = arith.constant 0 : i32
    return %c0_i32, %c0_i32_0 : i32, i32
  }
  func.func @transform_6(%arg0: i32, %arg1: i32) -> (i32, i32) {
    %c0_i32 = arith.constant 0 : i32
    %c0_i32_0 = arith.constant 0 : i32
    %c0_i32_1 = arith.constant 0 : i32
    return %c0_i32, %c0_i32_0 : i32, i32
  }
  func.func @transform_7(%arg0: i32, %arg1: i32) -> (i32, i32, i32) {
    %c0_i32 = arith.constant 0 : i32
    %c0_i32_0 = arith.constant 0 : i32
    return %arg1, %arg0, %c0_i32 : i32, i32, i32
  }
}

</mosaic_0001>

<bundles_post_ra>
// kernel: lstm_model_forward.1
= control target key start
LH: loop header
LB: loop body
LE: loop exit
PB: predicated region body
PF: predicated region fallthrough
CT: control target
= control target key end

     0   :  { %v6828_v3 = vmov 0.0   ;;  %s6820_s1 = inlined_call_operand.vmem [shape: f32[128,512], index: 1, kind: input, shape index: {}]   ;;  %s6821_s0 = inlined_call_operand.vmem [shape: f32[8,8,512], index: 0, kind: input, shape index: {}]   ;;  %s6822_s3 = inlined_call_operand.vmem [shape: f32[128,512], index: 3, kind: input, shape index: {}]   ;;  %s6823_s2 = inlined_call_operand.vmem [shape: f32[128,512], index: 2, kind: input, shape index: {}]   ;;  %s6824_s4 = inlined_call_operand.vmem [shape: f32[1,512], index: 4, kind: input, shape index: {}]   ;;  %s6825_s5 = inlined_call_operand.vmem [shape: f32[128,128], index: 5, kind: input, shape index: {}]   ;;  %s6826_s6 = inlined_call_operand.vmem [shape: f32[1,128], index: 6, kind: input, shape index: {}]   ;;  %s6827_s7 = inlined_call_operand.vmem [shape: f32[8,8,128], index: 7, kind: output, shape index: {}]  }
   0x1   :  { %v3849_v0 = vld [vmem:[%s6820_s1 + $0x1e8] sm:$0xff]  ;;  %v3854_v1 = vld [vmem:[%s6820_s1 + $0x1e0] sm:$0xff]  ;;  %168 = vmatprep.mubr.f32.mxu1 %v6828_v3  ;;  %338 = vmatprep.mubr.f32.mxu0 %v6828_v3  ;;  %v4070_v33 = vld [vmem:[%s6820_s1 + $0x1f8] sm:$0xff] }
   0x2   :  { %7002 = vst [vmem:[#allocation8_spill] sm:$0xff] %v3849_v0  ;;  %v3859_v2 = vld [vmem:[%s6820_s1 + $0x1c8] sm:$0xff]  ;;  %104 = vmatprep.subr.mxu1 %v3849_v0  ;;  %v3867_v4 = vld [vmem:[%s6820_s1 + $0x1c0] sm:$0xff]  ;;  %274 = vmatprep.subr.mxu0 %v3849_v0  ;;  %7011 = vst [vmem:[#allocation17_spill] sm:$0xff] %v4070_v33 }
   0x3   :  { %105 = vmatpush1.msra.mxu1 %v3854_v1  ;;  %v3874_v5 = vld [vmem:[%s6820_s1 + $0x1a8] sm:$0xff]  ;;  %275 = vmatpush1.msra.mxu0 %v3854_v1  ;;  %v3881_v6 = vld [vmem:[%s6820_s1 + $0x1a0] sm:$0xff]  ;;  %v4077_v34 = vld [vmem:[%s6820_s1 + $0x1f0] sm:$0xff] }
   0x4   :  { %106 = vmatprep.subr.mxu1 %v3859_v2  ;;  %276 = vmatprep.subr.mxu0 %v3859_v2  ;;  %v3888_v7 = vld [vmem:[%s6820_s1 + $0x188] sm:$0xff]  ;;  %v3895_v8 = vld [vmem:[%s6820_s1 + $0x180] sm:$0xff]  ;;  %v4084_v35 = vld [vmem:[%s6820_s1 + $0x1d8] sm:$0xff] }
   0x5   :  { %107 = vmatpush1.msra.mxu1 %v3867_v4  ;;  %277 = vmatpush1.msra.mxu0 %v3867_v4  ;;  %v3902_v9 = vld [vmem:[%s6820_s1 + $0x168] sm:$0xff]  ;;  %v3909_v10 = vld [vmem:[%s6820_s1 + $0x160] sm:$0xff]  ;;  %v4092_v36 = vld [vmem:[%s6820_s1 + $0x1d0] sm:$0xff] }
   0x6   :  { %108 = vmatprep.subr.mxu1 %v3874_v5  ;;  %278 = vmatprep.subr.mxu0 %v3874_v5  ;;  %v3916_v11 = vld [vmem:[%s6820_s1 + $0x148] sm:$0xff]  ;;  %v3923_v12 = vld [vmem:[%s6820_s1 + $0x140] sm:$0xff]  ;;  %v4098_v37 = vld [vmem:[%s6820_s1 + $0x1b8] sm:$0xff] }
   0x7   :  { %109 = vmatpush1.msra.mxu1 %v3881_v6  ;;  %279 = vmatpush1.msra.mxu0 %v3881_v6  ;;  %v3930_v13 = vld [vmem:[%s6820_s1 + $0x128] sm:$0xff]  ;;  %v3937_v14 = vld [vmem:[%s6820_s1 + $0x120] sm:$0xff]  ;;  %v4105_v38 = vld [vmem:[%s6820_s1 + $0x1b0] sm:$0xff] }
   0x8   :  { %110 = vmatprep.subr.mxu1 %v3888_v7  ;;  %280 = vmatprep.subr.mxu0 %v3888_v7  ;;  %v3944_v15 = vld [vmem:[%s6820_s1 + $0x108] sm:$0xff]  ;;  %v3951_v16 = vld [vmem:[%s6820_s1 + $0x100] sm:$0xff]  ;;  %v4112_v39 = vld [vmem:[%s6820_s1 + $0x198] sm:$0xff] }
   0x9   :  { %111 = vmatpush1.msra.mxu1 %v3895_v8  ;;  %281 = vmatpush1.msra.mxu0 %v3895_v8  ;;  %v3958_v17 = vld [vmem:[%s6820_s1 + $0xe8] sm:$0xff]  ;;  %v3965_v18 = vld [vmem:[%s6820_s1 + $0xe0] sm:$0xff]  ;;  %v4118_v40 = vld [vmem:[%s6820_s1 + $0x190] sm:$0xff] }
   0xa   :  { %112 = vmatprep.subr.mxu1 %v3902_v9  ;;  %282 = vmatprep.subr.mxu0 %v3902_v9  ;;  %v3972_v19 = vld [vmem:[%s6820_s1 + $0xc8] sm:$0xff]  ;;  %v3979_v20 = vld [vmem:[%s6820_s1 + $0xc0] sm:$0xff]  ;;  %v4124_v41 = vld [vmem:[%s6820_s1 + $0x178] sm:$0xff] }
   0xb   :  { %113 = vmatpush1.msra.mxu1 %v3909_v10  ;;  %283 = vmatpush1.msra.mxu0 %v3909_v10  ;;  %v3986_v21 = vld [vmem:[%s6820_s1 + $0xa8] sm:$0xff]  ;;  %v3993_v22 = vld [vmem:[%s6820_s1 + $0xa0] sm:$0xff]  ;;  %v4130_v42 = vld [vmem:[%s6820_s1 + $0x170] sm:$0xff] }
   0xc   :  { %114 = vmatprep.subr.mxu1 %v3916_v11  ;;  %284 = vmatprep.subr.mxu0 %v3916_v11  ;;  %v4000_v23 = vld [vmem:[%s6820_s1 + $0x88] sm:$0xff]  ;;  %v4007_v24 = vld [vmem:[%s6820_s1 + $0x80] sm:$0xff]  ;;  %v4136_v43 = vld [vmem:[%s6820_s1 + $0x158] sm:$0xff] }
   0xd   :  { %115 = vmatpush1.msra.mxu1 %v3923_v12  ;;  %285 = vmatpush1.msra.mxu0 %v3923_v12  ;;  %v4014_v25 = vld [vmem:[%s6820_s1 + $0x68] sm:$0xff]  ;;  %v4021_v26 = vld [vmem:[%s6820_s1 + $0x60] sm:$0xff]  ;;  %v4142_v44 = vld [vmem:[%s6820_s1 + $0x150] sm:$0xff] }
   0xe   :  { %116 = vmatprep.subr.mxu1 %v3930_v13  ;;  %286 = vmatprep.subr.mxu0 %v3930_v13  ;;  %7003 = vst [vmem:[#allocation9_spill] sm:$0xff] %v4014_v25  ;;  %7004 = vst [vmem:[#allocation10_spill] sm:$0xff] %v4021_v26  ;;  %v4028_v27 = vld [vmem:[%s6820_s1 + $0x48] sm:$0xff]  ;;  %v4035_v28 = vld [vmem:[%s6820_s1 + $0x40] sm:$0xff] }
   0xf   :  { %117 = vmatpush1.msra.mxu1 %v3937_v14  ;;  %287 = vmatpush1.msra.mxu0 %v3937_v14  ;;  %7005 = vst [vmem:[#allocation11_spill] sm:$0xff] %v4028_v27  ;;  %7006 = vst [vmem:[#allocation12_spill] sm:$0xff] %v4035_v28  ;;  %v4042_v29 = vld [vmem:[%s6820_s1 + $0x28] sm:$0xff]  ;;  %v4049_v30 = vld [vmem:[%s6820_s1 + $0x20] sm:$0xff] }
  0x10   :  { %118 = vmatprep.subr.mxu1 %v3944_v15  ;;  %288 = vmatprep.subr.mxu0 %v3944_v15  ;;  %7007 = vst [vmem:[#allocation13_spill] sm:$0xff] %v4042_v29  ;;  %7008 = vst [vmem:[#allocation14_spill] sm:$0xff] %v4049_v30  ;;  %v4056_v31 = vld [vmem:[%s6820_s1 + $0x8] sm:$0xff]  ;;  %v4063_v32 = vld [vmem:[%s6820_s1] sm:$0xff] }
  0x11   :  { %119 = vmatpush1.msra.mxu1 %v3951_v16  ;;  %289 = vmatpush1.msra.mxu0 %v3951_v16  ;;  %7009 = vst [vmem:[#allocation15_spill] sm:$0xff] %v4056_v31  ;;  %7010 = vst [vmem:[#allocation16_spill] sm:$0xff] %v4063_v32  ;;  %v4148_v45 = vld [vmem:[%s6820_s1 + $0x138] sm:$0xff]  ;;  %v4154_v46 = vld [vmem:[%s6820_s1 + $0x130] sm:$0xff] }
  0x12   :  { %120 = vmatprep.subr.mxu1 %v3958_v17  ;;  %290 = vmatprep.subr.mxu0 %v3958_v17  ;;  %v4160_v47 = vld [vmem:[%s6820_s1 + $0x118] sm:$0xff]  ;;  %v4166_v48 = vld [vmem:[%s6820_s1 + $0x110] sm:$0xff] }
  0x13   :  { %121 = vmatpush1.msra.mxu1 %v3965_v18  ;;  %291 = vmatpush1.msra.mxu0 %v3965_v18  ;;  %v4172_v49 = vld [vmem:[%s6820_s1 + $0xf8] sm:$0xff]  ;;  %v4178_v50 = vld [vmem:[%s6820_s1 + $0xf0] sm:$0xff] }
  0x14   :  { %122 = vmatprep.subr.mxu1 %v3972_v19  ;;  %292 = vmatprep.subr.mxu0 %v3972_v19  ;;  %v4184_v51 = vld [vmem:[%s6820_s1 + $0xd8] sm:$0xff]  ;;  %v4190_v52 = vld [vmem:[%s6820_s1 + $0xd0] sm:$0xff] }
  0x15   :  { %123 = vmatpush1.msra.mxu1 %v3979_v20  ;;  %293 = vmatpush1.msra.mxu0 %v3979_v20  ;;  %v4196_v53 = vld [vmem:[%s6820_s1 + $0xb8] sm:$0xff]  ;;  %v4202_v54 = vld [vmem:[%s6820_s1 + $0xb0] sm:$0xff] }
  0x16   :  { %124 = vmatprep.subr.mxu1 %v3986_v21  ;;  %294 = vmatprep.subr.mxu0 %v3986_v21  ;;  %v4208_v55 = vld [vmem:[%s6820_s1 + $0x98] sm:$0xff]  ;;  %v4214_v56 = vld [vmem:[%s6820_s1 + $0x90] sm:$0xff] }
  0x17   :  { %125 = vmatpush1.msra.mxu1 %v3993_v22  ;;  %295 = vmatpush1.msra.mxu0 %v3993_v22  ;;  %v4220_v57 = vld [vmem:[%s6820_s1 + $0x78] sm:$0xff]  ;;  %v4226_v58 = vld [vmem:[%s6820_s1 + $0x70] sm:$0xff] }
  0x18   :  { %126 = vmatprep.subr.mxu1 %v4000_v23  ;;  %296 = vmatprep.subr.mxu0 %v4000_v23  ;;  %7012 = vst [vmem:[#allocation18_spill] sm:$0xff] %v4220_v57  ;;  %7013 = vst [vmem:[#allocation19_spill] sm:$0xff] %v4226_v58  ;;  %v4232_v59 = vld [vmem:[%s6820_s1 + $0x58] sm:$0xff]  ;;  %v4238_v60 = vld [vmem:[%s6820_s1 + $0x50] sm:$0xff] }
  0x19   :  { %127 = vmatpush1.msra.mxu1 %v4007_v24  ;;  %297 = vmatpush1.msra.mxu0 %v4007_v24  ;;  %7014 = vst [vmem:[#allocation20_spill] sm:$0xff] %v4232_v59  ;;  %7015 = vst [vmem:[#allocation21_spill] sm:$0xff] %v4238_v60  ;;  %v4244_v61 = vld [vmem:[%s6820_s1 + $0x38] sm:$0xff]  ;;  %v4250_v62 = vld [vmem:[%s6820_s1 + $0x30] sm:$0xff] }
  0x1a   :  { %128 = vmatprep.subr.mxu1 %v4014_v25  ;;  %298 = vmatprep.subr.mxu0 %v4014_v25  ;;  %7016 = vst [vmem:[#allocation22_spill] sm:$0xff] %v4244_v61  ;;  %7017 = vst [vmem:[#allocation23_spill] sm:$0xff] %v4250_v62  ;;  %v4256_v63 = vld [vmem:[%s6820_s1 + $0x18] sm:$0xff] }
  0x1b   :  { %129 = vmatpush1.msra.mxu1 %v4021_v26  ;;  %299 = vmatpush1.msra.mxu0 %v4021_v26  ;;  %7018 = vst [vmem:[#allocation24_spill] sm:$0xff] %v4256_v63 }
  0x1c   :  { %130 = vmatprep.subr.mxu1 %v4028_v27  ;;  %300 = vmatprep.subr.mxu0 %v4028_v27 }
  0x1d   :  { %131 = vmatpush1.msra.mxu1 %v4035_v28  ;;  %301 = vmatpush1.msra.mxu0 %v4035_v28  ;;  %v103_v28 = vld [vmem:[%s6821_s0 + $0x18] sm:$0xff] }
  0x1e   :  { %132 = vmatprep.subr.mxu1 %v4042_v29  ;;  %302 = vmatprep.subr.mxu0 %v4042_v29 }
  0x1f   :  { %133 = vmatpush1.msra.mxu1 %v4049_v30  ;;  %303 = vmatpush1.msra.mxu0 %v4049_v30  ;;  %v100_v30 = vld [vmem:[%s6821_s0] sm:$0xff] }
  0x20   :  { %134 = vmatprep.subr.mxu1 %v4056_v31  ;;  %304 = vmatprep.subr.mxu0 %v4056_v31 }
  0x21   :  { %135 = vmatpush1.msra.mxu1 %v4063_v32  ;;  %305 = vmatpush1.msra.mxu0 %v4063_v32  ;;  %v101_v32 = vld [vmem:[%s6821_s0 + $0x8] sm:$0xff] }
  0x22   :  { %169 = vmatmul.mubr.f32.vlgmr.msra.gmra.mxu1 %v6828_v3  ;;  %175 = vmatprep.subr.mxu1 %v4070_v33 }
  0x23   :  { %176 = vmatpush1.msra.mxu1 %v4077_v34  ;;  %239 = vmatprep.mubr.f32.mxu1 %v6828_v3  ;;  %v4262_v3 = vld [vmem:[%s6820_s1 + $0x10] sm:$0xff] }
  0x24   :  { %177 = vmatprep.subr.mxu1 %v4084_v35  ;;  %445 = vmatprep.subr.mxu0 %v3849_v0  ;;  %7019 = vst [vmem:[#allocation25_spill] sm:$0xff] %v4262_v3  ;;  %v7020_v0 = vmov 0.0  }
  0x25   :  { %178 = vmatpush1.msra.mxu1 %v4092_v36 }
  0x26   :  { %179 = vmatprep.subr.mxu1 %v4098_v37 }
  0x27   :  { %180 = vmatpush1.msra.mxu1 %v4105_v38 }
  0x28   :  { %181 = vmatprep.subr.mxu1 %v4112_v39 }
  0x29   :  { %182 = vmatpush1.msra.mxu1 %v4118_v40 }
  0x2a   :  { %183 = vmatprep.subr.mxu1 %v4124_v41 }
  0x2b   :  { %184 = vmatpush1.msra.mxu1 %v4130_v42 }
  0x2c   :  { %185 = vmatprep.subr.mxu1 %v4136_v43 }
  0x2d   :  { %186 = vmatpush1.msra.mxu1 %v4142_v44 }
  0x2e   :  { %187 = vmatprep.subr.mxu1 %v4148_v45 }
  0x2f   :  { %188 = vmatpush1.msra.mxu1 %v4154_v46 }
  0x30   :  { %189 = vmatprep.subr.mxu1 %v4160_v47 }
  0x31   :  { %190 = vmatpush1.msra.mxu1 %v4166_v48 }
  0x32   :  { %191 = vmatprep.subr.mxu1 %v4172_v49 }
  0x33   :  { %192 = vmatpush1.msra.mxu1 %v4178_v50 }
  0x34   :  { %193 = vmatprep.subr.mxu1 %v4184_v51 }
  0x35   :  { %194 = vmatpush1.msra.mxu1 %v4190_v52 }
  0x36   :  { %195 = vmatprep.subr.mxu1 %v4196_v53 }
  0x37   :  { %196 = vmatpush1.msra.mxu1 %v4202_v54 }
  0x38   :  { %197 = vmatprep.subr.mxu1 %v4208_v55 }
  0x39   :  { %198 = vmatpush1.msra.mxu1 %v4214_v56 }
  0x3a   :  { %199 = vmatprep.subr.mxu1 %v4220_v57 }
  0x3b   :  { %200 = vmatpush1.msra.mxu1 %v4226_v58 }
  0x3c   :  { %201 = vmatprep.subr.mxu1 %v4232_v59 }
  0x3d   :  { %202 = vmatpush1.msra.mxu1 %v4238_v60 }
  0x3e   :  { %203 = vmatprep.subr.mxu1 %v4244_v61 }
  0x3f   :  { %204 = vmatpush1.msra.mxu1 %v4250_v62 }
  0x40   :  { %205 = vmatprep.subr.mxu1 %v4256_v63 }
  0x41   :  { %206 = vmatpush1.msra.mxu1 %v4262_v3 }
  0x42   :  { %240 = vmatmul.mubr.f32.vlgmr.msra.gmra.mxu1 %v7020_v0  ;;  %345 = vmatprep.subr.mxu1 %v4070_v33 }
  0x43   :  { %346 = vmatpush1.msra.mxu1 %v4077_v34  ;;  %409 = vmatprep.mubr.f32.mxu1 %v7020_v0 }
  0x44   :  { %347 = vmatprep.subr.mxu1 %v4084_v35 }
  0x45   :  { %348 = vmatpush1.msra.mxu1 %v4092_v36 }
  0x46   :  { %349 = vmatprep.subr.mxu1 %v4098_v37 }
  0x47   :  { %350 = vmatpush1.msra.mxu1 %v4105_v38 }
  0x48   :  { %351 = vmatprep.subr.mxu1 %v4112_v39 }
  0x49   :  { %352 = vmatpush1.msra.mxu1 %v4118_v40 }
  0x4a   :  { %353 = vmatprep.subr.mxu1 %v4124_v41 }
  0x4b   :  { %354 = vmatpush1.msra.mxu1 %v4130_v42 }
  0x4c   :  { %355 = vmatprep.subr.mxu1 %v4136_v43 }
  0x4d   :  { %356 = vmatpush1.msra.mxu1 %v4142_v44 }
  0x4e   :  { %357 = vmatprep.subr.mxu1 %v4148_v45 }
  0x4f   :  { %358 = vmatpush1.msra.mxu1 %v4154_v46 }
  0x50   :  { %359 = vmatprep.subr.mxu1 %v4160_v47 }
  0x51   :  { %360 = vmatpush1.msra.mxu1 %v4166_v48 }
  0x52   :  { %361 = vmatprep.subr.mxu1 %v4172_v49 }
  0x53   :  { %362 = vmatpush1.msra.mxu1 %v4178_v50 }
  0x54   :  { %363 = vmatprep.subr.mxu1 %v4184_v51 }
  0x55   :  { %364 = vmatpush1.msra.mxu1 %v4190_v52 }
  0x56   :  { %365 = vmatprep.subr.mxu1 %v4196_v53 }
  0x57   :  { %366 = vmatpush1.msra.mxu1 %v4202_v54 }
  0x58   :  { %367 = vmatprep.subr.mxu1 %v4208_v55 }
  0x59   :  { %368 = vmatpush1.msra.mxu1 %v4214_v56 }
  0x5a   :  { %369 = vmatprep.subr.mxu1 %v4220_v57 }
  0x5b   :  { %370 = vmatpush1.msra.mxu1 %v4226_v58 }
  0x5c   :  { %371 = vmatprep.subr.mxu1 %v4232_v59 }
  0x5d   :  { %372 = vmatpush1.msra.mxu1 %v4238_v60 }
  0x5e   :  { %373 = vmatprep.subr.mxu1 %v4244_v61 }
  0x5f   :  { %374 = vmatpush1.msra.mxu1 %v4250_v62 }
  0x60   :  { %375 = vmatprep.subr.mxu1 %v4256_v63 }
  0x61   :  { %376 = vmatpush1.msra.mxu1 %v4262_v3 }
  0x62   :  { %516 = vmatprep.subr.mxu1 %v4070_v33  ;;  %v102_v33 = vld [vmem:[%s6821_s0 + $0x10] sm:$0xff] }
  0xe2   :  { %v170_v0 = vpop.f32.mrf.mxu1 }
  0xe3   :  { %v246_v61 = vadd.f32 %v170_v0, %v100_v30 }
  0xe4   :  { %v172_v31 = vpop.f32.mrf.mxu1 }
  0xe5   :  { %v247_v29 = vadd.f32 %v172_v31, %v101_v32  ;;  %v250_v62 = vmul.f32 0.5, %v246_v61 }
  0xe7   :  { %v254_v60 = vmul.f32 0.5, %v247_v29 }
  0xe9   :  { %3517 = vtanh.f32 %v254_v60 }
  0xea   :  { %3519 = vtanh.f32 %v250_v62 }
  0xf6   :  { %v3518_v58 = vpop.eup %3517 }
  0xf7   :  { %v3520_v31 = vpop.eup %3519  ;;  %v256_v0 = vmul.f32 0.5, %v3518_v58  ;;  %v7025_v58 = vld [vmem:[#allocation19_spill] sm:$0xff] }
  0xf8   :  { %v252_v30 = vmul.f32 0.5, %v3520_v31  ;;  %v7027_v31 = vld [vmem:[#allocation20_spill] sm:$0xff] }
  0xf9   :  { %v257_v32 = vadd.f32 0.5, %v256_v0  ;;  %v7028_v0 = vld [vmem:[#allocation12_spill] sm:$0xff] }
  0xfa   :  { %v253_v60 = vadd.f32 0.5, %v252_v30  ;;  %v7030_v30 = vld [vmem:[#allocation13_spill] sm:$0xff] }
  0xfb   :  { %v263_v62 = vmul.f32 0.0, %v257_v32  ;;  %v7031_v32 = vld [vmem:[#allocation22_spill] sm:$0xff] }
 0x102   :  { %v241_v3 = vpop.f32.mrf.mxu1 }
 0x103   :  { %v248_v63 = vadd.f32 %v241_v3, %v102_v33 }
 0x104   :  { %v243_v59 = vpop.f32.mrf.mxu1 }
 0x105   :  { %3521 = vtanh.f32 %v248_v63  ;;  %v249_v27 = vadd.f32 %v243_v59, %v103_v28  ;;  %v7026_v59 = vld [vmem:[#allocation11_spill] sm:$0xff] }
 0x107   :  { %v259_v29 = vmul.f32 0.5, %v249_v27  ;;  %v7024_v27 = vld [vmem:[#allocation10_spill] sm:$0xff] }
 0x109   :  { %3523 = vtanh.f32 %v259_v29  ;;  %v7029_v29 = vld [vmem:[#allocation21_spill] sm:$0xff] }
 0x112   :  { %v3522_v61 = vpop.eup %3521 }
 0x113   :  { %v264_v26 = vmul.f32 %v3522_v61, %v253_v60  ;;  %v7032_v60 = vld [vmem:[#allocation14_spill] sm:$0xff]  ;;  %v7033_v61 = vld [vmem:[#allocation23_spill] sm:$0xff] }
 0x115   :  { %v4314_v57 = vadd.f32 %v264_v26, %v263_v62  ;;  %v7023_v26 = vld [vmem:[#allocation18_spill] sm:$0xff]  ;;  %v7034_v62 = vld [vmem:[#allocation15_spill] sm:$0xff] }
 0x116   :  { %v3524_v3 = vpop.eup %3523 }
 0x117   :  { %3525 = vtanh.f32 %v4314_v57  ;;  %v261_v33 = vmul.f32 0.5, %v3524_v3  ;;  %v7035_v3 = vld [vmem:[#allocation24_spill] sm:$0xff] }
 0x119   :  { %v262_v25 = vadd.f32 0.5, %v261_v33  ;;  %v7036_v33 = vld [vmem:[#allocation16_spill] sm:$0xff] }
 0x124   :  { %v3526_v63 = vpop.eup %3525 }
 0x125   :  { %v4317_v28 = vmul.f32 %v3526_v63, %v262_v25  ;;  %v7022_v25 = vld [vmem:[#allocation9_spill] sm:$0xff]  ;;  %v7037_v63 = vmov 0.0  }
 0x127   :  { %7021 = vst [vmem:[#allocation26_spill] sm:$0xff] %v4317_v28  ;;  %339 = vmatmul.mubr.f32.vlgmr.msra.gmra.mxu0 %v4317_v28  ;;  %410 = vmatmul.mubr.f32.vlgmr.msra.gmra.mxu1 %v4317_v28  ;;  %v7038_v28 = vld [vmem:[#allocation25_spill] sm:$0xff] }
 0x128   :  { %446 = vmatpush1.msra.mxu0 %v3854_v1  ;;  %517 = vmatpush1.msra.mxu1 %v4077_v34 }
 0x129   :  { %447 = vmatprep.subr.mxu0 %v3859_v2  ;;  %518 = vmatprep.subr.mxu1 %v4084_v35 }
 0x12a   :  { %448 = vmatpush1.msra.mxu0 %v3867_v4  ;;  %519 = vmatpush1.msra.mxu1 %v4092_v36 }
 0x12b   :  { %449 = vmatprep.subr.mxu0 %v3874_v5  ;;  %520 = vmatprep.subr.mxu1 %v4098_v37 }
 0x12c   :  { %450 = vmatpush1.msra.mxu0 %v3881_v6  ;;  %521 = vmatpush1.msra.mxu1 %v4105_v38 }
 0x12d   :  { %451 = vmatprep.subr.mxu0 %v3888_v7  ;;  %522 = vmatprep.subr.mxu1 %v4112_v39 }
 0x12e   :  { %452 = vmatpush1.msra.mxu0 %v3895_v8  ;;  %523 = vmatpush1.msra.mxu1 %v4118_v40 }
 0x12f   :  { %453 = vmatprep.subr.mxu0 %v3902_v9  ;;  %524 = vmatprep.subr.mxu1 %v4124_v41 }
 0x130   :  { %454 = vmatpush1.msra.mxu0 %v3909_v10  ;;  %525 = vmatpush1.msra.mxu1 %v4130_v42 }
 0x131   :  { %455 = vmatprep.subr.mxu0 %v3916_v11  ;;  %526 = vmatprep.subr.mxu1 %v4136_v43 }
 0x132   :  { %456 = vmatpush1.msra.mxu0 %v3923_v12  ;;  %527 = vmatpush1.msra.mxu1 %v4142_v44 }
 0x133   :  { %457 = vmatprep.subr.mxu0 %v3930_v13  ;;  %528 = vmatprep.subr.mxu1 %v4148_v45 }
 0x134   :  { %458 = vmatpush1.msra.mxu0 %v3937_v14  ;;  %529 = vmatpush1.msra.mxu1 %v4154_v46 }
 0x135   :  { %459 = vmatprep.subr.mxu0 %v3944_v15  ;;  %530 = vmatprep.subr.mxu1 %v4160_v47 }
 0x136   :  { %460 = vmatpush1.msra.mxu0 %v3951_v16  ;;  %531 = vmatpush1.msra.mxu1 %v4166_v48 }
 0x137   :  { %461 = vmatprep.subr.mxu0 %v3958_v17  ;;  %532 = vmatprep.subr.mxu1 %v4172_v49 }
 0x138   :  { %462 = vmatpush1.msra.mxu0 %v3965_v18  ;;  %533 = vmatpush1.msra.mxu1 %v4178_v50 }
 0x139   :  { %463 = vmatprep.subr.mxu0 %v3972_v19  ;;  %534 = vmatprep.subr.mxu1 %v4184_v51 }
 0x13a   :  { %464 = vmatpush1.msra.mxu0 %v3979_v20  ;;  %535 = vmatpush1.msra.mxu1 %v4190_v52 }
 0x13b   :  { %465 = vmatprep.subr.mxu0 %v3986_v21  ;;  %536 = vmatprep.subr.mxu1 %v4196_v53 }
 0x13c   :  { %466 = vmatpush1.msra.mxu0 %v3993_v22  ;;  %537 = vmatpush1.msra.mxu1 %v4202_v54 }
 0x13d   :  { %467 = vmatprep.subr.mxu0 %v4000_v23  ;;  %538 = vmatprep.subr.mxu1 %v4208_v55 }
 0x13e   :  { %468 = vmatpush1.msra.mxu0 %v4007_v24  ;;  %539 = vmatpush1.msra.mxu1 %v4214_v56 }
 0x13f   :  { %469 = vmatprep.subr.mxu0 %v7022_v25  ;;  %540 = vmatprep.subr.mxu1 %v7023_v26 }
 0x140   :  { %470 = vmatpush1.msra.mxu0 %v7024_v27  ;;  %541 = vmatpush1.msra.mxu1 %v7025_v58 }
 0x141   :  { %471 = vmatprep.subr.mxu0 %v7026_v59  ;;  %542 = vmatprep.subr.mxu1 %v7027_v31  ;;  %v3422_v31 = vld [vmem:[%s6821_s0 + $0x38] sm:$0xff] }
 0x142   :  { %472 = vmatpush1.msra.mxu0 %v7028_v0  ;;  %543 = vmatpush1.msra.mxu1 %v7029_v29  ;;  %v7039_v29 = vld [vmem:[#allocation8_spill] sm:$0xff] }
 0x143   :  { %473 = vmatprep.subr.mxu0 %v7030_v30  ;;  %544 = vmatprep.subr.mxu1 %v7031_v32  ;;  %v7040_v30 = vld [vmem:[#allocation17_spill] sm:$0xff] }
 0x144   :  { %474 = vmatpush1.msra.mxu0 %v7032_v60  ;;  %545 = vmatpush1.msra.mxu1 %v7033_v61  ;;  %v3419_v61 = vld [vmem:[%s6821_s0 + $0x20] sm:$0xff] }
 0x145   :  { %475 = vmatprep.subr.mxu0 %v7034_v62  ;;  %546 = vmatprep.subr.mxu1 %v7035_v3  ;;  %v3420_v3 = vld [vmem:[%s6821_s0 + $0x28] sm:$0xff] }
 0x146   :  { %476 = vmatpush1.msra.mxu0 %v7036_v33  ;;  %509 = vmatprep.mubr.f32.mxu0 %v7037_v63 }
 0x147   :  { %547 = vmatpush1.msra.mxu1 %v7038_v28  ;;  %580 = vmatprep.mubr.f32.mxu1 %v7037_v63  ;;  %v3421_v28 = vld [vmem:[%s6821_s0 + $0x30] sm:$0xff] }
 0x148   :  { %616 = vmatprep.subr.mxu0 %v7039_v29  ;;  %687 = vmatprep.subr.mxu1 %v7040_v30 }
 0x1e7   :  { %v340_v60 = vpop.f32.mrf.mxu0  ;;  %v411_v29 = vpop.f32.mrf.mxu1 }
 0x1e8   :  { %v416_v33 = vadd.f32 %v3419_v61, %v340_v60  ;;  %v418_v63 = vadd.f32 %v3421_v28, %v411_v29 }
 0x1e9   :  { %v342_v62 = vpop.f32.mrf.mxu0  ;;  %v413_v59 = vpop.f32.mrf.mxu1 }
 0x1ea   :  { %v420_v32 = vmul.f32 0.5, %v416_v33  ;;  %v417_v0 = vadd.f32 %v3420_v3, %v342_v62  ;;  %v419_v58 = vadd.f32 %v3422_v31, %v413_v59  ;;  %v7046_v31 = vld [vmem:[#allocation11_spill] sm:$0xff] }
 0x1ec   :  { %3527 = vtanh.f32 %v420_v32  ;;  %v424_v30 = vmul.f32 0.5, %v417_v0  ;;  %v429_v60 = vmul.f32 0.5, %v419_v58 }
 0x1ee   :  { %3529 = vtanh.f32 %v424_v30 }
 0x1ef   :  { %3531 = vtanh.f32 %v418_v63 }
 0x1f0   :  { %3533 = vtanh.f32 %v429_v60  ;;  %v7047_v60 = vld [vmem:[#allocation20_spill] sm:$0xff] }
 0x1f9   :  { %v3528_v61 = vpop.eup %3527 }
 0x1fa   :  { %v422_v33 = vmul.f32 0.5, %v3528_v61  ;;  %v7048_v61 = vld [vmem:[#allocation12_spill] sm:$0xff] }
 0x1fb   :  { %v3530_v62 = vpop.eup %3529 }
 0x1fc   :  { %v423_v3 = vadd.f32 0.5, %v422_v33  ;;  %v426_v27 = vmul.f32 0.5, %v3530_v62  ;;  %v3532_v25 = vpop.eup %3531  ;;  %v7049_v33 = vld [vmem:[#allocation21_spill] sm:$0xff] }
 0x1fd   :  { %v3534_v30 = vpop.eup %3533  ;;  %v7050_v62 = vld [vmem:[#allocation13_spill] sm:$0xff] }
 0x1fe   :  { %v427_v26 = vadd.f32 0.5, %v426_v27  ;;  %v434_v28 = vmul.f32 %v3532_v25, %v423_v3  ;;  %v431_v32 = vmul.f32 0.5, %v3534_v30  ;;  %v7043_v25 = vld [vmem:[#allocation18_spill] sm:$0xff]  ;;  %v7045_v27 = vld [vmem:[#allocation19_spill] sm:$0xff] }
 0x1ff   :  { %v7051_v3 = vld [vmem:[#allocation22_spill] sm:$0xff]  ;;  %v7054_v30 = vld [vmem:[#allocation15_spill] sm:$0xff] }
 0x200   :  { %v433_v0 = vmul.f32 %v427_v26, %v4314_v57  ;;  %v432_v63 = vadd.f32 0.5, %v431_v32  ;;  %v7042_v57 = vld [vmem:[#allocation9_spill] sm:$0xff]  ;;  %v7044_v26 = vld [vmem:[#allocation10_spill] sm:$0xff]  ;;  %v7055_v32 = vld [vmem:[#allocation24_spill] sm:$0xff] }
 0x202   :  { %v4400_v29 = vadd.f32 %v434_v28, %v433_v0  ;;  %v7052_v0 = vld [vmem:[#allocation14_spill] sm:$0xff]  ;;  %v7053_v28 = vld [vmem:[#allocation23_spill] sm:$0xff] }
 0x204   :  { %3535 = vtanh.f32 %v4400_v29 }
 0x211   :  { %v3536_v59 = vpop.eup %3535 }
 0x212   :  { %v4403_v58 = vmul.f32 %v3536_v59, %v432_v63  ;;  %v7056_v63 = vld [vmem:[#allocation16_spill] sm:$0xff]  ;;  %v7057_v59 = vmov 0.0  }
 0x214   :  { %7041 = vst [vmem:[#allocation27_spill] sm:$0xff] %v4403_v58  ;;  %510 = vmatmul.mubr.f32.vlgmr.msra.gmra.mxu0 %v4403_v58  ;;  %581 = vmatmul.mubr.f32.vlgmr.msra.gmra.mxu1 %v4403_v58  ;;  %v7058_v58 = vld [vmem:[#allocation25_spill] sm:$0xff] }
 0x215   :  { %617 = vmatpush1.msra.mxu0 %v3854_v1  ;;  %688 = vmatpush1.msra.mxu1 %v4077_v34 }
 0x216   :  { %618 = vmatprep.subr.mxu0 %v3859_v2  ;;  %689 = vmatprep.subr.mxu1 %v4084_v35 }
 0x217   :  { %619 = vmatpush1.msra.mxu0 %v3867_v4  ;;  %690 = vmatpush1.msra.mxu1 %v4092_v36 }
 0x218   :  { %620 = vmatprep.subr.mxu0 %v3874_v5  ;;  %691 = vmatprep.subr.mxu1 %v4098_v37 }
 0x219   :  { %621 = vmatpush1.msra.mxu0 %v3881_v6  ;;  %692 = vmatpush1.msra.mxu1 %v4105_v38 }
 0x21a   :  { %622 = vmatprep.subr.mxu0 %v3888_v7  ;;  %693 = vmatprep.subr.mxu1 %v4112_v39 }
 0x21b   :  { %623 = vmatpush1.msra.mxu0 %v3895_v8  ;;  %694 = vmatpush1.msra.mxu1 %v4118_v40 }
 0x21c   :  { %624 = vmatprep.subr.mxu0 %v3902_v9  ;;  %695 = vmatprep.subr.mxu1 %v4124_v41 }
 0x21d   :  { %625 = vmatpush1.msra.mxu0 %v3909_v10  ;;  %696 = vmatpush1.msra.mxu1 %v4130_v42 }
 0x21e   :  { %626 = vmatprep.subr.mxu0 %v3916_v11  ;;  %697 = vmatprep.subr.mxu1 %v4136_v43 }
 0x21f   :  { %627 = vmatpush1.msra.mxu0 %v3923_v12  ;;  %698 = vmatpush1.msra.mxu1 %v4142_v44 }
 0x220   :  { %628 = vmatprep.subr.mxu0 %v3930_v13  ;;  %699 = vmatprep.subr.mxu1 %v4148_v45 }
 0x221   :  { %629 = vmatpush1.msra.mxu0 %v3937_v14  ;;  %700 = vmatpush1.msra.mxu1 %v4154_v46 }
 0x222   :  { %630 = vmatprep.subr.mxu0 %v3944_v15  ;;  %701 = vmatprep.subr.mxu1 %v4160_v47 }
 0x223   :  { %631 = vmatpush1.msra.mxu0 %v3951_v16  ;;  %702 = vmatpush1.msra.mxu1 %v4166_v48 }
 0x224   :  { %632 = vmatprep.subr.mxu0 %v3958_v17  ;;  %703 = vmatprep.subr.mxu1 %v4172_v49 }
 0x225   :  { %633 = vmatpush1.msra.mxu0 %v3965_v18  ;;  %704 = vmatpush1.msra.mxu1 %v4178_v50 }
 0x226   :  { %634 = vmatprep.subr.mxu0 %v3972_v19  ;;  %705 = vmatprep.subr.mxu1 %v4184_v51 }
 0x227   :  { %635 = vmatpush1.msra.mxu0 %v3979_v20  ;;  %706 = vmatpush1.msra.mxu1 %v4190_v52 }
 0x228   :  { %636 = vmatprep.subr.mxu0 %v3986_v21  ;;  %707 = vmatprep.subr.mxu1 %v4196_v53 }
 0x229   :  { %637 = vmatpush1.msra.mxu0 %v3993_v22  ;;  %708 = vmatpush1.msra.mxu1 %v4202_v54 }
 0x22a   :  { %638 = vmatprep.subr.mxu0 %v4000_v23  ;;  %709 = vmatprep.subr.mxu1 %v4208_v55 }
 0x22b   :  { %639 = vmatpush1.msra.mxu0 %v4007_v24  ;;  %710 = vmatpush1.msra.mxu1 %v4214_v56 }
 0x22c   :  { %640 = vmatprep.subr.mxu0 %v7042_v57  ;;  %711 = vmatprep.subr.mxu1 %v7043_v25 }
 0x22d   :  { %641 = vmatpush1.msra.mxu0 %v7044_v26  ;;  %712 = vmatpush1.msra.mxu1 %v7045_v27 }
 0x22e   :  { %642 = vmatprep.subr.mxu0 %v7046_v31  ;;  %713 = vmatprep.subr.mxu1 %v7047_v60  ;;  %v3426_v60 = vld [vmem:[%s6821_s0 + $0x58] sm:$0xff] }
 0x22f   :  { %643 = vmatpush1.msra.mxu0 %v7048_v61  ;;  %714 = vmatpush1.msra.mxu1 %v7049_v33  ;;  %v7059_v33 = vld [vmem:[#allocation8_spill] sm:$0xff] }
 0x230   :  { %644 = vmatprep.subr.mxu0 %v7050_v62  ;;  %715 = vmatprep.subr.mxu1 %v7051_v3  ;;  %v7060_v62 = vld [vmem:[#allocation17_spill] sm:$0xff] }
 0x231   :  { %645 = vmatpush1.msra.mxu0 %v7052_v0  ;;  %716 = vmatpush1.msra.mxu1 %v7053_v28  ;;  %v3423_v28 = vld [vmem:[%s6821_s0 + $0x40] sm:$0xff] }
 0x232   :  { %646 = vmatprep.subr.mxu0 %v7054_v30  ;;  %717 = vmatprep.subr.mxu1 %v7055_v32  ;;  %v3424_v32 = vld [vmem:[%s6821_s0 + $0x48] sm:$0xff] }
 0x233   :  { %647 = vmatpush1.msra.mxu0 %v7056_v63  ;;  %680 = vmatprep.mubr.f32.mxu0 %v7057_v59 }
 0x234   :  { %718 = vmatpush1.msra.mxu1 %v7058_v58  ;;  %751 = vmatprep.mubr.f32.mxu1 %v7057_v59  ;;  %v3425_v58 = vld [vmem:[%s6821_s0 + $0x50] sm:$0xff] }
 0x235   :  { %787 = vmatprep.subr.mxu0 %v7059_v33  ;;  %858 = vmatprep.subr.mxu1 %v7060_v62 }
 0x2d4   :  { %v511_v0 = vpop.f32.mrf.mxu0  ;;  %v582_v33 = vpop.f32.mrf.mxu1 }
 0x2d5   :  { %v587_v63 = vadd.f32 %v3423_v28, %v511_v0  ;;  %v589_v59 = vadd.f32 %v3425_v58, %v582_v33 }
 0x2d6   :  { %v513_v30 = vpop.f32.mrf.mxu0  ;;  %v584_v31 = vpop.f32.mrf.mxu1 }
 0x2d7   :  { %v591_v3 = vmul.f32 0.5, %v587_v63  ;;  %v588_v61 = vadd.f32 %v3424_v32, %v513_v30  ;;  %v590_v27 = vadd.f32 %v3426_v60, %v584_v31 }
 0x2d9   :  { %3537 = vtanh.f32 %v591_v3  ;;  %v595_v62 = vmul.f32 0.5, %v588_v61  ;;  %v600_v0 = vmul.f32 0.5, %v590_v27 }
 0x2db   :  { %3539 = vtanh.f32 %v595_v62 }
 0x2dc   :  { %3541 = vtanh.f32 %v589_v59 }
 0x2dd   :  { %3543 = vtanh.f32 %v600_v0 }
 0x2e6   :  { %v3538_v28 = vpop.eup %3537 }
 0x2e7   :  { %v593_v63 = vmul.f32 0.5, %v3538_v28 }
 0x2e8   :  { %v3540_v30 = vpop.eup %3539 }
 0x2e9   :  { %v594_v32 = vadd.f32 0.5, %v593_v63  ;;  %v597_v26 = vmul.f32 0.5, %v3540_v30  ;;  %v3542_v57 = vpop.eup %3541  ;;  %v3430_v63 = vld [vmem:[%s6821_s0 + $0x78] sm:$0xff] }
 0x2ea   :  { %v3544_v62 = vpop.eup %3543 }
 0x2eb   :  { %v598_v25 = vadd.f32 0.5, %v597_v26  ;;  %v605_v58 = vmul.f32 %v3542_v57, %v594_v32  ;;  %v602_v3 = vmul.f32 0.5, %v3544_v62  ;;  %v3429_v26 = vld [vmem:[%s6821_s0 + $0x70] sm:$0xff] }
 0x2ed   :  { %v604_v61 = vmul.f32 %v598_v25, %v4400_v29  ;;  %v603_v59 = vadd.f32 0.5, %v602_v3 }
 0x2ef   :  { %v4486_v33 = vadd.f32 %v605_v58, %v604_v61 }
 0x2f1   :  { %3545 = vtanh.f32 %v4486_v33 }
 0x2fe   :  { %v3546_v31 = vpop.eup %3545 }
 0x2ff   :  { %v4489_v27 = vmul.f32 %v3546_v31, %v603_v59 }
 0x301   :  { %7061 = vst [vmem:[#allocation28_spill] sm:$0xff] %v4489_v27  ;;  %681 = vmatmul.mubr.f32.vlgmr.msra.gmra.mxu0 %v4489_v27  ;;  %752 = vmatmul.mubr.f32.vlgmr.msra.gmra.mxu1 %v4489_v27  ;;  %v5030_v27 = vld [vmem:[%s6820_s1 + $0x30] sm:$0xff] }
 0x302   :  { %788 = vmatpush1.msra.mxu0 %v3854_v1  ;;  %859 = vmatpush1.msra.mxu1 %v4077_v34  ;;  %v7062_v1 = vld [vmem:[#allocation9_spill] sm:$0xff] }
 0x303   :  { %789 = vmatprep.subr.mxu0 %v3859_v2  ;;  %860 = vmatprep.subr.mxu1 %v4084_v35  ;;  %v7063_v2 = vld [vmem:[#allocation18_spill] sm:$0xff] }
 0x304   :  { %790 = vmatpush1.msra.mxu0 %v3867_v4  ;;  %861 = vmatpush1.msra.mxu1 %v4092_v36  ;;  %v7064_v4 = vld [vmem:[#allocation10_spill] sm:$0xff] }
 0x305   :  { %791 = vmatprep.subr.mxu0 %v3874_v5  ;;  %862 = vmatprep.subr.mxu1 %v4098_v37  ;;  %v7065_v5 = vld [vmem:[#allocation19_spill] sm:$0xff] }
 0x306   :  { %792 = vmatpush1.msra.mxu0 %v3881_v6  ;;  %863 = vmatpush1.msra.mxu1 %v4105_v38  ;;  %v7066_v6 = vld [vmem:[#allocation11_spill] sm:$0xff] }
 0x307   :  { %793 = vmatprep.subr.mxu0 %v3888_v7  ;;  %864 = vmatprep.subr.mxu1 %v4112_v39  ;;  %v7067_v7 = vld [vmem:[#allocation20_spill] sm:$0xff] }
 0x308   :  { %794 = vmatpush1.msra.mxu0 %v3895_v8  ;;  %865 = vmatpush1.msra.mxu1 %v4118_v40  ;;  %v7068_v8 = vld [vmem:[#allocation12_spill] sm:$0xff] }
 0x309   :  { %795 = vmatprep.subr.mxu0 %v3902_v9  ;;  %866 = vmatprep.subr.mxu1 %v4124_v41  ;;  %v7069_v9 = vld [vmem:[#allocation21_spill] sm:$0xff] }
 0x30a   :  { %796 = vmatpush1.msra.mxu0 %v3909_v10  ;;  %867 = vmatpush1.msra.mxu1 %v4130_v42  ;;  %v7070_v10 = vld [vmem:[#allocation13_spill] sm:$0xff] }
 0x30b   :  { %797 = vmatprep.subr.mxu0 %v3916_v11  ;;  %868 = vmatprep.subr.mxu1 %v4136_v43  ;;  %v7071_v11 = vld [vmem:[#allocation22_spill] sm:$0xff] }
 0x30c   :  { %798 = vmatpush1.msra.mxu0 %v3923_v12  ;;  %869 = vmatpush1.msra.mxu1 %v4142_v44  ;;  %v7072_v12 = vld [vmem:[#allocation14_spill] sm:$0xff] }
 0x30d   :  { %799 = vmatprep.subr.mxu0 %v3930_v13  ;;  %870 = vmatprep.subr.mxu1 %v4148_v45  ;;  %v7073_v13 = vld [vmem:[#allocation23_spill] sm:$0xff] }
 0x30e   :  { %800 = vmatpush1.msra.mxu0 %v3937_v14  ;;  %871 = vmatpush1.msra.mxu1 %v4154_v46  ;;  %v7074_v14 = vld [vmem:[#allocation15_spill] sm:$0xff] }
 0x30f   :  { %801 = vmatprep.subr.mxu0 %v3944_v15  ;;  %872 = vmatprep.subr.mxu1 %v4160_v47  ;;  %v7075_v15 = vld [vmem:[#allocation24_spill] sm:$0xff] }
 0x310   :  { %802 = vmatpush1.msra.mxu0 %v3951_v16  ;;  %873 = vmatpush1.msra.mxu1 %v4166_v48  ;;  %v7076_v16 = vld [vmem:[#allocation16_spill] sm:$0xff] }
 0x311   :  { %803 = vmatprep.subr.mxu0 %v3958_v17  ;;  %874 = vmatprep.subr.mxu1 %v4172_v49  ;;  %v7077_v17 = vmov 0.0  }
 0x312   :  { %804 = vmatpush1.msra.mxu0 %v3965_v18  ;;  %875 = vmatpush1.msra.mxu1 %v4178_v50  ;;  %v7078_v18 = vld [vmem:[#allocation25_spill] sm:$0xff] }
 0x313   :  { %805 = vmatprep.subr.mxu0 %v3972_v19  ;;  %876 = vmatprep.subr.mxu1 %v4184_v51  ;;  %v7079_v19 = vld [vmem:[#allocation8_spill] sm:$0xff]  ;;  %7096 = vst [vmem:[#allocation25_spill] sm:$0xff] %v5030_v27 }
 0x314   :  { %806 = vmatpush1.msra.mxu0 %v3979_v20  ;;  %877 = vmatpush1.msra.mxu1 %v4190_v52  ;;  %v7080_v20 = vld [vmem:[#allocation17_spill] sm:$0xff] }
 0x315   :  { %807 = vmatprep.subr.mxu0 %v3986_v21  ;;  %878 = vmatprep.subr.mxu1 %v4196_v53  ;;  %v3427_v21 = vld [vmem:[%s6821_s0 + $0x60] sm:$0xff] }
 0x316   :  { %808 = vmatpush1.msra.mxu0 %v3993_v22  ;;  %879 = vmatpush1.msra.mxu1 %v4202_v54 }
 0x317   :  { %809 = vmatprep.subr.mxu0 %v4000_v23  ;;  %880 = vmatprep.subr.mxu1 %v4208_v55  ;;  %v3428_v23 = vld [vmem:[%s6821_s0 + $0x68] sm:$0xff] }
 0x318   :  { %810 = vmatpush1.msra.mxu0 %v4007_v24  ;;  %881 = vmatpush1.msra.mxu1 %v4214_v56 }
 0x319   :  { %811 = vmatprep.subr.mxu0 %v7062_v1  ;;  %882 = vmatprep.subr.mxu1 %v7063_v2 }
 0x31a   :  { %812 = vmatpush1.msra.mxu0 %v7064_v4  ;;  %883 = vmatpush1.msra.mxu1 %v7065_v5 }
 0x31b   :  { %813 = vmatprep.subr.mxu0 %v7066_v6  ;;  %884 = vmatprep.subr.mxu1 %v7067_v7 }
 0x31c   :  { %814 = vmatpush1.msra.mxu0 %v7068_v8  ;;  %885 = vmatpush1.msra.mxu1 %v7069_v9 }
 0x31d   :  { %815 = vmatprep.subr.mxu0 %v7070_v10  ;;  %886 = vmatprep.subr.mxu1 %v7071_v11 }
 0x31e   :  { %816 = vmatpush1.msra.mxu0 %v7072_v12  ;;  %887 = vmatpush1.msra.mxu1 %v7073_v13 }
 0x31f   :  { %817 = vmatprep.subr.mxu0 %v7074_v14  ;;  %888 = vmatprep.subr.mxu1 %v7075_v15 }
 0x320   :  { %818 = vmatpush1.msra.mxu0 %v7076_v16  ;;  %851 = vmatprep.mubr.f32.mxu0 %v7077_v17 }
 0x321   :  { %889 = vmatpush1.msra.mxu1 %v7078_v18  ;;  %922 = vmatprep.mubr.f32.mxu1 %v7077_v17 }
 0x322   :  { %958 = vmatprep.subr.mxu0 %v7079_v19  ;;  %1029 = vmatprep.subr.mxu1 %v7080_v20 }
 0x3c1   :  { %v682_v22 = vpop.f32.mrf.mxu0  ;;  %v753_v60 = vpop.f32.mrf.mxu1 }
 0x3c2   :  { %v758_v24 = vadd.f32 %v3427_v21, %v682_v22  ;;  %v760_v28 = vadd.f32 %v3429_v26, %v753_v60  ;;  %v4582_v21 = vld [vmem:[%s6820_s1 + $0x1e0] sm:$0xff]  ;;  %v3433_v60 = vld [vmem:[%s6821_s0 + $0x90] sm:$0xff] }
 0x3c3   :  { %v684_v29 = vpop.f32.mrf.mxu0  ;;  %v755_v30 = vpop.f32.mrf.mxu1  ;;  %v4596_v22 = vld [vmem:[%s6820_s1 + $0x1c0] sm:$0xff] }
 0x3c4   :  { %v762_v57 = vmul.f32 0.5, %v758_v24  ;;  %v759_v25 = vadd.f32 %v3428_v23, %v684_v29  ;;  %v761_v32 = vadd.f32 %v3430_v63, %v755_v30  ;;  %v3432_v24 = vld [vmem:[%s6821_s0 + $0x88] sm:$0xff]  ;;  %v3434_v30 = vld [vmem:[%s6821_s0 + $0x98] sm:$0xff] }
 0x3c6   :  { %3547 = vtanh.f32 %v762_v57  ;;  %v766_v0 = vmul.f32 0.5, %v759_v25  ;;  %v771_v61 = vmul.f32 0.5, %v761_v32 }
 0x3c8   :  { %3549 = vtanh.f32 %v766_v0 }
 0x3c9   :  { %3551 = vtanh.f32 %v760_v28 }
 0x3ca   :  { %3553 = vtanh.f32 %v771_v61 }
 0x3d3   :  { %v3548_v58 = vpop.eup %3547 }
 0x3d4   :  { %v764_v62 = vmul.f32 0.5, %v3548_v58 }
 0x3d5   :  { %v3550_v3 = vpop.eup %3549 }
 0x3d6   :  { %v765_v59 = vadd.f32 0.5, %v764_v62  ;;  %v768_v31 = vmul.f32 0.5, %v3550_v3  ;;  %v3552_v4 = vpop.eup %3551 }
 0x3d7   :  { %v3554_v12 = vpop.eup %3553 }
 0x3d8   :  { %v769_v1 = vadd.f32 0.5, %v768_v31  ;;  %v776_v8 = vmul.f32 %v3552_v4, %v765_v59  ;;  %v773_v14 = vmul.f32 0.5, %v3554_v12 }
 0x3da   :  { %v775_v6 = vmul.f32 %v769_v1, %v4486_v33  ;;  %v774_v16 = vadd.f32 0.5, %v773_v14  ;;  %v4589_v33 = vld [vmem:[%s6820_s1 + $0x1c8] sm:$0xff] }
 0x3dc   :  { %v4572_v10 = vadd.f32 %v776_v8, %v775_v6 }
 0x3de   :  { %3555 = vtanh.f32 %v4572_v10 }
 0x3eb   :  { %v3556_v19 = vpop.eup %3555 }
 0x3ec   :  { %v4575_v20 = vmul.f32 %v3556_v19, %v774_v16 }
 0x3ee   :  { %7081 = vst [vmem:[#allocation9_spill] sm:$0xff] %v4575_v20  ;;  %852 = vmatmul.mubr.f32.vlgmr.msra.gmra.mxu0 %v4575_v20  ;;  %923 = vmatmul.mubr.f32.vlgmr.msra.gmra.mxu1 %v4575_v20  ;;  %v5023_v20 = vld [vmem:[%s6820_s1 + $0x38] sm:$0xff] }
 0x3ef   :  { %959 = vmatpush1.msra.mxu0 %v4582_v21  ;;  %1030 = vmatpush1.msra.mxu1 %v4077_v34  ;;  %v4603_v34 = vld [vmem:[%s6820_s1 + $0x1a8] sm:$0xff]  ;;  %7095 = vst [vmem:[#allocation16_spill] sm:$0xff] %v5023_v20 }
 0x3f0   :  { %960 = vmatprep.subr.mxu0 %v4589_v33  ;;  %1031 = vmatprep.subr.mxu1 %v4084_v35  ;;  %v4610_v35 = vld [vmem:[%s6820_s1 + $0x1a0] sm:$0xff] }
 0x3f1   :  { %961 = vmatpush1.msra.mxu0 %v4596_v22  ;;  %1032 = vmatpush1.msra.mxu1 %v4092_v36  ;;  %v4617_v36 = vld [vmem:[%s6820_s1 + $0x188] sm:$0xff] }
 0x3f2   :  { %962 = vmatprep.subr.mxu0 %v4603_v34  ;;  %1033 = vmatprep.subr.mxu1 %v4098_v37  ;;  %v4624_v37 = vld [vmem:[%s6820_s1 + $0x180] sm:$0xff] }
 0x3f3   :  { %963 = vmatpush1.msra.mxu0 %v4610_v35  ;;  %1034 = vmatpush1.msra.mxu1 %v4105_v38  ;;  %v4631_v38 = vld [vmem:[%s6820_s1 + $0x168] sm:$0xff] }
 0x3f4   :  { %964 = vmatprep.subr.mxu0 %v4617_v36  ;;  %1035 = vmatprep.subr.mxu1 %v4112_v39  ;;  %v4638_v39 = vld [vmem:[%s6820_s1 + $0x160] sm:$0xff] }
 0x3f5   :  { %965 = vmatpush1.msra.mxu0 %v4624_v37  ;;  %1036 = vmatpush1.msra.mxu1 %v4118_v40  ;;  %v4645_v40 = vld [vmem:[%s6820_s1 + $0x148] sm:$0xff] }
 0x3f6   :  { %966 = vmatprep.subr.mxu0 %v4631_v38  ;;  %1037 = vmatprep.subr.mxu1 %v4124_v41  ;;  %v4652_v41 = vld [vmem:[%s6820_s1 + $0x140] sm:$0xff] }
 0x3f7   :  { %967 = vmatpush1.msra.mxu0 %v4638_v39  ;;  %1038 = vmatpush1.msra.mxu1 %v4130_v42  ;;  %v4659_v42 = vld [vmem:[%s6820_s1 + $0x128] sm:$0xff] }
 0x3f8   :  { %968 = vmatprep.subr.mxu0 %v4645_v40  ;;  %1039 = vmatprep.subr.mxu1 %v4136_v43  ;;  %v4666_v43 = vld [vmem:[%s6820_s1 + $0x120] sm:$0xff] }
 0x3f9   :  { %969 = vmatpush1.msra.mxu0 %v4652_v41  ;;  %1040 = vmatpush1.msra.mxu1 %v4142_v44  ;;  %v4673_v44 = vld [vmem:[%s6820_s1 + $0x108] sm:$0xff] }
 0x3fa   :  { %970 = vmatprep.subr.mxu0 %v4659_v42  ;;  %1041 = vmatprep.subr.mxu1 %v4148_v45  ;;  %v4680_v45 = vld [vmem:[%s6820_s1 + $0x100] sm:$0xff] }
 0x3fb   :  { %971 = vmatpush1.msra.mxu0 %v4666_v43  ;;  %1042 = vmatpush1.msra.mxu1 %v4154_v46  ;;  %v4687_v46 = vld [vmem:[%s6820_s1 + $0xe8] sm:$0xff] }
 0x3fc   :  { %972 = vmatprep.subr.mxu0 %v4673_v44  ;;  %1043 = vmatprep.subr.mxu1 %v4160_v47  ;;  %v4694_v47 = vld [vmem:[%s6820_s1 + $0xe0] sm:$0xff] }
 0x3fd   :  { %973 = vmatpush1.msra.mxu0 %v4680_v45  ;;  %1044 = vmatpush1.msra.mxu1 %v4166_v48  ;;  %v4701_v48 = vld [vmem:[%s6820_s1 + $0xc8] sm:$0xff] }
 0x3fe   :  { %974 = vmatprep.subr.mxu0 %v4687_v46  ;;  %1045 = vmatprep.subr.mxu1 %v4172_v49  ;;  %v4708_v49 = vld [vmem:[%s6820_s1 + $0xc0] sm:$0xff] }
 0x3ff   :  { %975 = vmatpush1.msra.mxu0 %v4694_v47  ;;  %1046 = vmatpush1.msra.mxu1 %v4178_v50  ;;  %v4715_v50 = vld [vmem:[%s6820_s1 + $0xa8] sm:$0xff] }
 0x400   :  { %976 = vmatprep.subr.mxu0 %v4701_v48  ;;  %1047 = vmatprep.subr.mxu1 %v4184_v51  ;;  %v4722_v51 = vld [vmem:[%s6820_s1 + $0xa0] sm:$0xff] }
 0x401   :  { %977 = vmatpush1.msra.mxu0 %v4708_v49  ;;  %1048 = vmatpush1.msra.mxu1 %v4190_v52  ;;  %v4729_v52 = vld [vmem:[%s6820_s1 + $0x88] sm:$0xff] }
 0x402   :  { %978 = vmatprep.subr.mxu0 %v4715_v50  ;;  %1049 = vmatprep.subr.mxu1 %v4196_v53  ;;  %v4736_v53 = vld [vmem:[%s6820_s1 + $0x80] sm:$0xff] }
 0x403   :  { %979 = vmatpush1.msra.mxu0 %v4722_v51  ;;  %1050 = vmatpush1.msra.mxu1 %v4202_v54  ;;  %v4743_v54 = vld [vmem:[%s6820_s1 + $0x68] sm:$0xff] }
 0x404   :  { %980 = vmatprep.subr.mxu0 %v4729_v52  ;;  %1051 = vmatprep.subr.mxu1 %v4208_v55  ;;  %7082 = vst [vmem:[#allocation18_spill] sm:$0xff] %v4743_v54  ;;  %v4750_v55 = vld [vmem:[%s6820_s1 + $0x60] sm:$0xff] }
 0x405   :  { %981 = vmatpush1.msra.mxu0 %v4736_v53  ;;  %1052 = vmatpush1.msra.mxu1 %v4214_v56  ;;  %7083 = vst [vmem:[#allocation10_spill] sm:$0xff] %v4750_v55  ;;  %v4757_v56 = vld [vmem:[%s6820_s1 + $0x48] sm:$0xff] }
 0x406   :  { %982 = vmatprep.subr.mxu0 %v4743_v54  ;;  %1053 = vmatprep.subr.mxu1 %v7063_v2  ;;  %7084 = vst [vmem:[#allocation19_spill] sm:$0xff] %v4757_v56  ;;  %v4764_v2 = vld [vmem:[%s6820_s1 + $0x40] sm:$0xff] }
 0x407   :  { %983 = vmatpush1.msra.mxu0 %v4750_v55  ;;  %1054 = vmatpush1.msra.mxu1 %v7065_v5  ;;  %7085 = vst [vmem:[#allocation11_spill] sm:$0xff] %v4764_v2  ;;  %v4771_v5 = vld [vmem:[%s6820_s1 + $0x28] sm:$0xff] }
 0x408   :  { %984 = vmatprep.subr.mxu0 %v4757_v56  ;;  %1055 = vmatprep.subr.mxu1 %v7067_v7  ;;  %7086 = vst [vmem:[#allocation20_spill] sm:$0xff] %v4771_v5  ;;  %v4778_v7 = vld [vmem:[%s6820_s1 + $0x20] sm:$0xff] }
 0x409   :  { %985 = vmatpush1.msra.mxu0 %v4764_v2  ;;  %1056 = vmatpush1.msra.mxu1 %v7069_v9  ;;  %7087 = vst [vmem:[#allocation12_spill] sm:$0xff] %v4778_v7  ;;  %v4785_v9 = vld [vmem:[%s6820_s1 + $0x8] sm:$0xff] }
 0x40a   :  { %986 = vmatprep.subr.mxu0 %v4771_v5  ;;  %1057 = vmatprep.subr.mxu1 %v7071_v11  ;;  %7088 = vst [vmem:[#allocation21_spill] sm:$0xff] %v4785_v9  ;;  %v4792_v11 = vld [vmem:[%s6820_s1] sm:$0xff] }
 0x40b   :  { %987 = vmatpush1.msra.mxu0 %v4778_v7  ;;  %1058 = vmatpush1.msra.mxu1 %v7073_v13  ;;  %7089 = vst [vmem:[#allocation13_spill] sm:$0xff] %v4792_v11  ;;  %v4801_v13 = vld [vmem:[%s6820_s1 + $0x1e8] sm:$0xff] }
 0x40c   :  { %988 = vmatprep.subr.mxu0 %v4785_v9  ;;  %1059 = vmatprep.subr.mxu1 %v7075_v15  ;;  %v4807_v15 = vld [vmem:[%s6820_s1 + $0x1f8] sm:$0xff] }
 0x40d   :  { %989 = vmatpush1.msra.mxu0 %v4792_v11  ;;  %1022 = vmatprep.mubr.f32.mxu0 %v7077_v17 }
 0x40e   :  { %1060 = vmatpush1.msra.mxu1 %v7078_v18  ;;  %1093 = vmatprep.mubr.f32.mxu1 %v7077_v17  ;;  %v3431_v18 = vld [vmem:[%s6821_s0 + $0x80] sm:$0xff] }
 0x40f   :  { %1129 = vmatprep.subr.mxu0 %v4801_v13  ;;  %1200 = vmatprep.subr.mxu1 %v4807_v15 }
 0x4ae   :  { %v853_v23 = vpop.f32.mrf.mxu0  ;;  %v924_v0 = vpop.f32.mrf.mxu1 }
 0x4af   :  { %v929_v29 = vadd.f32 %v3431_v18, %v853_v23  ;;  %v931_v63 = vadd.f32 %v3433_v60, %v924_v0  ;;  %v4869_v60 = vld [vmem:[%s6820_s1 + $0x198] sm:$0xff]  ;;  %v4876_v0 = vld [vmem:[%s6820_s1 + $0x190] sm:$0xff] }
 0x4b0   :  { %v855_v57 = vpop.f32.mrf.mxu0  ;;  %v926_v32 = vpop.f32.mrf.mxu1 }
 0x4b1   :  { %v933_v25 = vmul.f32 0.5, %v929_v29  ;;  %v930_v26 = vadd.f32 %v3432_v24, %v855_v57  ;;  %v932_v61 = vadd.f32 %v3434_v30, %v926_v32  ;;  %v4841_v29 = vld [vmem:[%s6820_s1 + $0x1d8] sm:$0xff]  ;;  %v4848_v57 = vld [vmem:[%s6820_s1 + $0x1d0] sm:$0xff] }
 0x4b2   :  { %v4897_v30 = vld [vmem:[%s6820_s1 + $0x158] sm:$0xff]  ;;  %v4904_v32 = vld [vmem:[%s6820_s1 + $0x150] sm:$0xff] }
 0x4b3   :  { %3557 = vtanh.f32 %v933_v25  ;;  %v937_v28 = vmul.f32 0.5, %v930_v26  ;;  %v942_v58 = vmul.f32 0.5, %v932_v61  ;;  %v4855_v25 = vld [vmem:[%s6820_s1 + $0x1b8] sm:$0xff]  ;;  %v4862_v26 = vld [vmem:[%s6820_s1 + $0x1b0] sm:$0xff] }
 0x4b4   :  { %v4911_v61 = vld [vmem:[%s6820_s1 + $0x138] sm:$0xff] }
 0x4b5   :  { %3559 = vtanh.f32 %v937_v28  ;;  %v4883_v28 = vld [vmem:[%s6820_s1 + $0x178] sm:$0xff] }
 0x4b6   :  { %3561 = vtanh.f32 %v931_v63  ;;  %v4890_v63 = vld [vmem:[%s6820_s1 + $0x170] sm:$0xff] }
 0x4b7   :  { %3563 = vtanh.f32 %v942_v58  ;;  %v4918_v58 = vld [vmem:[%s6820_s1 + $0x130] sm:$0xff] }
 0x4c0   :  { %v3558_v62 = vpop.eup %3557 }
 0x4c1   :  { %v935_v3 = vmul.f32 0.5, %v3558_v62  ;;  %v4925_v62 = vld [vmem:[%s6820_s1 + $0x118] sm:$0xff] }
 0x4c2   :  { %v3560_v59 = vpop.eup %3559 }
 0x4c3   :  { %v936_v31 = vadd.f32 0.5, %v935_v3  ;;  %v939_v1 = vmul.f32 0.5, %v3560_v59  ;;  %v3562_v6 = vpop.eup %3561  ;;  %v4932_v3 = vld [vmem:[%s6820_s1 + $0x110] sm:$0xff]  ;;  %v4939_v59 = vld [vmem:[%s6820_s1 + $0xf8] sm:$0xff] }
 0x4c4   :  { %v3564_v16 = vpop.eup %3563 }
 0x4c5   :  { %v940_v4 = vadd.f32 0.5, %v939_v1  ;;  %v947_v12 = vmul.f32 %v3562_v6, %v936_v31  ;;  %v944_v19 = vmul.f32 0.5, %v3564_v16  ;;  %v4946_v31 = vld [vmem:[%s6820_s1 + $0xf0] sm:$0xff]  ;;  %v4953_v1 = vld [vmem:[%s6820_s1 + $0xd8] sm:$0xff] }
 0x4c6   :  { %v4967_v6 = vld [vmem:[%s6820_s1 + $0xb8] sm:$0xff]  ;;  %v4988_v16 = vld [vmem:[%s6820_s1 + $0x90] sm:$0xff] }
 0x4c7   :  { %v946_v8 = vmul.f32 %v940_v4, %v4572_v10  ;;  %v945_v18 = vadd.f32 0.5, %v944_v19  ;;  %v4834_v10 = vld [vmem:[%s6820_s1 + $0x1f0] sm:$0xff]  ;;  %v4995_v19 = vld [vmem:[%s6820_s1 + $0x78] sm:$0xff] }
 0x4c8   :  { %v4960_v4 = vld [vmem:[%s6820_s1 + $0xd0] sm:$0xff]  ;;  %7091 = vst [vmem:[#allocation14_spill] sm:$0xff] %v4995_v19 }
 0x4c9   :  { %v4823_v14 = vadd.f32 %v947_v12, %v946_v8  ;;  %v4974_v8 = vld [vmem:[%s6820_s1 + $0xb0] sm:$0xff]  ;;  %v4981_v12 = vld [vmem:[%s6820_s1 + $0x98] sm:$0xff] }
 0x4cb   :  { %3565 = vtanh.f32 %v4823_v14 }
 0x4d8   :  { %v3566_v23 = vpop.eup %3565 }
 0x4d9   :  { %v4826_v24 = vmul.f32 %v3566_v23, %v945_v18  ;;  %v5002_v18 = vld [vmem:[%s6820_s1 + $0x70] sm:$0xff]  ;;  %v5009_v23 = vld [vmem:[%s6820_s1 + $0x58] sm:$0xff] }
 0x4da   :  { %7092 = vst [vmem:[#allocation23_spill] sm:$0xff] %v5002_v18  ;;  %7093 = vst [vmem:[#allocation15_spill] sm:$0xff] %v5009_v23 }
 0x4db   :  { %7090 = vst [vmem:[#allocation22_spill] sm:$0xff] %v4826_v24  ;;  %1023 = vmatmul.mubr.f32.vlgmr.msra.gmra.mxu0 %v4826_v24  ;;  %1094 = vmatmul.mubr.f32.vlgmr.msra.gmra.mxu1 %v4826_v24  ;;  %v5016_v24 = vld [vmem:[%s6820_s1 + $0x50] sm:$0xff] }
 0x4dc   :  { %1130 = vmatpush1.msra.mxu0 %v4582_v21  ;;  %1201 = vmatpush1.msra.mxu1 %v4834_v10  ;;  %7094 = vst [vmem:[#allocation24_spill] sm:$0xff] %v5016_v24 }
 0x4dd   :  { %1131 = vmatprep.subr.mxu0 %v4589_v33  ;;  %1202 = vmatprep.subr.mxu1 %v4841_v29 }
 0x4de   :  { %1132 = vmatpush1.msra.mxu0 %v4596_v22  ;;  %1203 = vmatpush1.msra.mxu1 %v4848_v57 }
 0x4df   :  { %1133 = vmatprep.subr.mxu0 %v4603_v34  ;;  %1204 = vmatprep.subr.mxu1 %v4855_v25 }
 0x4e0   :  { %1134 = vmatpush1.msra.mxu0 %v4610_v35  ;;  %1205 = vmatpush1.msra.mxu1 %v4862_v26 }
 0x4e1   :  { %1135 = vmatprep.subr.mxu0 %v4617_v36  ;;  %1206 = vmatprep.subr.mxu1 %v4869_v60 }
 0x4e2   :  { %1136 = vmatpush1.msra.mxu0 %v4624_v37  ;;  %1207 = vmatpush1.msra.mxu1 %v4876_v0 }
 0x4e3   :  { %1137 = vmatprep.subr.mxu0 %v4631_v38  ;;  %1208 = vmatprep.subr.mxu1 %v4883_v28 }
 0x4e4   :  { %1138 = vmatpush1.msra.mxu0 %v4638_v39  ;;  %1209 = vmatpush1.msra.mxu1 %v4890_v63 }
 0x4e5   :  { %1139 = vmatprep.subr.mxu0 %v4645_v40  ;;  %1210 = vmatprep.subr.mxu1 %v4897_v30 }
 0x4e6   :  { %1140 = vmatpush1.msra.mxu0 %v4652_v41  ;;  %1211 = vmatpush1.msra.mxu1 %v4904_v32 }
 0x4e7   :  { %1141 = vmatprep.subr.mxu0 %v4659_v42  ;;  %1212 = vmatprep.subr.mxu1 %v4911_v61 }
 0x4e8   :  { %1142 = vmatpush1.msra.mxu0 %v4666_v43  ;;  %1213 = vmatpush1.msra.mxu1 %v4918_v58 }
 0x4e9   :  { %1143 = vmatprep.subr.mxu0 %v4673_v44  ;;  %1214 = vmatprep.subr.mxu1 %v4925_v62 }
 0x4ea   :  { %1144 = vmatpush1.msra.mxu0 %v4680_v45  ;;  %1215 = vmatpush1.msra.mxu1 %v4932_v3 }
 0x4eb   :  { %1145 = vmatprep.subr.mxu0 %v4687_v46  ;;  %1216 = vmatprep.subr.mxu1 %v4939_v59 }
 0x4ec   :  { %1146 = vmatpush1.msra.mxu0 %v4694_v47  ;;  %1217 = vmatpush1.msra.mxu1 %v4946_v31 }
 0x4ed   :  { %1147 = vmatprep.subr.mxu0 %v4701_v48  ;;  %1218 = vmatprep.subr.mxu1 %v4953_v1 }
 0x4ee   :  { %1148 = vmatpush1.msra.mxu0 %v4708_v49  ;;  %1219 = vmatpush1.msra.mxu1 %v4960_v4 }
 0x4ef   :  { %1149 = vmatprep.subr.mxu0 %v4715_v50  ;;  %1220 = vmatprep.subr.mxu1 %v4967_v6 }
 0x4f0   :  { %1150 = vmatpush1.msra.mxu0 %v4722_v51  ;;  %1221 = vmatpush1.msra.mxu1 %v4974_v8 }
 0x4f1   :  { %1151 = vmatprep.subr.mxu0 %v4729_v52  ;;  %1222 = vmatprep.subr.mxu1 %v4981_v12 }
 0x4f2   :  { %1152 = vmatpush1.msra.mxu0 %v4736_v53  ;;  %1223 = vmatpush1.msra.mxu1 %v4988_v16 }
 0x4f3   :  { %1153 = vmatprep.subr.mxu0 %v4743_v54  ;;  %1224 = vmatprep.subr.mxu1 %v4995_v19 }
 0x4f4   :  { %1154 = vmatpush1.msra.mxu0 %v4750_v55  ;;  %1225 = vmatpush1.msra.mxu1 %v5002_v18 }
 0x4f5   :  { %1155 = vmatprep.subr.mxu0 %v4757_v56  ;;  %1226 = vmatprep.subr.mxu1 %v5009_v23  ;;  %v3438_v23 = vld [vmem:[%s6821_s0 + $0xb8] sm:$0xff] }
 0x4f6   :  { %1156 = vmatpush1.msra.mxu0 %v4764_v2  ;;  %1227 = vmatpush1.msra.mxu1 %v5016_v24 }
 0x4f7   :  { %1157 = vmatprep.subr.mxu0 %v4771_v5  ;;  %1228 = vmatprep.subr.mxu1 %v5023_v20  ;;  %v5037_v5 = vld [vmem:[%s6820_s1 + $0x18] sm:$0xff] }
 0x4f8   :  { %1158 = vmatpush1.msra.mxu0 %v4778_v7  ;;  %1229 = vmatpush1.msra.mxu1 %v5030_v27  ;;  %7097 = vst [vmem:[#allocation8_spill] sm:$0xff] %v5037_v5  ;;  %v5045_v7 = vld [vmem:[%s6820_s1 + $0x10] sm:$0xff] }
 0x4f9   :  { %1159 = vmatprep.subr.mxu0 %v4785_v9  ;;  %1230 = vmatprep.subr.mxu1 %v5037_v5  ;;  %7098 = vst [vmem:[#allocation17_spill] sm:$0xff] %v5045_v7  ;;  %v3435_v5 = vld [vmem:[%s6821_s0 + $0xa0] sm:$0xff]  ;;  %v3436_v9 = vld [vmem:[%s6821_s0 + $0xa8] sm:$0xff] }
 0x4fa   :  { %1160 = vmatpush1.msra.mxu0 %v4792_v11  ;;  %1193 = vmatprep.mubr.f32.mxu0 %v7077_v17 }
 0x4fb   :  { %1231 = vmatpush1.msra.mxu1 %v5045_v7  ;;  %1264 = vmatprep.mubr.f32.mxu1 %v7077_v17  ;;  %v3437_v17 = vld [vmem:[%s6821_s0 + $0xb0] sm:$0xff] }
 0x4fc   :  { %1300 = vmatprep.subr.mxu0 %v4801_v13  ;;  %1371 = vmatprep.subr.mxu1 %v4807_v15 }
 0x59b   :  { %v1024_v11 = vpop.f32.mrf.mxu0  ;;  %v1095_v13 = vpop.f32.mrf.mxu1 }
 0x59c   :  { %v1100_v27 = vadd.f32 %v3435_v5, %v1024_v11  ;;  %v1102_v7 = vadd.f32 %v3437_v17, %v1095_v13 }
 0x59d   :  { %v1026_v20 = vpop.f32.mrf.mxu0  ;;  %v1097_v56 = vpop.f32.mrf.mxu1 }
 0x59e   :  { %v1104_v24 = vmul.f32 0.5, %v1100_v27  ;;  %v1101_v2 = vadd.f32 %v3436_v9, %v1026_v20  ;;  %v1103_v18 = vadd.f32 %v3438_v23, %v1097_v56  ;;  %v1538_v23 = vld [vmem:[%s6822_s3 + $0x1f0] sm:$0xff] }
 0x5a0   :  { %3567 = vtanh.f32 %v1104_v24  ;;  %v1108_v15 = vmul.f32 0.5, %v1101_v2  ;;  %v1113_v5 = vmul.f32 0.5, %v1103_v18 }
 0x5a2   :  { %3569 = vtanh.f32 %v1108_v15 }
 0x5a3   :  { %3571 = vtanh.f32 %v1102_v7 }
 0x5a4   :  { %3573 = vtanh.f32 %v1113_v5  ;;  %v1533_v5 = vld [vmem:[%s6822_s3 + $0x1c8] sm:$0xff] }
 0x5ad   :  { %v3568_v11 = vpop.eup %3567 }
 0x5ae   :  { %v1106_v27 = vmul.f32 0.5, %v3568_v11  ;;  %v1535_v11 = vld [vmem:[%s6822_s3 + $0x1d8] sm:$0xff] }
 0x5af   :  { %v3570_v20 = vpop.eup %3569 }
 0x5b0   :  { %v1107_v9 = vadd.f32 0.5, %v1106_v27  ;;  %v1110_v55 = vmul.f32 0.5, %v3570_v20  ;;  %v3572_v54 = vpop.eup %3571  ;;  %v1532_v27 = vld [vmem:[%s6822_s3 + $0x1c0] sm:$0xff]  ;;  %v1534_v20 = vld [vmem:[%s6822_s3 + $0x1d0] sm:$0xff] }
 0x5b1   :  { %v3574_v13 = vpop.eup %3573 }
 0x5b2   :  { %v1111_v19 = vadd.f32 0.5, %v1110_v55  ;;  %v1118_v17 = vmul.f32 %v3572_v54, %v1107_v9  ;;  %v1115_v15 = vmul.f32 0.5, %v3574_v13  ;;  %v1529_v9 = vld [vmem:[%s6822_s3 + $0x1a8] sm:$0xff] }
 0x5b3   :  { %v1525_v13 = vld [vmem:[%s6822_s3 + $0x188] sm:$0xff] }
 0x5b4   :  { %v1117_v2 = vmul.f32 %v1111_v19, %v4823_v14  ;;  %v1116_v7 = vadd.f32 0.5, %v1115_v15  ;;  %v1536_v19 = vld [vmem:[%s6822_s3 + $0x1e0] sm:$0xff]  ;;  %v1527_v15 = vld [vmem:[%s6822_s3 + $0x198] sm:$0xff] }
 0x5b6   :  { %v5064_v24 = vadd.f32 %v1118_v17, %v1117_v2  ;;  %v1531_v2 = vld [vmem:[%s6822_s3 + $0x1b8] sm:$0xff]  ;;  %v1528_v17 = vld [vmem:[%s6822_s3 + $0x1a0] sm:$0xff] }
 0x5b8   :  { %3575 = vtanh.f32 %v5064_v24 }
 0x5c5   :  { %v3576_v56 = vpop.eup %3575 }
 0x5c6   :  { %v5067_v18 = vmul.f32 %v3576_v56, %v1116_v7  ;;  %v1524_v7 = vld [vmem:[%s6822_s3 + $0x180] sm:$0xff]  ;;  %v1526_v56 = vld [vmem:[%s6822_s3 + $0x190] sm:$0xff] }
 0x5c8   :  { %1194 = vmatmul.mubr.f32.vlgmr.msra.gmra.mxu0 %v5067_v18  ;;  %1265 = vmatmul.mubr.f32.vlgmr.msra.gmra.mxu1 %v5067_v18 }
 0x5c9   :  { %1301 = vmatpush1.msra.mxu0 %v4582_v21  ;;  %1372 = vmatpush1.msra.mxu1 %v4834_v10  ;;  %v7099_v21 = vld [vmem:[#allocation18_spill] sm:$0xff] }
 0x5ca   :  { %1302 = vmatprep.subr.mxu0 %v4589_v33  ;;  %1373 = vmatprep.subr.mxu1 %v4841_v29  ;;  %v7100_v33 = vld [vmem:[#allocation14_spill] sm:$0xff] }
 0x5cb   :  { %1303 = vmatpush1.msra.mxu0 %v4596_v22  ;;  %1374 = vmatpush1.msra.mxu1 %v4848_v57  ;;  %v7101_v22 = vld [vmem:[#allocation10_spill] sm:$0xff] }
 0x5cc   :  { %1304 = vmatprep.subr.mxu0 %v4603_v34  ;;  %1375 = vmatprep.subr.mxu1 %v4855_v25  ;;  %v7102_v34 = vld [vmem:[#allocation23_spill] sm:$0xff]  ;;  %v3441_v10 = vld [vmem:[%s6821_s0 + $0xd0] sm:$0xff] }
 0x5cd   :  { %1305 = vmatpush1.msra.mxu0 %v4610_v35  ;;  %1376 = vmatpush1.msra.mxu1 %v4862_v26  ;;  %v7103_v35 = vld [vmem:[#allocation19_spill] sm:$0xff] }
 0x5ce   :  { %1306 = vmatprep.subr.mxu0 %v4617_v36  ;;  %1377 = vmatprep.subr.mxu1 %v4869_v60  ;;  %v7104_v36 = vld [vmem:[#allocation15_spill] sm:$0xff] }
 0x5cf   :  { %1307 = vmatpush1.msra.mxu0 %v4624_v37  ;;  %1378 = vmatpush1.msra.mxu1 %v4876_v0  ;;  %v7105_v37 = vld [vmem:[#allocation11_spill] sm:$0xff] }
 0x5d0   :  { %1308 = vmatprep.subr.mxu0 %v4631_v38  ;;  %1379 = vmatprep.subr.mxu1 %v4883_v28  ;;  %v7106_v38 = vld [vmem:[#allocation24_spill] sm:$0xff]  ;;  %v3442_v26 = vld [vmem:[%s6821_s0 + $0xd8] sm:$0xff] }
 0x5d1   :  { %1309 = vmatpush1.msra.mxu0 %v4638_v39  ;;  %1380 = vmatpush1.msra.mxu1 %v4890_v63  ;;  %v7107_v39 = vld [vmem:[#allocation20_spill] sm:$0xff] }
 0x5d2   :  { %1310 = vmatprep.subr.mxu0 %v4645_v40  ;;  %1381 = vmatprep.subr.mxu1 %v4897_v30  ;;  %v7108_v40 = vld [vmem:[#allocation16_spill] sm:$0xff] }
 0x5d3   :  { %1311 = vmatpush1.msra.mxu0 %v4652_v41  ;;  %1382 = vmatpush1.msra.mxu1 %v4904_v32  ;;  %v7109_v41 = vld [vmem:[#allocation12_spill] sm:$0xff] }
 0x5d4   :  { %1312 = vmatprep.subr.mxu0 %v4659_v42  ;;  %1383 = vmatprep.subr.mxu1 %v4911_v61  ;;  %v7110_v42 = vld [vmem:[#allocation25_spill] sm:$0xff] }
 0x5d5   :  { %1313 = vmatpush1.msra.mxu0 %v4666_v43  ;;  %1384 = vmatpush1.msra.mxu1 %v4918_v58  ;;  %v7111_v43 = vld [vmem:[#allocation21_spill] sm:$0xff] }
 0x5d6   :  { %1314 = vmatprep.subr.mxu0 %v4673_v44  ;;  %1385 = vmatprep.subr.mxu1 %v4925_v62  ;;  %v7112_v44 = vld [vmem:[#allocation8_spill] sm:$0xff] }
 0x5d7   :  { %1315 = vmatpush1.msra.mxu0 %v4680_v45  ;;  %1386 = vmatpush1.msra.mxu1 %v4932_v3  ;;  %v7113_v45 = vld [vmem:[#allocation13_spill] sm:$0xff] }
 0x5d8   :  { %1316 = vmatprep.subr.mxu0 %v4687_v46  ;;  %1387 = vmatprep.subr.mxu1 %v4939_v59  ;;  %v7114_v46 = vld [vmem:[#allocation17_spill] sm:$0xff] }
 0x5d9   :  { %1317 = vmatpush1.msra.mxu0 %v4694_v47  ;;  %1388 = vmatpush1.msra.mxu1 %v4946_v31  ;;  %v7115_v47 = vmov 0.0  }
 0x5da   :  { %1318 = vmatprep.subr.mxu0 %v4701_v48  ;;  %1389 = vmatprep.subr.mxu1 %v4953_v1  ;;  %v1537_v48 = vld [vmem:[%s6822_s3 + $0x1e8] sm:$0xff] }
 0x5db   :  { %1319 = vmatpush1.msra.mxu0 %v4708_v49  ;;  %1390 = vmatpush1.msra.mxu1 %v4960_v4  ;;  %v1539_v49 = vld [vmem:[%s6822_s3 + $0x1f8] sm:$0xff] }
 0x5dc   :  { %1320 = vmatprep.subr.mxu0 %v4715_v50  ;;  %1391 = vmatprep.subr.mxu1 %v4967_v6  ;;  %v3439_v50 = vld [vmem:[%s6821_s0 + $0xc0] sm:$0xff] }
 0x5dd   :  { %1321 = vmatpush1.msra.mxu0 %v4722_v51  ;;  %1392 = vmatpush1.msra.mxu1 %v4974_v8 }
 0x5de   :  { %1322 = vmatprep.subr.mxu0 %v4729_v52  ;;  %1393 = vmatprep.subr.mxu1 %v4981_v12  ;;  %v3440_v52 = vld [vmem:[%s6821_s0 + $0xc8] sm:$0xff] }
 0x5df   :  { %1323 = vmatpush1.msra.mxu0 %v4736_v53  ;;  %1394 = vmatpush1.msra.mxu1 %v4988_v16 }
 0x5e0   :  { %1324 = vmatprep.subr.mxu0 %v7099_v21  ;;  %1395 = vmatprep.subr.mxu1 %v7100_v33  ;;  %v1521_v21 = vld [vmem:[%s6822_s3 + $0x168] sm:$0xff]  ;;  %v1523_v33 = vld [vmem:[%s6822_s3 + $0x178] sm:$0xff] }
 0x5e1   :  { %1325 = vmatpush1.msra.mxu0 %v7101_v22  ;;  %1396 = vmatpush1.msra.mxu1 %v7102_v34  ;;  %v1520_v22 = vld [vmem:[%s6822_s3 + $0x160] sm:$0xff]  ;;  %v1522_v34 = vld [vmem:[%s6822_s3 + $0x170] sm:$0xff] }
 0x5e2   :  { %1326 = vmatprep.subr.mxu0 %v7103_v35  ;;  %1397 = vmatprep.subr.mxu1 %v7104_v36  ;;  %v1517_v35 = vld [vmem:[%s6822_s3 + $0x148] sm:$0xff]  ;;  %v1519_v36 = vld [vmem:[%s6822_s3 + $0x158] sm:$0xff] }
 0x5e3   :  { %1327 = vmatpush1.msra.mxu0 %v7105_v37  ;;  %1398 = vmatpush1.msra.mxu1 %v7106_v38  ;;  %v1516_v37 = vld [vmem:[%s6822_s3 + $0x140] sm:$0xff]  ;;  %v1518_v38 = vld [vmem:[%s6822_s3 + $0x150] sm:$0xff] }
 0x5e4   :  { %1328 = vmatprep.subr.mxu0 %v7107_v39  ;;  %1399 = vmatprep.subr.mxu1 %v7108_v40  ;;  %v1513_v39 = vld [vmem:[%s6822_s3 + $0x128] sm:$0xff]  ;;  %v1515_v40 = vld [vmem:[%s6822_s3 + $0x138] sm:$0xff] }
 0x5e5   :  { %1329 = vmatpush1.msra.mxu0 %v7109_v41  ;;  %1400 = vmatpush1.msra.mxu1 %v7110_v42  ;;  %v1512_v41 = vld [vmem:[%s6822_s3 + $0x120] sm:$0xff]  ;;  %v1514_v42 = vld [vmem:[%s6822_s3 + $0x130] sm:$0xff] }
 0x5e6   :  { %1330 = vmatprep.subr.mxu0 %v7111_v43  ;;  %1401 = vmatprep.subr.mxu1 %v7112_v44  ;;  %v1509_v43 = vld [vmem:[%s6822_s3 + $0x108] sm:$0xff]  ;;  %v1511_v44 = vld [vmem:[%s6822_s3 + $0x118] sm:$0xff] }
 0x5e7   :  { %1331 = vmatpush1.msra.mxu0 %v7113_v45  ;;  %1402 = vmatpush1.msra.mxu1 %v7114_v46  ;;  %v1508_v45 = vld [vmem:[%s6822_s3 + $0x100] sm:$0xff]  ;;  %v1510_v46 = vld [vmem:[%s6822_s3 + $0x110] sm:$0xff] }
 0x5e8   :  { %1364 = vmatprep.mubr.f32.mxu0 %v7115_v47  ;;  %1435 = vmatprep.mubr.f32.mxu1 %v7115_v47 }
 0x5e9   :  { %1562 = vmatprep.subr.mxu0 %v1537_v48  ;;  %1675 = vmatprep.subr.mxu1 %v1539_v49  ;;  %v1505_v48 = vld [vmem:[%s6822_s3 + $0xe8] sm:$0xff]  ;;  %v1507_v49 = vld [vmem:[%s6822_s3 + $0xf8] sm:$0xff] }
 0x688   :  { %v1195_v51 = vpop.f32.mrf.mxu0  ;;  %v1266_v29 = vpop.f32.mrf.mxu1 }
 0x689   :  { %v1271_v53 = vadd.f32 %v3439_v50, %v1195_v51  ;;  %v1273_v25 = vadd.f32 %v3441_v10, %v1266_v29  ;;  %v1504_v50 = vld [vmem:[%s6822_s3 + $0xe0] sm:$0xff]  ;;  %v1506_v51 = vld [vmem:[%s6822_s3 + $0xf0] sm:$0xff]  ;;  %v1499_v10 = vld [vmem:[%s6822_s3 + $0xb8] sm:$0xff] }
 0x68a   :  { %v1197_v54 = vpop.f32.mrf.mxu0  ;;  %v1268_v60 = vpop.f32.mrf.mxu1  ;;  %v1496_v29 = vld [vmem:[%s6822_s3 + $0xa0] sm:$0xff] }
 0x68b   :  { %v1275_v55 = vmul.f32 0.5, %v1271_v53  ;;  %v1272_v14 = vadd.f32 %v3440_v52, %v1197_v54  ;;  %v1274_v0 = vadd.f32 %v3442_v26, %v1268_v60  ;;  %v1501_v52 = vld [vmem:[%s6822_s3 + $0xc8] sm:$0xff]  ;;  %v1503_v53 = vld [vmem:[%s6822_s3 + $0xd8] sm:$0xff]  ;;  %v1500_v54 = vld [vmem:[%s6822_s3 + $0xc0] sm:$0xff] }
 0x68c   :  { %v1495_v26 = vld [vmem:[%s6822_s3 + $0x98] sm:$0xff]  ;;  %v1492_v60 = vld [vmem:[%s6822_s3 + $0x80] sm:$0xff] }
 0x68d   :  { %3577 = vtanh.f32 %v1275_v55  ;;  %v1279_v57 = vmul.f32 0.5, %v1272_v14  ;;  %v1284_v28 = vmul.f32 0.5, %v1274_v0  ;;  %v1502_v55 = vld [vmem:[%s6822_s3 + $0xd0] sm:$0xff]  ;;  %v1497_v14 = vld [vmem:[%s6822_s3 + $0xa8] sm:$0xff] }
 0x68e   :  { %v1494_v0 = vld [vmem:[%s6822_s3 + $0x90] sm:$0xff] }
 0x68f   :  { %3579 = vtanh.f32 %v1279_v57  ;;  %v1498_v57 = vld [vmem:[%s6822_s3 + $0xb0] sm:$0xff] }
 0x690   :  { %3581 = vtanh.f32 %v1273_v25  ;;  %v1493_v25 = vld [vmem:[%s6822_s3 + $0x88] sm:$0xff] }
 0x691   :  { %3583 = vtanh.f32 %v1284_v28  ;;  %v1489_v28 = vld [vmem:[%s6822_s3 + $0x68] sm:$0xff] }
 0x69a   :  { %v3578_v63 = vpop.eup %3577 }
 0x69b   :  { %v1277_v30 = vmul.f32 0.5, %v3578_v63  ;;  %v1491_v63 = vld [vmem:[%s6822_s3 + $0x78] sm:$0xff] }
 0x69c   :  { %v3580_v32 = vpop.eup %3579 }
 0x69d   :  { %v1278_v61 = vadd.f32 0.5, %v1277_v30  ;;  %v1281_v58 = vmul.f32 0.5, %v3580_v32  ;;  %v3582_v3 = vpop.eup %3581  ;;  %v1488_v30 = vld [vmem:[%s6822_s3 + $0x60] sm:$0xff]  ;;  %v1490_v32 = vld [vmem:[%s6822_s3 + $0x70] sm:$0xff] }
 0x69e   :  { %v3584_v4 = vpop.eup %3583 }
 0x69f   :  { %v1282_v62 = vadd.f32 0.5, %v1281_v58  ;;  %v1289_v31 = vmul.f32 %v3582_v3, %v1278_v61  ;;  %v1286_v6 = vmul.f32 0.5, %v3584_v4  ;;  %v1485_v61 = vld [vmem:[%s6822_s3 + $0x48] sm:$0xff]  ;;  %v1487_v58 = vld [vmem:[%s6822_s3 + $0x58] sm:$0xff]  ;;  %v1486_v3 = vld [vmem:[%s6822_s3 + $0x50] sm:$0xff] }
 0x6a0   :  { %v1480_v4 = vld [vmem:[%s6822_s3 + $0x20] sm:$0xff] }
 0x6a1   :  { %v1288_v59 = vmul.f32 %v1282_v62, %v5064_v24  ;;  %v1287_v8 = vadd.f32 0.5, %v1286_v6  ;;  %v1530_v24 = vld [vmem:[%s6822_s3 + $0x1b0] sm:$0xff]  ;;  %v1484_v62 = vld [vmem:[%s6822_s3 + $0x40] sm:$0xff] }
 0x6a2   :  { %v1482_v6 = vld [vmem:[%s6822_s3 + $0x30] sm:$0xff] }
 0x6a3   :  { %v5154_v1 = vadd.f32 %v1289_v31, %v1288_v59  ;;  %v1481_v59 = vld [vmem:[%s6822_s3 + $0x28] sm:$0xff]  ;;  %v1483_v31 = vld [vmem:[%s6822_s3 + $0x38] sm:$0xff] }
 0x6a5   :  { %3585 = vtanh.f32 %v5154_v1 }
 0x6b2   :  { %v3586_v12 = vpop.eup %3585 }
 0x6b3   :  { %v5157_v16 = vmul.f32 %v3586_v12, %v1287_v8  ;;  %v1477_v8 = vld [vmem:[%s6822_s3 + $0x8] sm:$0xff]  ;;  %v1479_v12 = vld [vmem:[%s6822_s3 + $0x18] sm:$0xff] }
 0x6b5   :  { %1365 = vmatmul.mubr.f32.vlgmr.msra.gmra.mxu0 %v5157_v16  ;;  %1436 = vmatmul.mubr.f32.vlgmr.msra.gmra.mxu1 %v5157_v16 }
 0x6b6   :  { %1563 = vmatpush1.msra.mxu0 %v1536_v19  ;;  %1676 = vmatpush1.msra.mxu1 %v1538_v23  ;;  %v1476_v19 = vld [vmem:[%s6822_s3] sm:$0xff]  ;;  %v1478_v23 = vld [vmem:[%s6822_s3 + $0x10] sm:$0xff] }
 0x6b7   :  { %1564 = vmatprep.subr.mxu0 %v1533_v5  ;;  %1677 = vmatprep.subr.mxu1 %v1535_v11  ;;  %v7116_v5 = vld [vmem:[#allocation26_spill] sm:$0xff]  ;;  %v7117_v11 = vld [vmem:[#allocation27_spill] sm:$0xff] }
 0x6b8   :  { %1565 = vmatpush1.msra.mxu0 %v1532_v27  ;;  %1678 = vmatpush1.msra.mxu1 %v1534_v20  ;;  %v7118_v27 = vld [vmem:[#allocation28_spill] sm:$0xff]  ;;  %v7119_v20 = vld [vmem:[#allocation9_spill] sm:$0xff] }
 0x6b9   :  { %1566 = vmatprep.subr.mxu0 %v1529_v9  ;;  %1679 = vmatprep.subr.mxu1 %v1531_v2  ;;  %v7120_v9 = vld [vmem:[#allocation22_spill] sm:$0xff]  ;;  %v5380_v2 = vld [vmem:[%s6823_s2 + $0x1e8] sm:$0xff] }
 0x6ba   :  { %1567 = vmatpush1.msra.mxu0 %v1528_v17  ;;  %1680 = vmatpush1.msra.mxu1 %v1530_v24  ;;  %7121 = vst [vmem:[#allocation18_spill] sm:$0xff] %v5380_v2  ;;  %v5397_v17 = vld [vmem:[%s6823_s2 + $0x1f0] sm:$0xff]  ;;  %v5403_v24 = vld [vmem:[%s6823_s2 + $0x1c8] sm:$0xff] }
 0x6bb   :  { %1568 = vmatprep.subr.mxu0 %v1525_v13  ;;  %1681 = vmatprep.subr.mxu1 %v1527_v15  ;;  %v5409_v13 = vld [vmem:[%s6823_s2 + $0x1d8] sm:$0xff]  ;;  %v5415_v15 = vld [vmem:[%s6823_s2 + $0x1c0] sm:$0xff] }
 0x6bc   :  { %1569 = vmatpush1.msra.mxu0 %v1524_v7  ;;  %1682 = vmatpush1.msra.mxu1 %v1526_v56  ;;  %v5421_v7 = vld [vmem:[%s6823_s2 + $0x1d0] sm:$0xff]  ;;  %v5427_v56 = vld [vmem:[%s6823_s2 + $0x1a8] sm:$0xff] }
 0x6bd   :  { %1570 = vmatprep.subr.mxu0 %v1521_v21  ;;  %1683 = vmatprep.subr.mxu1 %v1523_v33  ;;  %v5433_v21 = vld [vmem:[%s6823_s2 + $0x1b8] sm:$0xff]  ;;  %v5439_v33 = vld [vmem:[%s6823_s2 + $0x1a0] sm:$0xff] }
 0x6be   :  { %1571 = vmatpush1.msra.mxu0 %v1520_v22  ;;  %1684 = vmatpush1.msra.mxu1 %v1522_v34  ;;  %v5445_v22 = vld [vmem:[%s6823_s2 + $0x1b0] sm:$0xff]  ;;  %v5451_v34 = vld [vmem:[%s6823_s2 + $0x188] sm:$0xff] }
 0x6bf   :  { %1572 = vmatprep.subr.mxu0 %v1517_v35  ;;  %1685 = vmatprep.subr.mxu1 %v1519_v36  ;;  %v5457_v35 = vld [vmem:[%s6823_s2 + $0x198] sm:$0xff]  ;;  %v5463_v36 = vld [vmem:[%s6823_s2 + $0x180] sm:$0xff] }
 0x6c0   :  { %1573 = vmatpush1.msra.mxu0 %v1516_v37  ;;  %1686 = vmatpush1.msra.mxu1 %v1518_v38  ;;  %v5469_v37 = vld [vmem:[%s6823_s2 + $0x190] sm:$0xff]  ;;  %v5475_v38 = vld [vmem:[%s6823_s2 + $0x168] sm:$0xff] }
 0x6c1   :  { %1574 = vmatprep.subr.mxu0 %v1513_v39  ;;  %1687 = vmatprep.subr.mxu1 %v1515_v40  ;;  %v5481_v39 = vld [vmem:[%s6823_s2 + $0x178] sm:$0xff]  ;;  %v5487_v40 = vld [vmem:[%s6823_s2 + $0x160] sm:$0xff] }
 0x6c2   :  { %1575 = vmatpush1.msra.mxu0 %v1512_v41  ;;  %1688 = vmatpush1.msra.mxu1 %v1514_v42  ;;  %v5493_v41 = vld [vmem:[%s6823_s2 + $0x170] sm:$0xff]  ;;  %v5499_v42 = vld [vmem:[%s6823_s2 + $0x148] sm:$0xff] }
 0x6c3   :  { %1576 = vmatprep.subr.mxu0 %v1509_v43  ;;  %1689 = vmatprep.subr.mxu1 %v1511_v44  ;;  %v5505_v43 = vld [vmem:[%s6823_s2 + $0x158] sm:$0xff]  ;;  %v5511_v44 = vld [vmem:[%s6823_s2 + $0x140] sm:$0xff] }
 0x6c4   :  { %1577 = vmatpush1.msra.mxu0 %v1508_v45  ;;  %1690 = vmatpush1.msra.mxu1 %v1510_v46  ;;  %v5517_v45 = vld [vmem:[%s6823_s2 + $0x128] sm:$0xff]  ;;  %v5522_v46 = vld [vmem:[%s6823_s2 + $0x150] sm:$0xff] }
 0x6c5   :  { %1578 = vmatprep.subr.mxu0 %v1505_v48  ;;  %1691 = vmatprep.subr.mxu1 %v1507_v49  ;;  %v5529_v48 = vld [vmem:[%s6823_s2 + $0x120] sm:$0xff]  ;;  %v5534_v49 = vld [vmem:[%s6823_s2 + $0x138] sm:$0xff] }
 0x6c6   :  { %1579 = vmatpush1.msra.mxu0 %v1504_v50  ;;  %1692 = vmatpush1.msra.mxu1 %v1506_v51  ;;  %v5539_v50 = vld [vmem:[%s6823_s2 + $0x108] sm:$0xff]  ;;  %v5546_v51 = vld [vmem:[%s6823_s2 + $0x130] sm:$0xff] }
 0x6c7   :  { %1580 = vmatprep.subr.mxu0 %v1501_v52  ;;  %1693 = vmatprep.subr.mxu1 %v1503_v53  ;;  %v5553_v52 = vld [vmem:[%s6823_s2 + $0x118] sm:$0xff]  ;;  %v5559_v53 = vld [vmem:[%s6823_s2 + $0x100] sm:$0xff] }
 0x6c8   :  { %1581 = vmatpush1.msra.mxu0 %v1500_v54  ;;  %1694 = vmatpush1.msra.mxu1 %v1502_v55  ;;  %v5565_v54 = vld [vmem:[%s6823_s2 + $0x110] sm:$0xff]  ;;  %v5571_v55 = vld [vmem:[%s6823_s2 + $0xe8] sm:$0xff] }
 0x6c9   :  { %1582 = vmatprep.subr.mxu0 %v1497_v14  ;;  %1695 = vmatprep.subr.mxu1 %v1499_v10  ;;  %v5577_v14 = vld [vmem:[%s6823_s2 + $0xf8] sm:$0xff]  ;;  %v5583_v10 = vld [vmem:[%s6823_s2 + $0xe0] sm:$0xff] }
 0x6ca   :  { %1583 = vmatpush1.msra.mxu0 %v1496_v29  ;;  %1696 = vmatpush1.msra.mxu1 %v1498_v57  ;;  %v5589_v29 = vld [vmem:[%s6823_s2 + $0xf0] sm:$0xff]  ;;  %v5595_v57 = vld [vmem:[%s6823_s2 + $0xc8] sm:$0xff] }
 0x6cb   :  { %1584 = vmatprep.subr.mxu0 %v1493_v25  ;;  %1697 = vmatprep.subr.mxu1 %v1495_v26  ;;  %v5601_v25 = vld [vmem:[%s6823_s2 + $0xd8] sm:$0xff]  ;;  %v5607_v26 = vld [vmem:[%s6823_s2 + $0xc0] sm:$0xff] }
 0x6cc   :  { %1585 = vmatpush1.msra.mxu0 %v1492_v60  ;;  %1698 = vmatpush1.msra.mxu1 %v1494_v0  ;;  %v5613_v60 = vld [vmem:[%s6823_s2 + $0xd0] sm:$0xff]  ;;  %v5619_v0 = vld [vmem:[%s6823_s2 + $0xa8] sm:$0xff] }
 0x6cd   :  { %1586 = vmatprep.subr.mxu0 %v1489_v28  ;;  %1699 = vmatprep.subr.mxu1 %v1491_v63  ;;  %v5625_v28 = vld [vmem:[%s6823_s2 + $0xb8] sm:$0xff]  ;;  %v5631_v63 = vld [vmem:[%s6823_s2 + $0xa0] sm:$0xff] }
 0x6ce   :  { %1587 = vmatpush1.msra.mxu0 %v1488_v30  ;;  %1700 = vmatpush1.msra.mxu1 %v1490_v32  ;;  %v5637_v30 = vld [vmem:[%s6823_s2 + $0xb0] sm:$0xff]  ;;  %v5643_v32 = vld [vmem:[%s6823_s2 + $0x88] sm:$0xff] }
 0x6cf   :  { %1588 = vmatprep.subr.mxu0 %v1485_v61  ;;  %1701 = vmatprep.subr.mxu1 %v1487_v58  ;;  %7123 = vst [vmem:[#allocation10_spill] sm:$0xff] %v5637_v30  ;;  %7124 = vst [vmem:[#allocation23_spill] sm:$0xff] %v5643_v32  ;;  %v5649_v61 = vld [vmem:[%s6823_s2 + $0x98] sm:$0xff]  ;;  %v5655_v58 = vld [vmem:[%s6823_s2 + $0x80] sm:$0xff] }
 0x6d0   :  { %1589 = vmatpush1.msra.mxu0 %v1484_v62  ;;  %1702 = vmatpush1.msra.mxu1 %v1486_v3  ;;  %7125 = vst [vmem:[#allocation19_spill] sm:$0xff] %v5649_v61  ;;  %7126 = vst [vmem:[#allocation15_spill] sm:$0xff] %v5655_v58  ;;  %v5661_v62 = vld [vmem:[%s6823_s2 + $0x90] sm:$0xff]  ;;  %v5667_v3 = vld [vmem:[%s6823_s2 + $0x68] sm:$0xff] }
 0x6d1   :  { %1590 = vmatprep.subr.mxu0 %v1481_v59  ;;  %1703 = vmatprep.subr.mxu1 %v1483_v31  ;;  %7127 = vst [vmem:[#allocation11_spill] sm:$0xff] %v5661_v62  ;;  %7128 = vst [vmem:[#allocation24_spill] sm:$0xff] %v5667_v3  ;;  %v5673_v59 = vld [vmem:[%s6823_s2 + $0x78] sm:$0xff]  ;;  %v5679_v31 = vld [vmem:[%s6823_s2 + $0x60] sm:$0xff] }
 0x6d2   :  { %1591 = vmatpush1.msra.mxu0 %v1480_v4  ;;  %1704 = vmatpush1.msra.mxu1 %v1482_v6  ;;  %7129 = vst [vmem:[#allocation20_spill] sm:$0xff] %v5673_v59  ;;  %7130 = vst [vmem:[#allocation16_spill] sm:$0xff] %v5679_v31  ;;  %v5685_v4 = vld [vmem:[%s6823_s2 + $0x70] sm:$0xff]  ;;  %v5691_v6 = vld [vmem:[%s6823_s2 + $0x48] sm:$0xff] }
 0x6d3   :  { %1592 = vmatprep.subr.mxu0 %v1477_v8  ;;  %1705 = vmatprep.subr.mxu1 %v1479_v12  ;;  %7131 = vst [vmem:[#allocation12_spill] sm:$0xff] %v5685_v4  ;;  %7132 = vst [vmem:[#allocation25_spill] sm:$0xff] %v5691_v6  ;;  %v5697_v8 = vld [vmem:[%s6823_s2 + $0x58] sm:$0xff]  ;;  %v5703_v12 = vld [vmem:[%s6823_s2 + $0x40] sm:$0xff] }
 0x6d4   :  { %1593 = vmatpush1.msra.mxu0 %v1476_v19  ;;  %1626 = vmatprep.mubr.f32.mxu0 %v7115_v47  ;;  %7133 = vst [vmem:[#allocation21_spill] sm:$0xff] %v5697_v8  ;;  %7134 = vst [vmem:[#allocation8_spill] sm:$0xff] %v5703_v12  ;;  %v5709_v19 = vld [vmem:[%s6823_s2 + $0x50] sm:$0xff] }
 0x6d5   :  { %1706 = vmatpush1.msra.mxu1 %v1478_v23  ;;  %1739 = vmatprep.mubr.f32.mxu1 %v7115_v47  ;;  %7135 = vst [vmem:[#allocation13_spill] sm:$0xff] %v5709_v19  ;;  %v5715_v23 = vld [vmem:[%s6823_s2 + $0x28] sm:$0xff] }
 0x6d6   :  { %1627 = vmatmul.mubr.f32.vlgmr.msra.gmra.mxu0 %v7116_v5  ;;  %1740 = vmatmul.mubr.f32.vlgmr.msra.gmra.mxu1 %v7116_v5  ;;  %7136 = vst [vmem:[#allocation17_spill] sm:$0xff] %v5715_v23  ;;  %v5721_v5 = vld [vmem:[%s6823_s2 + $0x38] sm:$0xff] }
 0x6d7   :  { %1632 = vmatprep.mubr.f32.mxu0 %v7115_v47  ;;  %1745 = vmatprep.mubr.f32.mxu1 %v7115_v47  ;;  %7137 = vst [vmem:[#allocation26_spill] sm:$0xff] %v5721_v5 }
 0x6d8   :  { %1893 = vmatprep.subr.mxu0 %v5380_v2 }
 0x6da   :  { %1633 = vmatmul.mubr.f32.gmra.mxu0 %v7117_v11  ;;  %1746 = vmatmul.mubr.f32.gmra.mxu1 %v7117_v11  ;;  %v5727_v11 = vld [vmem:[%s6823_s2 + $0x20] sm:$0xff] }
 0x6db   :  { %1638 = vmatprep.mubr.f32.mxu0 %v7115_v47  ;;  %1751 = vmatprep.mubr.f32.mxu1 %v7115_v47  ;;  %7138 = vst [vmem:[#allocation27_spill] sm:$0xff] %v5727_v11 }
 0x6de   :  { %1639 = vmatmul.mubr.f32.gmra.mxu0 %v7118_v27  ;;  %1752 = vmatmul.mubr.f32.gmra.mxu1 %v7118_v27  ;;  %v5733_v27 = vld [vmem:[%s6823_s2 + $0x30] sm:$0xff] }
 0x6df   :  { %1644 = vmatprep.mubr.f32.mxu0 %v7115_v47  ;;  %1757 = vmatprep.mubr.f32.mxu1 %v7115_v47  ;;  %7139 = vst [vmem:[#allocation28_spill] sm:$0xff] %v5733_v27 }
 0x6e2   :  { %1645 = vmatmul.mubr.f32.gmra.mxu0 %v7119_v20  ;;  %1758 = vmatmul.mubr.f32.gmra.mxu1 %v7119_v20  ;;  %v5739_v20 = vld [vmem:[%s6823_s2 + $0x8] sm:$0xff] }
 0x6e3   :  { %1650 = vmatprep.mubr.f32.mxu0 %v7115_v47  ;;  %1763 = vmatprep.mubr.f32.mxu1 %v7115_v47  ;;  %7140 = vst [vmem:[#allocation9_spill] sm:$0xff] %v5739_v20 }
 0x6e6   :  { %1651 = vmatmul.mubr.f32.gmra.mxu0 %v7120_v9  ;;  %1764 = vmatmul.mubr.f32.gmra.mxu1 %v7120_v9  ;;  %v5745_v9 = vld [vmem:[%s6823_s2 + $0x18] sm:$0xff] }
 0x6e7   :  { %1656 = vmatprep.mubr.f32.mxu0 %v7115_v47  ;;  %1769 = vmatprep.mubr.f32.mxu1 %v7115_v47  ;;  %7141 = vst [vmem:[#allocation22_spill] sm:$0xff] %v5745_v9 }
 0x6ea   :  { %1657 = vmatmul.mubr.f32.gmra.mxu0 %v5067_v18  ;;  %1770 = vmatmul.mubr.f32.gmra.mxu1 %v5067_v18  ;;  %v5385_v18 = vld [vmem:[%s6823_s2 + $0x1f8] sm:$0xff] }
 0x6eb   :  { %1662 = vmatprep.mubr.f32.mxu0 %v7115_v47  ;;  %1775 = vmatprep.mubr.f32.mxu1 %v7115_v47  ;;  %7122 = vst [vmem:[#allocation14_spill] sm:$0xff] %v5385_v18 }
 0x6ec   :  { %1964 = vmatprep.subr.mxu1 %v5385_v18 }
 0x6ed   :  { %1965 = vmatpush1.msra.mxu1 %v5397_v17 }
 0x6ee   :  { %1663 = vmatmul.mubr.f32.gmra.mxu0 %v5157_v16  ;;  %1776 = vmatmul.mubr.f32.gmra.mxu1 %v5157_v16  ;;  %v5391_v16 = vld [vmem:[%s6823_s2 + $0x1e0] sm:$0xff] }
 0x6ef   :  { %1668 = vmatprep.mubr.f32.mxu0 %v7115_v47  ;;  %1781 = vmatprep.mubr.f32.mxu1 %v7115_v47 }
 0x6f0   :  { %1894 = vmatpush1.msra.mxu0 %v5391_v16  ;;  %1966 = vmatprep.subr.mxu1 %v5409_v13 }
 0x6f1   :  { %1895 = vmatprep.subr.mxu0 %v5403_v24  ;;  %1967 = vmatpush1.msra.mxu1 %v5421_v7 }
 0x6f2   :  { %1896 = vmatpush1.msra.mxu0 %v5415_v15  ;;  %1968 = vmatprep.subr.mxu1 %v5433_v21 }
 0x6f3   :  { %1897 = vmatprep.subr.mxu0 %v5427_v56  ;;  %1969 = vmatpush1.msra.mxu1 %v5445_v22 }
 0x6f4   :  { %1898 = vmatpush1.msra.mxu0 %v5439_v33  ;;  %1970 = vmatprep.subr.mxu1 %v5457_v35 }
 0x6f5   :  { %1899 = vmatprep.subr.mxu0 %v5451_v34  ;;  %1971 = vmatpush1.msra.mxu1 %v5469_v37 }
 0x6f6   :  { %1900 = vmatpush1.msra.mxu0 %v5463_v36  ;;  %1972 = vmatprep.subr.mxu1 %v5481_v39 }
 0x6f7   :  { %1901 = vmatprep.subr.mxu0 %v5475_v38  ;;  %1973 = vmatpush1.msra.mxu1 %v5493_v41 }
 0x6f8   :  { %1902 = vmatpush1.msra.mxu0 %v5487_v40  ;;  %1974 = vmatprep.subr.mxu1 %v5505_v43 }
 0x6f9   :  { %1903 = vmatprep.subr.mxu0 %v5499_v42  ;;  %1975 = vmatpush1.msra.mxu1 %v5522_v46 }
 0x6fa   :  { %1904 = vmatpush1.msra.mxu0 %v5511_v44  ;;  %1976 = vmatprep.subr.mxu1 %v5534_v49 }
 0x6fb   :  { %1905 = vmatprep.subr.mxu0 %v5517_v45  ;;  %1977 = vmatpush1.msra.mxu1 %v5546_v51 }
 0x6fc   :  { %1906 = vmatpush1.msra.mxu0 %v5529_v48  ;;  %1978 = vmatprep.subr.mxu1 %v5553_v52 }
 0x6fd   :  { %1907 = vmatprep.subr.mxu0 %v5539_v50  ;;  %1979 = vmatpush1.msra.mxu1 %v5565_v54 }
 0x6fe   :  { %1908 = vmatpush1.msra.mxu0 %v5559_v53  ;;  %1980 = vmatprep.subr.mxu1 %v5577_v14 }
 0x6ff   :  { %1909 = vmatprep.subr.mxu0 %v5571_v55  ;;  %1981 = vmatpush1.msra.mxu1 %v5589_v29 }
 0x700   :  { %1910 = vmatpush1.msra.mxu0 %v5583_v10  ;;  %1982 = vmatprep.subr.mxu1 %v5601_v25 }
 0x701   :  { %1911 = vmatprep.subr.mxu0 %v5595_v57  ;;  %1983 = vmatpush1.msra.mxu1 %v5613_v60 }
 0x702   :  { %1912 = vmatpush1.msra.mxu0 %v5607_v26  ;;  %1984 = vmatprep.subr.mxu1 %v5625_v28 }
 0x703   :  { %1913 = vmatprep.subr.mxu0 %v5619_v0  ;;  %1985 = vmatpush1.msra.mxu1 %v5637_v30 }
 0x704   :  { %1914 = vmatpush1.msra.mxu0 %v5631_v63  ;;  %1986 = vmatprep.subr.mxu1 %v5649_v61 }
 0x705   :  { %1915 = vmatprep.subr.mxu0 %v5643_v32  ;;  %1987 = vmatpush1.msra.mxu1 %v5661_v62 }
 0x706   :  { %1916 = vmatpush1.msra.mxu0 %v5655_v58  ;;  %1988 = vmatprep.subr.mxu1 %v5673_v59 }
 0x707   :  { %1917 = vmatprep.subr.mxu0 %v5667_v3  ;;  %1989 = vmatpush1.msra.mxu1 %v5685_v4 }
 0x708   :  { %1918 = vmatpush1.msra.mxu0 %v5679_v31  ;;  %1990 = vmatprep.subr.mxu1 %v5697_v8 }
 0x709   :  { %1919 = vmatprep.subr.mxu0 %v5691_v6  ;;  %1991 = vmatpush1.msra.mxu1 %v5709_v19  ;;  %v3446_v6 = vld [vmem:[%s6821_s0 + $0xf8] sm:$0xff] }
 0x70a   :  { %1920 = vmatpush1.msra.mxu0 %v5703_v12  ;;  %1992 = vmatprep.subr.mxu1 %v5721_v5  ;;  %v5751_v5 = vld [vmem:[%s6823_s2] sm:$0xff] }
 0x70b   :  { %1921 = vmatprep.subr.mxu0 %v5715_v23  ;;  %1993 = vmatpush1.msra.mxu1 %v5733_v27  ;;  %7142 = vst [vmem:[#allocation29_spill] sm:$0xff] %v5751_v5 }
 0x70c   :  { %1922 = vmatpush1.msra.mxu0 %v5727_v11  ;;  %1994 = vmatprep.subr.mxu1 %v5745_v9  ;;  %v5757_v11 = vld [vmem:[%s6823_s2 + $0x10] sm:$0xff]  ;;  %v3444_v9 = vld [vmem:[%s6821_s0 + $0xe8] sm:$0xff] }
 0x70d   :  { %1923 = vmatprep.subr.mxu0 %v5739_v20  ;;  %7143 = vst [vmem:[#allocation30_spill] sm:$0xff] %v5757_v11  ;;  %1995 = vmatpush1.msra.mxu1 %v5757_v11  ;;  %v3443_v20 = vld [vmem:[%s6821_s0 + $0xe0] sm:$0xff]  ;;  %v3445_v11 = vld [vmem:[%s6821_s0 + $0xf0] sm:$0xff] }
 0x70e   :  { %1924 = vmatpush1.msra.mxu0 %v5751_v5  ;;  %2136 = vmatprep.subr.mxu1 %v5385_v18 }
 0x70f   :  { %2065 = vmatprep.subr.mxu0 %v5380_v2 }
 0x775   :  { %v1366_v27 = vpop.f32.mrf.mxu0  ;;  %v1437_v2 = vpop.f32.mrf.mxu1 }
 0x776   :  { %v1442_v23 = vadd.f32 %v3443_v20, %v1366_v27  ;;  %v1444_v5 = vadd.f32 %v3445_v11, %v1437_v2 }
 0x777   :  { %v1368_v19 = vpop.f32.mrf.mxu0  ;;  %v1439_v4 = vpop.f32.mrf.mxu1 }
 0x778   :  { %v1446_v12 = vmul.f32 0.5, %v1442_v23  ;;  %v1443_v8 = vadd.f32 %v3444_v9, %v1368_v19  ;;  %v1445_v31 = vadd.f32 %v3446_v6, %v1439_v4  ;;  %v7151_v4 = vld [vmem:[#allocation25_spill] sm:$0xff] }
 0x779   :  { %v7152_v6 = vld [vmem:[#allocation21_spill] sm:$0xff] }
 0x77a   :  { %3587 = vtanh.f32 %v1446_v12  ;;  %v1450_v18 = vmul.f32 0.5, %v1443_v8  ;;  %v1455_v27 = vmul.f32 0.5, %v1445_v31  ;;  %v7150_v31 = vld [vmem:[#allocation12_spill] sm:$0xff] }
 0x77c   :  { %3589 = vtanh.f32 %v1450_v18 }
 0x77d   :  { %3591 = vtanh.f32 %v1444_v5 }
 0x77e   :  { %3593 = vtanh.f32 %v1455_v27  ;;  %v7153_v27 = vld [vmem:[#allocation8_spill] sm:$0xff] }
 0x787   :  { %v3588_v20 = vpop.eup %3587 }
 0x788   :  { %v1448_v23 = vmul.f32 0.5, %v3588_v20  ;;  %v7154_v20 = vld [vmem:[#allocation13_spill] sm:$0xff] }
 0x789   :  { %v3590_v19 = vpop.eup %3589 }
 0x78a   :  { %v1449_v9 = vadd.f32 0.5, %v1448_v23  ;;  %v1452_v59 = vmul.f32 0.5, %v3590_v19  ;;  %v3592_v62 = vpop.eup %3591  ;;  %v7155_v23 = vld [vmem:[#allocation17_spill] sm:$0xff]  ;;  %v7156_v19 = vld [vmem:[#allocation26_spill] sm:$0xff] }
 0x78b   :  { %v3594_v12 = vpop.eup %3593 }
 0x78c   :  { %v1453_v3 = vadd.f32 0.5, %v1452_v59  ;;  %v1460_v2 = vmul.f32 %v3592_v62, %v1449_v9  ;;  %v1457_v11 = vmul.f32 0.5, %v3594_v12  ;;  %v7147_v62 = vld [vmem:[#allocation24_spill] sm:$0xff]  ;;  %v7157_v9 = vld [vmem:[#allocation27_spill] sm:$0xff]  ;;  %v7161_v12 = vld [vmem:[#allocation29_spill] sm:$0xff] }
 0x78d   :  { %v7149_v59 = vld [vmem:[#allocation16_spill] sm:$0xff] }
 0x78e   :  { %v1459_v8 = vmul.f32 %v1453_v3, %v5154_v1  ;;  %v1458_v58 = vadd.f32 0.5, %v1457_v11  ;;  %v7144_v1 = vld [vmem:[#allocation19_spill] sm:$0xff]  ;;  %v7148_v3 = vld [vmem:[#allocation20_spill] sm:$0xff]  ;;  %v7162_v11 = vld [vmem:[#allocation30_spill] sm:$0xff] }
 0x790   :  { %v1461_v18 = vadd.f32 %v1460_v2, %v1459_v8  ;;  %v7158_v8 = vld [vmem:[#allocation28_spill] sm:$0xff]  ;;  %v7159_v2 = vld [vmem:[#allocation9_spill] sm:$0xff] }
 0x792   :  { %3595 = vtanh.f32 %v1461_v18  ;;  %v7160_v18 = vld [vmem:[#allocation22_spill] sm:$0xff] }
 0x79f   :  { %v3596_v61 = vpop.eup %3595 }
 0x7a0   :  { %v1463_v5 = vmul.f32 %v3596_v61, %v1458_v58  ;;  %v7145_v61 = vld [vmem:[#allocation15_spill] sm:$0xff] }
 0x7a1   :  { %v7146_v58 = vld [vmem:[#allocation11_spill] sm:$0xff] }
 0x7a2   :  { %1669 = vmatmul.mubr.f32.gmra.mxu0 %v1463_v5  ;;  %1782 = vmatmul.mubr.f32.gmra.mxu1 %v1463_v5  ;;  %v7163_v5 = vld [vmem:[#allocation18_spill] sm:$0xff] }
 0x7a3   :  { %1957 = vmatprep.mubr.f32.mxu0 %v7115_v47  ;;  %2028 = vmatprep.mubr.f32.mxu1 %v7115_v47 }
 0x7a6   :  { %1958 = vmatmul.mubr.f32.vlgmr.msra.gmra.mxu0 %v7115_v47  ;;  %2029 = vmatmul.mubr.f32.vlgmr.msra.gmra.mxu1 %v7115_v47 }
 0x7a7   :  { %2066 = vmatpush1.msra.mxu0 %v5391_v16  ;;  %2137 = vmatpush1.msra.mxu1 %v5397_v17 }
 0x7a8   :  { %2067 = vmatprep.subr.mxu0 %v5403_v24  ;;  %2138 = vmatprep.subr.mxu1 %v5409_v13 }
 0x7a9   :  { %2068 = vmatpush1.msra.mxu0 %v5415_v15  ;;  %2139 = vmatpush1.msra.mxu1 %v5421_v7 }
 0x7aa   :  { %2069 = vmatprep.subr.mxu0 %v5427_v56  ;;  %2140 = vmatprep.subr.mxu1 %v5433_v21 }
 0x7ab   :  { %2070 = vmatpush1.msra.mxu0 %v5439_v33  ;;  %2141 = vmatpush1.msra.mxu1 %v5445_v22 }
 0x7ac   :  { %2071 = vmatprep.subr.mxu0 %v5451_v34  ;;  %2142 = vmatprep.subr.mxu1 %v5457_v35 }
 0x7ad   :  { %2072 = vmatpush1.msra.mxu0 %v5463_v36  ;;  %2143 = vmatpush1.msra.mxu1 %v5469_v37 }
 0x7ae   :  { %2073 = vmatprep.subr.mxu0 %v5475_v38  ;;  %2144 = vmatprep.subr.mxu1 %v5481_v39 }
 0x7af   :  { %2074 = vmatpush1.msra.mxu0 %v5487_v40  ;;  %2145 = vmatpush1.msra.mxu1 %v5493_v41 }
 0x7b0   :  { %2075 = vmatprep.subr.mxu0 %v5499_v42  ;;  %2146 = vmatprep.subr.mxu1 %v5505_v43 }
 0x7b1   :  { %2076 = vmatpush1.msra.mxu0 %v5511_v44  ;;  %2147 = vmatpush1.msra.mxu1 %v5522_v46 }
 0x7b2   :  { %2077 = vmatprep.subr.mxu0 %v5517_v45  ;;  %2148 = vmatprep.subr.mxu1 %v5534_v49 }
 0x7b3   :  { %2078 = vmatpush1.msra.mxu0 %v5529_v48  ;;  %2149 = vmatpush1.msra.mxu1 %v5546_v51 }
 0x7b4   :  { %2079 = vmatprep.subr.mxu0 %v5539_v50  ;;  %2150 = vmatprep.subr.mxu1 %v5553_v52 }
 0x7b5   :  { %2080 = vmatpush1.msra.mxu0 %v5559_v53  ;;  %2151 = vmatpush1.msra.mxu1 %v5565_v54 }
 0x7b6   :  { %2081 = vmatprep.subr.mxu0 %v5571_v55  ;;  %2152 = vmatprep.subr.mxu1 %v5577_v14 }
 0x7b7   :  { %2082 = vmatpush1.msra.mxu0 %v5583_v10  ;;  %2153 = vmatpush1.msra.mxu1 %v5589_v29 }
 0x7b8   :  { %2083 = vmatprep.subr.mxu0 %v5595_v57  ;;  %2154 = vmatprep.subr.mxu1 %v5601_v25 }
 0x7b9   :  { %2084 = vmatpush1.msra.mxu0 %v5607_v26  ;;  %2155 = vmatpush1.msra.mxu1 %v5613_v60 }
 0x7ba   :  { %2085 = vmatprep.subr.mxu0 %v5619_v0  ;;  %2156 = vmatprep.subr.mxu1 %v5625_v28 }
 0x7bb   :  { %2086 = vmatpush1.msra.mxu0 %v5631_v63  ;;  %2157 = vmatpush1.msra.mxu1 %v5637_v30 }
 0x7bc   :  { %2087 = vmatprep.subr.mxu0 %v5643_v32  ;;  %2158 = vmatprep.subr.mxu1 %v7144_v1 }
 0x7bd   :  { %2088 = vmatpush1.msra.mxu0 %v7145_v61  ;;  %2159 = vmatpush1.msra.mxu1 %v7146_v58 }
 0x7be   :  { %2089 = vmatprep.subr.mxu0 %v7147_v62  ;;  %2160 = vmatprep.subr.mxu1 %v7148_v3 }
 0x7bf   :  { %2090 = vmatpush1.msra.mxu0 %v7149_v59  ;;  %2161 = vmatpush1.msra.mxu1 %v7150_v31 }
 0x7c0   :  { %2091 = vmatprep.subr.mxu0 %v7151_v4  ;;  %2162 = vmatprep.subr.mxu1 %v7152_v6 }
 0x7c1   :  { %2092 = vmatpush1.msra.mxu0 %v7153_v27  ;;  %2163 = vmatpush1.msra.mxu1 %v7154_v20 }
 0x7c2   :  { %2093 = vmatprep.subr.mxu0 %v7155_v23  ;;  %2164 = vmatprep.subr.mxu1 %v7156_v19  ;;  %v7164_v23 = vld [vmem:[#allocation14_spill] sm:$0xff]  ;;  %v1628_v19 = vpop.f32.mrf.mxu0 }
 0x7c3   :  { %2094 = vmatpush1.msra.mxu0 %v7157_v9  ;;  %2165 = vmatpush1.msra.mxu1 %v7158_v8  ;;  %v1741_v9 = vpop.f32.mrf.mxu1 }
 0x7c4   :  { %2095 = vmatprep.subr.mxu0 %v7159_v2  ;;  %2166 = vmatprep.subr.mxu1 %v7160_v18  ;;  %v1630_v20 = vpop.f32.mrf.mxu0 }
 0x7c5   :  { %2096 = vmatpush1.msra.mxu0 %v7161_v12  ;;  %2129 = vmatprep.mubr.f32.mxu0 %v7115_v47  ;;  %v1743_v8 = vpop.f32.mrf.mxu1 }
 0x7c6   :  { %2167 = vmatpush1.msra.mxu1 %v7162_v11  ;;  %2200 = vmatprep.mubr.f32.mxu1 %v7115_v47  ;;  %v5846_v27 = vpop.f32.mrf.mxu0 }
 0x7c7   :  { %2237 = vmatprep.subr.mxu0 %v7163_v5  ;;  %2308 = vmatprep.subr.mxu1 %v7164_v23  ;;  %7165 = vst [vmem:[#allocation31_spill] sm:$0xff] %v5846_v27  ;;  %v5848_v2 = vpop.f32.mrf.mxu1 }
 0x7c8   :  { %7166 = vst [vmem:[#allocation32_spill] sm:$0xff] %v5848_v2  ;;  %v5850_v18 = vpop.f32.mrf.mxu0 }
 0x7c9   :  { %7167 = vst [vmem:[#allocation33_spill] sm:$0xff] %v5850_v18  ;;  %v5852_v12 = vpop.f32.mrf.mxu1 }
 0x7ca   :  { %7168 = vst [vmem:[#allocation34_spill] sm:$0xff] %v5852_v12  ;;  %v5854_v6 = vpop.f32.mrf.mxu0 }
 0x7cb   :  { %7169 = vst [vmem:[#allocation35_spill] sm:$0xff] %v5854_v6  ;;  %v5856_v11 = vpop.f32.mrf.mxu1 }
 0x7cc   :  { %7170 = vst [vmem:[#allocation36_spill] sm:$0xff] %v5856_v11  ;;  %v5858_v47 = vpop.f32.mrf.mxu0 }
 0x7cd   :  { %7171 = vst [vmem:[#allocation37_spill] sm:$0xff] %v5858_v47  ;;  %v5860_v5 = vpop.f32.mrf.mxu1 }
 0x7ce   :  { %7172 = vst [vmem:[#allocation38_spill] sm:$0xff] %v5860_v5  ;;  %v5862_v23 = vpop.f32.mrf.mxu0  ;;  %v1542_v5 = vlaneseq }
 0x7cf   :  { %7173 = vst [vmem:[#allocation39_spill] sm:$0xff] %v5862_v23  ;;  %v5864_v4 = vpop.f32.mrf.mxu1 }
 0x7d0   :  { %7174 = vst [vmem:[#allocation40_spill] sm:$0xff] %v5864_v4  ;;  %v5866_v31 = vpop.f32.mrf.mxu0 }
 0x7d1   :  { %7175 = vst [vmem:[#allocation41_spill] sm:$0xff] %v5866_v31  ;;  %v5868_v27 = vpop.f32.mrf.mxu1  ;;  %v1543_v31 = vshrl.u32 %v1542_v5, 7 }
 0x7d2   :  { %7176 = vst [vmem:[#allocation42_spill] sm:$0xff] %v5868_v27  ;;  %v5870_v2 = vpop.f32.mrf.mxu0 }
 0x7d3   :  { %7177 = vst [vmem:[#allocation43_spill] sm:$0xff] %v5870_v2  ;;  %v5872_v18 = vpop.f32.mrf.mxu1  ;;  %v1544_v2 = vsub.s32 0, %v1543_v31  ;;  %v1552_v5 = vsub.s32 2, %v1543_v31  ;;  %v1556_v1 = vsub.s32 3, %v1543_v31 }
 0x7d4   :  { %7178 = vst [vmem:[#allocation44_spill] sm:$0xff] %v5872_v18  ;;  %v5874_v12 = vpop.f32.mrf.mxu0  ;;  %v1540_v18 = vld [vmem:[%s6824_s4] sm:$0xf] }
 0x7d5   :  { %7179 = vst [vmem:[#allocation45_spill] sm:$0xff] %v5874_v12  ;;  %v5876_v6 = vpop.f32.mrf.mxu1  ;;  %v5910_v61 = vrot.slane %v1540_v18, %v1552_v5 }
 0x7d6   :  { %7180 = vst [vmem:[#allocation46_spill] sm:$0xff] %v5876_v6  ;;  %v5878_v11 = vpop.f32.mrf.mxu0  ;;  %v1548_v6 = vsub.s32 1, %v1543_v31 }
 0x7d7   :  { %7181 = vst [vmem:[#allocation47_spill] sm:$0xff] %v5878_v11  ;;  %v5880_v47 = vpop.f32.mrf.mxu1 }
 0x7d8   :  { %7182 = vst [vmem:[#allocation48_spill] sm:$0xff] %v5880_v47  ;;  %v5882_v23 = vpop.f32.mrf.mxu0  ;;  %v5897_v47 = vrot.slane %v1540_v18, %v1544_v2 }
 0x7d9   :  { %7183 = vst [vmem:[#allocation49_spill] sm:$0xff] %v5882_v23  ;;  %v5884_v4 = vpop.f32.mrf.mxu1 }
 0x7da   :  { %7184 = vst [vmem:[#allocation50_spill] sm:$0xff] %v5884_v4  ;;  %v5886_v59 = vpop.f32.mrf.mxu0  ;;  %7189 = vst [vmem:[#allocation55_spill] sm:$0xff] %v5897_v47  ;;  %v1629_v3 = vadd.f32 %v1628_v19, %v5897_v47 }
 0x7db   :  { %7185 = vst [vmem:[#allocation51_spill] sm:$0xff] %v5886_v59  ;;  %v5888_v27 = vpop.f32.mrf.mxu1  ;;  %v5903_v59 = vrot.slane %v1540_v18, %v1548_v6  ;;  %v1742_v6 = vadd.f32 %v1741_v9, %v5910_v61 }
 0x7dc   :  { %7186 = vst [vmem:[#allocation52_spill] sm:$0xff] %v5888_v27  ;;  %v5893_v12 = vpop.f32.mrf.mxu0 }
 0x7dd   :  { %7187 = vst [vmem:[#allocation53_spill] sm:$0xff] %v5893_v12  ;;  %v5895_v11 = vpop.f32.mrf.mxu1  ;;  %7192 = vst [vmem:[#allocation58_spill] sm:$0xff] %v5903_v59 }
 0x7de   :  { %7188 = vst [vmem:[#allocation54_spill] sm:$0xff] %v5895_v11  ;;  %v1631_v11 = vadd.f32 %v1630_v20, %v5903_v59 }
 0x862   :  { %v5899_v23 = vpop.f32.mrf.mxu0  ;;  %v5901_v4 = vpop.f32.mrf.mxu1 }
 0x863   :  { %7190 = vst [vmem:[#allocation56_spill] sm:$0xff] %v5899_v23  ;;  %7191 = vst [vmem:[#allocation57_spill] sm:$0xff] %v5901_v4 }
 0x864   :  { %v5905_v27 = vpop.f32.mrf.mxu0  ;;  %v5908_v62 = vpop.f32.mrf.mxu1 }
 0x865   :  { %7193 = vst [vmem:[#allocation59_spill] sm:$0xff] %v5905_v27  ;;  %7194 = vst [vmem:[#allocation60_spill] sm:$0xff] %v5908_v62  ;;  %v5914_v27 = vrot.slane %v1540_v18, %v1556_v1 }
 0x866   :  { %v1959_v58 = vpop.f32.mrf.mxu0  ;;  %v2030_v4 = vpop.f32.mrf.mxu1 }
 0x867   :  { %v2035_v2 = vadd.f32 %v1959_v58, %v1629_v3  ;;  %v2037_v19 = vadd.f32 %v2030_v4, %v1742_v6  ;;  %v1744_v5 = vadd.f32 %v1743_v8, %v5914_v27  ;;  %v7197_v6 = vld [vmem:[#allocation23_spill] sm:$0xff] }
 0x868   :  { %v1961_v12 = vpop.f32.mrf.mxu0  ;;  %v2032_v62 = vpop.f32.mrf.mxu1 }
 0x869   :  { %v2039_v23 = vmul.f32 0.5, %v2035_v2  ;;  %v2036_v32 = vadd.f32 %v1961_v12, %v1631_v11  ;;  %v2038_v47 = vadd.f32 %v2032_v62, %v1744_v5  ;;  %v7199_v5 = vld [vmem:[#allocation15_spill] sm:$0xff] }
 0x86b   :  { %3597 = vtanh.f32 %v2039_v23  ;;  %v2043_v30 = vmul.f32 0.5, %v2036_v32  ;;  %v2048_v20 = vmul.f32 0.5, %v2038_v47  ;;  %v7196_v47 = vld [vmem:[#allocation10_spill] sm:$0xff] }
 0x86d   :  { %3599 = vtanh.f32 %v2043_v30 }
 0x86e   :  { %3601 = vtanh.f32 %v2037_v19  ;;  %v7198_v19 = vld [vmem:[#allocation19_spill] sm:$0xff] }
 0x86f   :  { %3603 = vtanh.f32 %v2048_v20  ;;  %v7200_v20 = vld [vmem:[#allocation11_spill] sm:$0xff] }
 0x878   :  { %v3598_v58 = vpop.eup %3597 }
 0x879   :  { %v2041_v3 = vmul.f32 0.5, %v3598_v58  ;;  %v7201_v58 = vld [vmem:[#allocation24_spill] sm:$0xff] }
 0x87a   :  { %v3600_v31 = vpop.eup %3599 }
 0x87b   :  { %v2042_v2 = vadd.f32 0.5, %v2041_v3  ;;  %v2045_v12 = vmul.f32 0.5, %v3600_v31  ;;  %v3602_v9 = vpop.eup %3601  ;;  %v7202_v3 = vld [vmem:[#allocation20_spill] sm:$0xff] }
 0x87c   :  { %v3604_v30 = vpop.eup %3603  ;;  %v7203_v31 = vld [vmem:[#allocation16_spill] sm:$0xff] }
 0x87d   :  { %v2046_v11 = vadd.f32 0.5, %v2045_v12  ;;  %v2053_v32 = vmul.f32 %v3602_v9, %v2042_v2  ;;  %v2050_v4 = vmul.f32 0.5, %v3604_v30  ;;  %v7204_v2 = vld [vmem:[#allocation12_spill] sm:$0xff]  ;;  %v7205_v12 = vld [vmem:[#allocation25_spill] sm:$0xff]  ;;  %v7210_v30 = vld [vmem:[#allocation26_spill] sm:$0xff] }
 0x87e   :  { %v7207_v9 = vld [vmem:[#allocation8_spill] sm:$0xff] }
 0x87f   :  { %v2052_v23 = vmul.f32 0.0, %v2046_v11  ;;  %v2051_v8 = vadd.f32 0.5, %v2050_v4  ;;  %v7206_v11 = vld [vmem:[#allocation21_spill] sm:$0xff]  ;;  %v7211_v4 = vld [vmem:[#allocation27_spill] sm:$0xff] }
 0x881   :  { %v5917_v1 = vadd.f32 %v2053_v32, %v2052_v23  ;;  %v7208_v23 = vld [vmem:[#allocation13_spill] sm:$0xff] }
 0x882   :  { %v7209_v32 = vld [vmem:[#allocation17_spill] sm:$0xff] }
 0x883   :  { %3605 = vtanh.f32 %v5917_v1 }
 0x890   :  { %v3606_v18 = vpop.eup %3605 }
 0x891   :  { %v5920_v62 = vmul.f32 %v3606_v18, %v2051_v8  ;;  %v7212_v8 = vld [vmem:[#allocation28_spill] sm:$0xff]  ;;  %v7213_v18 = vld [vmem:[#allocation9_spill] sm:$0xff] }
 0x893   :  { %7195 = vst [vmem:[#allocation61_spill] sm:$0xff] %v5920_v62  ;;  %2130 = vmatmul.mubr.f32.vlgmr.msra.gmra.mxu0 %v5920_v62  ;;  %2201 = vmatmul.mubr.f32.vlgmr.msra.gmra.mxu1 %v5920_v62  ;;  %v7214_v62 = vld [vmem:[#allocation22_spill] sm:$0xff] }
 0x894   :  { %2238 = vmatpush1.msra.mxu0 %v5391_v16  ;;  %2309 = vmatpush1.msra.mxu1 %v5397_v17 }
 0x895   :  { %2239 = vmatprep.subr.mxu0 %v5403_v24  ;;  %2310 = vmatprep.subr.mxu1 %v5409_v13 }
 0x896   :  { %2240 = vmatpush1.msra.mxu0 %v5415_v15  ;;  %2311 = vmatpush1.msra.mxu1 %v5421_v7 }
 0x897   :  { %2241 = vmatprep.subr.mxu0 %v5427_v56  ;;  %2312 = vmatprep.subr.mxu1 %v5433_v21 }
 0x898   :  { %2242 = vmatpush1.msra.mxu0 %v5439_v33  ;;  %2313 = vmatpush1.msra.mxu1 %v5445_v22 }
 0x899   :  { %2243 = vmatprep.subr.mxu0 %v5451_v34  ;;  %2314 = vmatprep.subr.mxu1 %v5457_v35 }
 0x89a   :  { %2244 = vmatpush1.msra.mxu0 %v5463_v36  ;;  %2315 = vmatpush1.msra.mxu1 %v5469_v37 }
 0x89b   :  { %2245 = vmatprep.subr.mxu0 %v5475_v38  ;;  %2316 = vmatprep.subr.mxu1 %v5481_v39 }
 0x89c   :  { %2246 = vmatpush1.msra.mxu0 %v5487_v40  ;;  %2317 = vmatpush1.msra.mxu1 %v5493_v41 }
 0x89d   :  { %2247 = vmatprep.subr.mxu0 %v5499_v42  ;;  %2318 = vmatprep.subr.mxu1 %v5505_v43 }
 0x89e   :  { %2248 = vmatpush1.msra.mxu0 %v5511_v44  ;;  %2319 = vmatpush1.msra.mxu1 %v5522_v46 }
 0x89f   :  { %2249 = vmatprep.subr.mxu0 %v5517_v45  ;;  %2320 = vmatprep.subr.mxu1 %v5534_v49 }
 0x8a0   :  { %2250 = vmatpush1.msra.mxu0 %v5529_v48  ;;  %2321 = vmatpush1.msra.mxu1 %v5546_v51 }
 0x8a1   :  { %2251 = vmatprep.subr.mxu0 %v5539_v50  ;;  %2322 = vmatprep.subr.mxu1 %v5553_v52 }
 0x8a2   :  { %2252 = vmatpush1.msra.mxu0 %v5559_v53  ;;  %2323 = vmatpush1.msra.mxu1 %v5565_v54 }
 0x8a3   :  { %2253 = vmatprep.subr.mxu0 %v5571_v55  ;;  %2324 = vmatprep.subr.mxu1 %v5577_v14 }
 0x8a4   :  { %2254 = vmatpush1.msra.mxu0 %v5583_v10  ;;  %2325 = vmatpush1.msra.mxu1 %v5589_v29 }
 0x8a5   :  { %2255 = vmatprep.subr.mxu0 %v5595_v57  ;;  %2326 = vmatprep.subr.mxu1 %v5601_v25 }
 0x8a6   :  { %2256 = vmatpush1.msra.mxu0 %v5607_v26  ;;  %2327 = vmatpush1.msra.mxu1 %v5613_v60 }
 0x8a7   :  { %2257 = vmatprep.subr.mxu0 %v5619_v0  ;;  %2328 = vmatprep.subr.mxu1 %v5625_v28 }
 0x8a8   :  { %2258 = vmatpush1.msra.mxu0 %v5631_v63  ;;  %2329 = vmatpush1.msra.mxu1 %v7196_v47 }
 0x8a9   :  { %2259 = vmatprep.subr.mxu0 %v7197_v6  ;;  %2330 = vmatprep.subr.mxu1 %v7198_v19 }
 0x8aa   :  { %2260 = vmatpush1.msra.mxu0 %v7199_v5  ;;  %2331 = vmatpush1.msra.mxu1 %v7200_v20 }
 0x8ab   :  { %2261 = vmatprep.subr.mxu0 %v7201_v58  ;;  %2332 = vmatprep.subr.mxu1 %v7202_v3  ;;  %v7223_v58 = vld [vmem:[#allocation32_spill] sm:$0xff] }
 0x8ac   :  { %2262 = vmatpush1.msra.mxu0 %v7203_v31  ;;  %2333 = vmatpush1.msra.mxu1 %v7204_v2  ;;  %v7215_v2 = vld [vmem:[#allocation29_spill] sm:$0xff]  ;;  %v1748_v20 = vadd.f32 %v7223_v58, %v5910_v61 }
 0x8ad   :  { %2263 = vmatprep.subr.mxu0 %v7205_v12  ;;  %2334 = vmatprep.subr.mxu1 %v7206_v11  ;;  %v7216_v12 = vmov 0.0   ;;  %v7217_v11 = vld [vmem:[#allocation30_spill] sm:$0xff] }
 0x8ae   :  { %2264 = vmatpush1.msra.mxu0 %v7207_v9  ;;  %2335 = vmatpush1.msra.mxu1 %v7208_v23  ;;  %v7218_v23 = vld [vmem:[#allocation18_spill] sm:$0xff] }
 0x8af   :  { %2265 = vmatprep.subr.mxu0 %v7209_v32  ;;  %2336 = vmatprep.subr.mxu1 %v7210_v30  ;;  %v7219_v32 = vld [vmem:[#allocation14_spill] sm:$0xff]  ;;  %v7220_v30 = vld [vmem:[#allocation55_spill] sm:$0xff] }
 0x8b0   :  { %2266 = vmatpush1.msra.mxu0 %v7211_v4  ;;  %2337 = vmatpush1.msra.mxu1 %v7212_v8  ;;  %v7221_v4 = vld [vmem:[#allocation31_spill] sm:$0xff] }
 0x8b1   :  { %2267 = vmatprep.subr.mxu0 %v7213_v18  ;;  %2338 = vmatprep.subr.mxu1 %v7214_v62  ;;  %v1635_v9 = vadd.f32 %v7221_v4, %v7220_v30  ;;  %v7222_v18 = vld [vmem:[#allocation33_spill] sm:$0xff]  ;;  %v7224_v4 = vld [vmem:[#allocation34_spill] sm:$0xff] }
 0x8b2   :  { %2268 = vmatpush1.msra.mxu0 %v7215_v2  ;;  %2301 = vmatprep.mubr.f32.mxu0 %v7216_v12  ;;  %v1637_v31 = vadd.f32 %v7222_v18, %v5903_v59  ;;  %v1750_v30 = vadd.f32 %v7224_v4, %v5914_v27  ;;  %v7243_v4 = vld [vmem:[#allocation9_spill] sm:$0xff] }
 0x8b3   :  { %2339 = vmatpush1.msra.mxu1 %v7217_v11  ;;  %2372 = vmatprep.mubr.f32.mxu1 %v7216_v12 }
 0x8b4   :  { %2409 = vmatprep.subr.mxu0 %v7218_v23  ;;  %2480 = vmatprep.subr.mxu1 %v7219_v32 }
 0x953   :  { %v2131_v8 = vpop.f32.mrf.mxu0  ;;  %v2202_v3 = vpop.f32.mrf.mxu1 }
 0x954   :  { %v2207_v62 = vadd.f32 %v2131_v8, %v1635_v9  ;;  %v2209_v12 = vadd.f32 %v2202_v3, %v1748_v20 }
 0x955   :  { %v2133_v2 = vpop.f32.mrf.mxu0  ;;  %v2204_v32 = vpop.f32.mrf.mxu1 }
 0x956   :  { %v2211_v11 = vmul.f32 0.5, %v2207_v62  ;;  %v2208_v5 = vadd.f32 %v2133_v2, %v1637_v31  ;;  %v2210_v19 = vadd.f32 %v2204_v32, %v1750_v30  ;;  %v7241_v32 = vld [vmem:[#allocation27_spill] sm:$0xff]  ;;  %v7242_v30 = vld [vmem:[#allocation28_spill] sm:$0xff] }
 0x958   :  { %3607 = vtanh.f32 %v2211_v11  ;;  %v2215_v23 = vmul.f32 0.5, %v2208_v5  ;;  %v2220_v6 = vmul.f32 0.5, %v2210_v19 }
 0x95a   :  { %3609 = vtanh.f32 %v2215_v23  ;;  %v7240_v23 = vld [vmem:[#allocation26_spill] sm:$0xff] }
 0x95b   :  { %3611 = vtanh.f32 %v2209_v12 }
 0x95c   :  { %3613 = vtanh.f32 %v2220_v6  ;;  %v7239_v6 = vld [vmem:[#allocation17_spill] sm:$0xff] }
 0x965   :  { %v3608_v18 = vpop.eup %3607 }
 0x966   :  { %v2213_v9 = vmul.f32 0.5, %v3608_v18  ;;  %v7244_v18 = vld [vmem:[#allocation22_spill] sm:$0xff] }
 0x967   :  { %v3610_v8 = vpop.eup %3609 }
 0x968   :  { %v2214_v59 = vadd.f32 0.5, %v2213_v9  ;;  %v2217_v47 = vmul.f32 0.5, %v3610_v8  ;;  %v3612_v58 = vpop.eup %3611  ;;  %v7245_v9 = vld [vmem:[#allocation29_spill] sm:$0xff]  ;;  %v7246_v8 = vmov 0.0  }
 0x969   :  { %v3614_v3 = vpop.eup %3613 }
 0x96a   :  { %v2218_v62 = vadd.f32 0.5, %v2217_v47  ;;  %v2225_v31 = vmul.f32 %v3612_v58, %v2214_v59  ;;  %v2222_v2 = vmul.f32 0.5, %v3614_v3  ;;  %v7236_v59 = vld [vmem:[#allocation21_spill] sm:$0xff]  ;;  %v7247_v58 = vld [vmem:[#allocation30_spill] sm:$0xff]  ;;  %v7251_v3 = vld [vmem:[#allocation35_spill] sm:$0xff] }
 0x96b   :  { %v7238_v47 = vld [vmem:[#allocation13_spill] sm:$0xff] }
 0x96c   :  { %v2224_v20 = vmul.f32 %v2218_v62, %v5917_v1  ;;  %v2223_v12 = vadd.f32 0.5, %v2222_v2  ;;  %v7237_v1 = vld [vmem:[#allocation8_spill] sm:$0xff]  ;;  %v7248_v62 = vld [vmem:[#allocation18_spill] sm:$0xff] }
 0x96e   :  { %v5999_v5 = vadd.f32 %v2225_v31, %v2224_v20  ;;  %v7249_v31 = vld [vmem:[#allocation14_spill] sm:$0xff]  ;;  %v7250_v20 = vld [vmem:[#allocation55_spill] sm:$0xff] }
 0x96f   :  { %v1641_v2 = vadd.f32 %v7251_v3, %v7250_v20  ;;  %v7255_v3 = vld [vmem:[#allocation38_spill] sm:$0xff] }
 0x970   :  { %3615 = vtanh.f32 %v5999_v5  ;;  %v1756_v20 = vadd.f32 %v7255_v3, %v5914_v27  ;;  %v6133_v3 = vld [vmem:[%s6823_s2 + $0x1b8] sm:$0xff] }
 0x97d   :  { %v3616_v11 = vpop.eup %3615 }
 0x97e   :  { %v6002_v19 = vmul.f32 %v3616_v11, %v2223_v12  ;;  %v7252_v11 = vld [vmem:[#allocation58_spill] sm:$0xff] }
 0x980   :  { %7225 = vst [vmem:[#allocation31_spill] sm:$0xff] %v6002_v19  ;;  %2302 = vmatmul.mubr.f32.vlgmr.msra.gmra.mxu0 %v6002_v19  ;;  %2373 = vmatmul.mubr.f32.vlgmr.msra.gmra.mxu1 %v6002_v19  ;;  %v7253_v19 = vld [vmem:[#allocation37_spill] sm:$0xff] }
 0x981   :  { %2410 = vmatpush1.msra.mxu0 %v5391_v16  ;;  %2481 = vmatpush1.msra.mxu1 %v5397_v17  ;;  %v7226_v16 = vld [vmem:[#allocation10_spill] sm:$0xff]  ;;  %v7227_v17 = vld [vmem:[#allocation23_spill] sm:$0xff] }
 0x982   :  { %2411 = vmatprep.subr.mxu0 %v5403_v24  ;;  %2482 = vmatprep.subr.mxu1 %v5409_v13  ;;  %v7228_v24 = vld [vmem:[#allocation19_spill] sm:$0xff] }
 0x983   :  { %2412 = vmatpush1.msra.mxu0 %v5415_v15  ;;  %2483 = vmatpush1.msra.mxu1 %v5421_v7  ;;  %v7229_v13 = vld [vmem:[#allocation15_spill] sm:$0xff]  ;;  %v7231_v7 = vld [vmem:[#allocation24_spill] sm:$0xff] }
 0x984   :  { %2413 = vmatprep.subr.mxu0 %v5427_v56  ;;  %2484 = vmatprep.subr.mxu1 %v5433_v21  ;;  %v7230_v15 = vld [vmem:[#allocation11_spill] sm:$0xff]  ;;  %v7232_v56 = vld [vmem:[#allocation20_spill] sm:$0xff] }
 0x985   :  { %2414 = vmatpush1.msra.mxu0 %v5439_v33  ;;  %2485 = vmatpush1.msra.mxu1 %v5445_v22  ;;  %v7233_v21 = vld [vmem:[#allocation16_spill] sm:$0xff]  ;;  %v7235_v22 = vld [vmem:[#allocation25_spill] sm:$0xff] }
 0x986   :  { %2415 = vmatprep.subr.mxu0 %v5451_v34  ;;  %2486 = vmatprep.subr.mxu1 %v5457_v35  ;;  %v7234_v33 = vld [vmem:[#allocation12_spill] sm:$0xff] }
 0x987   :  { %2416 = vmatpush1.msra.mxu0 %v5463_v36  ;;  %2487 = vmatpush1.msra.mxu1 %v5469_v37 }
 0x988   :  { %2417 = vmatprep.subr.mxu0 %v5475_v38  ;;  %2488 = vmatprep.subr.mxu1 %v5481_v39 }
 0x989   :  { %2418 = vmatpush1.msra.mxu0 %v5487_v40  ;;  %2489 = vmatpush1.msra.mxu1 %v5493_v41 }
 0x98a   :  { %2419 = vmatprep.subr.mxu0 %v5499_v42  ;;  %2490 = vmatprep.subr.mxu1 %v5505_v43 }
 0x98b   :  { %2420 = vmatpush1.msra.mxu0 %v5511_v44  ;;  %2491 = vmatpush1.msra.mxu1 %v5522_v46 }
 0x98c   :  { %2421 = vmatprep.subr.mxu0 %v5517_v45  ;;  %2492 = vmatprep.subr.mxu1 %v5534_v49 }
 0x98d   :  { %2422 = vmatpush1.msra.mxu0 %v5529_v48  ;;  %2493 = vmatpush1.msra.mxu1 %v5546_v51 }
 0x98e   :  { %2423 = vmatprep.subr.mxu0 %v5539_v50  ;;  %2494 = vmatprep.subr.mxu1 %v5553_v52 }
 0x98f   :  { %2424 = vmatpush1.msra.mxu0 %v5559_v53  ;;  %2495 = vmatpush1.msra.mxu1 %v5565_v54 }
 0x990   :  { %2425 = vmatprep.subr.mxu0 %v5571_v55  ;;  %2496 = vmatprep.subr.mxu1 %v5577_v14 }
 0x991   :  { %2426 = vmatpush1.msra.mxu0 %v5583_v10  ;;  %2497 = vmatpush1.msra.mxu1 %v5589_v29 }
 0x992   :  { %2427 = vmatprep.subr.mxu0 %v5595_v57  ;;  %2498 = vmatprep.subr.mxu1 %v5601_v25 }
 0x993   :  { %2428 = vmatpush1.msra.mxu0 %v5607_v26  ;;  %2499 = vmatpush1.msra.mxu1 %v5613_v60 }
 0x994   :  { %2429 = vmatprep.subr.mxu0 %v5619_v0  ;;  %2500 = vmatprep.subr.mxu1 %v5625_v28 }
 0x995   :  { %2430 = vmatpush1.msra.mxu0 %v5631_v63  ;;  %2501 = vmatpush1.msra.mxu1 %v7226_v16 }
 0x996   :  { %2431 = vmatprep.subr.mxu0 %v7227_v17  ;;  %2502 = vmatprep.subr.mxu1 %v7228_v24 }
 0x997   :  { %2432 = vmatpush1.msra.mxu0 %v7229_v13  ;;  %2503 = vmatpush1.msra.mxu1 %v7230_v15 }
 0x998   :  { %2433 = vmatprep.subr.mxu0 %v7231_v7  ;;  %2504 = vmatprep.subr.mxu1 %v7232_v56 }
 0x999   :  { %2434 = vmatpush1.msra.mxu0 %v7233_v21  ;;  %2505 = vmatpush1.msra.mxu1 %v7234_v33 }
 0x99a   :  { %2435 = vmatprep.subr.mxu0 %v7235_v22  ;;  %2506 = vmatprep.subr.mxu1 %v7236_v59 }
 0x99b   :  { %2436 = vmatpush1.msra.mxu0 %v7237_v1  ;;  %2507 = vmatpush1.msra.mxu1 %v7238_v47 }
 0x99c   :  { %2437 = vmatprep.subr.mxu0 %v7239_v6  ;;  %2508 = vmatprep.subr.mxu1 %v7240_v23 }
 0x99d   :  { %2438 = vmatpush1.msra.mxu0 %v7241_v32  ;;  %2509 = vmatpush1.msra.mxu1 %v7242_v30  ;;  %v7254_v32 = vld [vmem:[#allocation36_spill] sm:$0xff] }
 0x99e   :  { %2439 = vmatprep.subr.mxu0 %v7243_v4  ;;  %2510 = vmatprep.subr.mxu1 %v7244_v18  ;;  %v1643_v4 = vadd.f32 %v7253_v19, %v7252_v11  ;;  %v1754_v23 = vadd.f32 %v7254_v32, %v5910_v61 }
 0x99f   :  { %2440 = vmatpush1.msra.mxu0 %v7245_v9  ;;  %2473 = vmatprep.mubr.f32.mxu0 %v7246_v8 }
 0x9a0   :  { %2511 = vmatpush1.msra.mxu1 %v7247_v58  ;;  %2544 = vmatprep.mubr.f32.mxu1 %v7246_v8 }
 0x9a1   :  { %2581 = vmatprep.subr.mxu0 %v7248_v62  ;;  %2652 = vmatprep.subr.mxu1 %v7249_v31 }
 0xa40   :  { %v2303_v12 = vpop.f32.mrf.mxu0  ;;  %v2374_v30 = vpop.f32.mrf.mxu1 }
 0xa41   :  { %v2379_v18 = vadd.f32 %v2303_v12, %v1641_v2  ;;  %v2381_v8 = vadd.f32 %v2374_v30, %v1754_v23 }
 0xa42   :  { %v2305_v9 = vpop.f32.mrf.mxu0  ;;  %v2376_v31 = vpop.f32.mrf.mxu1 }
 0xa43   :  { %v2383_v58 = vmul.f32 0.5, %v2379_v18  ;;  %v2380_v6 = vadd.f32 %v2305_v9, %v1643_v4  ;;  %v2382_v47 = vadd.f32 %v2376_v31, %v1756_v20  ;;  %v6109_v20 = vld [vmem:[%s6823_s2 + $0x1d8] sm:$0xff]  ;;  %v6127_v31 = vld [vmem:[%s6823_s2 + $0x1a8] sm:$0xff] }
 0xa45   :  { %3617 = vtanh.f32 %v2383_v58  ;;  %v2387_v62 = vmul.f32 0.5, %v2380_v6  ;;  %v2392_v1 = vmul.f32 0.5, %v2382_v47 }
 0xa47   :  { %3619 = vtanh.f32 %v2387_v62  ;;  %v6121_v62 = vld [vmem:[%s6823_s2 + $0x1d0] sm:$0xff] }
 0xa48   :  { %3621 = vtanh.f32 %v2381_v8 }
 0xa49   :  { %3623 = vtanh.f32 %v2392_v1  ;;  %v6103_v1 = vld [vmem:[%s6823_s2 + $0x1c8] sm:$0xff] }
 0xa52   :  { %v3618_v19 = vpop.eup %3617 }
 0xa53   :  { %v2385_v2 = vmul.f32 0.5, %v3618_v19  ;;  %v6139_v19 = vld [vmem:[%s6823_s2 + $0x1a0] sm:$0xff] }
 0xa54   :  { %v3620_v12 = vpop.eup %3619 }
 0xa55   :  { %v2386_v11 = vadd.f32 0.5, %v2385_v2  ;;  %v2389_v59 = vmul.f32 0.5, %v3620_v12  ;;  %v3622_v32 = vpop.eup %3621  ;;  %v6145_v2 = vld [vmem:[%s6823_s2 + $0x1b0] sm:$0xff] }
 0xa56   :  { %v3624_v30 = vpop.eup %3623 }
 0xa57   :  { %v2390_v18 = vadd.f32 0.5, %v2389_v59  ;;  %v2397_v4 = vmul.f32 %v3622_v32, %v2386_v11  ;;  %v2394_v9 = vmul.f32 0.5, %v3624_v30  ;;  %v6091_v59 = vld [vmem:[%s6823_s2 + $0x1e0] sm:$0xff] }
 0xa58   :  { %v6115_v11 = vld [vmem:[%s6823_s2 + $0x1c0] sm:$0xff] }
 0xa59   :  { %v2396_v23 = vmul.f32 %v2390_v18, %v5999_v5  ;;  %v2395_v8 = vadd.f32 0.5, %v2394_v9  ;;  %v6097_v5 = vld [vmem:[%s6823_s2 + $0x1f0] sm:$0xff] }
 0xa5b   :  { %v6081_v6 = vadd.f32 %v2397_v4, %v2396_v23 }
 0xa5d   :  { %3625 = vtanh.f32 %v6081_v6 }
 0xa6a   :  { %v3626_v58 = vpop.eup %3625 }
 0xa6b   :  { %v6084_v47 = vmul.f32 %v3626_v58, %v2395_v8 }
 0xa6d   :  { %7256 = vst [vmem:[#allocation33_spill] sm:$0xff] %v6084_v47  ;;  %2474 = vmatmul.mubr.f32.vlgmr.msra.gmra.mxu0 %v6084_v47  ;;  %2545 = vmatmul.mubr.f32.vlgmr.msra.gmra.mxu1 %v6084_v47  ;;  %v6513_v47 = vld [vmem:[%s6823_s2 + $0x38] sm:$0xff] }
 0xa6e   :  { %2582 = vmatpush1.msra.mxu0 %v6091_v59  ;;  %2653 = vmatpush1.msra.mxu1 %v6097_v5  ;;  %7292 = vst [vmem:[#allocation38_spill] sm:$0xff] %v6513_v47 }
 0xa6f   :  { %2583 = vmatprep.subr.mxu0 %v6103_v1  ;;  %2654 = vmatprep.subr.mxu1 %v6109_v20 }
 0xa70   :  { %2584 = vmatpush1.msra.mxu0 %v6115_v11  ;;  %2655 = vmatpush1.msra.mxu1 %v6121_v62 }
 0xa71   :  { %2585 = vmatprep.subr.mxu0 %v6127_v31  ;;  %2656 = vmatprep.subr.mxu1 %v6133_v3 }
 0xa72   :  { %2586 = vmatpush1.msra.mxu0 %v6139_v19  ;;  %2657 = vmatpush1.msra.mxu1 %v6145_v2 }
 0xa73   :  { %2587 = vmatprep.subr.mxu0 %v5451_v34  ;;  %2658 = vmatprep.subr.mxu1 %v5457_v35  ;;  %v7257_v34 = vld [vmem:[#allocation21_spill] sm:$0xff]  ;;  %v7258_v35 = vld [vmem:[#allocation8_spill] sm:$0xff] }
 0xa74   :  { %2588 = vmatpush1.msra.mxu0 %v5463_v36  ;;  %2659 = vmatpush1.msra.mxu1 %v5469_v37  ;;  %v7259_v36 = vld [vmem:[#allocation13_spill] sm:$0xff] }
 0xa75   :  { %2589 = vmatprep.subr.mxu0 %v5475_v38  ;;  %2660 = vmatprep.subr.mxu1 %v5481_v39  ;;  %v7260_v37 = vld [vmem:[#allocation17_spill] sm:$0xff]  ;;  %v7261_v38 = vld [vmem:[#allocation26_spill] sm:$0xff]  ;;  %v7262_v39 = vld [vmem:[#allocation27_spill] sm:$0xff] }
 0xa76   :  { %2590 = vmatpush1.msra.mxu0 %v5487_v40  ;;  %2661 = vmatpush1.msra.mxu1 %v5493_v41  ;;  %v7263_v40 = vld [vmem:[#allocation28_spill] sm:$0xff]  ;;  %v7264_v41 = vld [vmem:[#allocation9_spill] sm:$0xff] }
 0xa77   :  { %2591 = vmatprep.subr.mxu0 %v5499_v42  ;;  %2662 = vmatprep.subr.mxu1 %v5505_v43  ;;  %v7265_v42 = vld [vmem:[#allocation22_spill] sm:$0xff]  ;;  %v7266_v43 = vld [vmem:[#allocation29_spill] sm:$0xff] }
 0xa78   :  { %2592 = vmatpush1.msra.mxu0 %v5511_v44  ;;  %2663 = vmatpush1.msra.mxu1 %v5522_v46  ;;  %v7267_v44 = vmov 0.0   ;;  %v6205_v46 = vld [vmem:[%s6823_s2 + $0x1e8] sm:$0xff] }
 0xa79   :  { %2593 = vmatprep.subr.mxu0 %v5517_v45  ;;  %2664 = vmatprep.subr.mxu1 %v5534_v49  ;;  %v7268_v45 = vld [vmem:[#allocation30_spill] sm:$0xff]  ;;  %7269 = vst [vmem:[#allocation32_spill] sm:$0xff] %v6205_v46  ;;  %v7271_v49 = vld [vmem:[#allocation55_spill] sm:$0xff] }
 0xa7a   :  { %2594 = vmatpush1.msra.mxu0 %v5529_v48  ;;  %2665 = vmatpush1.msra.mxu1 %v5546_v51  ;;  %v6211_v48 = vld [vmem:[%s6823_s2 + $0x1f8] sm:$0xff] }
 0xa7b   :  { %2595 = vmatprep.subr.mxu0 %v5539_v50  ;;  %2666 = vmatprep.subr.mxu1 %v5553_v52  ;;  %7270 = vst [vmem:[#allocation34_spill] sm:$0xff] %v6211_v48  ;;  %v7272_v50 = vld [vmem:[#allocation39_spill] sm:$0xff] }
 0xa7c   :  { %2596 = vmatpush1.msra.mxu0 %v5559_v53  ;;  %2667 = vmatpush1.msra.mxu1 %v5565_v54  ;;  %v1647_v51 = vadd.f32 %v7272_v50, %v7271_v49  ;;  %v7273_v53 = vld [vmem:[#allocation58_spill] sm:$0xff]  ;;  %v7274_v54 = vld [vmem:[#allocation41_spill] sm:$0xff] }
 0xa7d   :  { %2597 = vmatprep.subr.mxu0 %v5571_v55  ;;  %2668 = vmatprep.subr.mxu1 %v5577_v14  ;;  %v1649_v55 = vadd.f32 %v7274_v54, %v7273_v53  ;;  %v6315_v50 = vld [vmem:[%s6823_s2 + $0x128] sm:$0xff]  ;;  %v6333_v54 = vld [vmem:[%s6823_s2 + $0x130] sm:$0xff] }
 0xa7e   :  { %2598 = vmatpush1.msra.mxu0 %v5583_v10  ;;  %2669 = vmatpush1.msra.mxu1 %v5589_v29 }
 0xa7f   :  { %2599 = vmatprep.subr.mxu0 %v5595_v57  ;;  %2670 = vmatprep.subr.mxu1 %v5601_v25  ;;  %v7275_v57 = vld [vmem:[#allocation40_spill] sm:$0xff] }
 0xa80   :  { %2600 = vmatpush1.msra.mxu0 %v5607_v26  ;;  %2671 = vmatpush1.msra.mxu1 %v5613_v60  ;;  %v1760_v25 = vadd.f32 %v7275_v57, %v5910_v61  ;;  %v6363_v57 = vld [vmem:[%s6823_s2 + $0xe8] sm:$0xff] }
 0xa81   :  { %2601 = vmatprep.subr.mxu0 %v5619_v0  ;;  %2672 = vmatprep.subr.mxu1 %v5625_v28 }
 0xa82   :  { %2602 = vmatpush1.msra.mxu0 %v5631_v63  ;;  %2673 = vmatpush1.msra.mxu1 %v7226_v16  ;;  %v7276_v16 = vld [vmem:[#allocation42_spill] sm:$0xff] }
 0xa83   :  { %2603 = vmatprep.subr.mxu0 %v7227_v17  ;;  %2674 = vmatprep.subr.mxu1 %v7228_v24  ;;  %v1762_v17 = vadd.f32 %v7276_v16, %v5914_v27  ;;  %v6405_v16 = vld [vmem:[%s6823_s2 + $0xd0] sm:$0xff] }
 0xa84   :  { %2604 = vmatpush1.msra.mxu0 %v7229_v13  ;;  %2675 = vmatpush1.msra.mxu1 %v7230_v15 }
 0xa85   :  { %2605 = vmatprep.subr.mxu0 %v7231_v7  ;;  %2676 = vmatprep.subr.mxu1 %v7232_v56 }
 0xa86   :  { %2606 = vmatpush1.msra.mxu0 %v7233_v21  ;;  %2677 = vmatpush1.msra.mxu1 %v7234_v33 }
 0xa87   :  { %2607 = vmatprep.subr.mxu0 %v7235_v22  ;;  %2678 = vmatprep.subr.mxu1 %v7257_v34  ;;  %v6249_v34 = vld [vmem:[%s6823_s2 + $0x198] sm:$0xff] }
 0xa88   :  { %2608 = vmatpush1.msra.mxu0 %v7258_v35  ;;  %2679 = vmatpush1.msra.mxu1 %v7259_v36  ;;  %v6255_v35 = vld [vmem:[%s6823_s2 + $0x180] sm:$0xff]  ;;  %v6261_v36 = vld [vmem:[%s6823_s2 + $0x190] sm:$0xff] }
 0xa89   :  { %2609 = vmatprep.subr.mxu0 %v7260_v37  ;;  %2680 = vmatprep.subr.mxu1 %v7261_v38  ;;  %v6267_v37 = vld [vmem:[%s6823_s2 + $0x168] sm:$0xff]  ;;  %v6273_v38 = vld [vmem:[%s6823_s2 + $0x178] sm:$0xff] }
 0xa8a   :  { %2610 = vmatpush1.msra.mxu0 %v7262_v39  ;;  %2681 = vmatpush1.msra.mxu1 %v7263_v40  ;;  %v6279_v39 = vld [vmem:[%s6823_s2 + $0x160] sm:$0xff]  ;;  %v6285_v40 = vld [vmem:[%s6823_s2 + $0x170] sm:$0xff] }
 0xa8b   :  { %2611 = vmatprep.subr.mxu0 %v7264_v41  ;;  %2682 = vmatprep.subr.mxu1 %v7265_v42  ;;  %v6291_v41 = vld [vmem:[%s6823_s2 + $0x148] sm:$0xff]  ;;  %v6297_v42 = vld [vmem:[%s6823_s2 + $0x158] sm:$0xff] }
 0xa8c   :  { %2612 = vmatpush1.msra.mxu0 %v7266_v43  ;;  %2645 = vmatprep.mubr.f32.mxu0 %v7267_v44  ;;  %v6303_v43 = vld [vmem:[%s6823_s2 + $0x140] sm:$0xff] }
 0xa8d   :  { %2683 = vmatpush1.msra.mxu1 %v7268_v45  ;;  %2716 = vmatprep.mubr.f32.mxu1 %v7267_v44  ;;  %v6309_v45 = vld [vmem:[%s6823_s2 + $0x150] sm:$0xff] }
 0xa8e   :  { %2753 = vmatprep.subr.mxu0 %v6205_v46  ;;  %2824 = vmatprep.subr.mxu1 %v6211_v48 }
 0xb2d   :  { %v2475_v52 = vpop.f32.mrf.mxu0  ;;  %v2546_v10 = vpop.f32.mrf.mxu1 }
 0xb2e   :  { %v2551_v14 = vadd.f32 %v2475_v52, %v1647_v51  ;;  %v2553_v0 = vadd.f32 %v2546_v10, %v1760_v25  ;;  %v6321_v51 = vld [vmem:[%s6823_s2 + $0x138] sm:$0xff]  ;;  %v6327_v52 = vld [vmem:[%s6823_s2 + $0x120] sm:$0xff] }
 0xb2f   :  { %v2477_v29 = vpop.f32.mrf.mxu0  ;;  %v2548_v63 = vpop.f32.mrf.mxu1  ;;  %v6351_v10 = vld [vmem:[%s6823_s2 + $0x100] sm:$0xff]  ;;  %v6369_v25 = vld [vmem:[%s6823_s2 + $0xf8] sm:$0xff] }
 0xb30   :  { %v2555_v26 = vmul.f32 0.5, %v2551_v14  ;;  %v2552_v60 = vadd.f32 %v2477_v29, %v1649_v55  ;;  %v2554_v24 = vadd.f32 %v2548_v63, %v1762_v17  ;;  %v6339_v55 = vld [vmem:[%s6823_s2 + $0x108] sm:$0xff]  ;;  %v6345_v14 = vld [vmem:[%s6823_s2 + $0x118] sm:$0xff]  ;;  %v6357_v29 = vld [vmem:[%s6823_s2 + $0x110] sm:$0xff] }
 0xb31   :  { %v6399_v63 = vld [vmem:[%s6823_s2 + $0xc0] sm:$0xff]  ;;  %v6411_v17 = vld [vmem:[%s6823_s2 + $0xa8] sm:$0xff] }
 0xb32   :  { %3627 = vtanh.f32 %v2555_v26  ;;  %v2559_v28 = vmul.f32 0.5, %v2552_v60  ;;  %v2564_v13 = vmul.f32 0.5, %v2554_v24  ;;  %v6375_v26 = vld [vmem:[%s6823_s2 + $0xe0] sm:$0xff]  ;;  %v6381_v60 = vld [vmem:[%s6823_s2 + $0xf0] sm:$0xff]  ;;  %v6417_v24 = vld [vmem:[%s6823_s2 + $0xb8] sm:$0xff] }
 0xb34   :  { %3629 = vtanh.f32 %v2559_v28  ;;  %v6393_v28 = vld [vmem:[%s6823_s2 + $0xd8] sm:$0xff] }
 0xb35   :  { %3631 = vtanh.f32 %v2553_v0  ;;  %v6387_v0 = vld [vmem:[%s6823_s2 + $0xc8] sm:$0xff] }
 0xb36   :  { %3633 = vtanh.f32 %v2564_v13  ;;  %v6423_v13 = vld [vmem:[%s6823_s2 + $0xa0] sm:$0xff] }
 0xb3f   :  { %v3628_v15 = vpop.eup %3627 }
 0xb40   :  { %v2557_v7 = vmul.f32 0.5, %v3628_v15  ;;  %v6429_v15 = vld [vmem:[%s6823_s2 + $0xb0] sm:$0xff] }
 0xb41   :  { %v3630_v56 = vpop.eup %3629  ;;  %7278 = vst [vmem:[#allocation23_spill] sm:$0xff] %v6429_v15 }
 0xb42   :  { %v2558_v21 = vadd.f32 0.5, %v2557_v7  ;;  %v2561_v33 = vmul.f32 0.5, %v3630_v56  ;;  %v3632_v22 = vpop.eup %3631  ;;  %v6435_v7 = vld [vmem:[%s6823_s2 + $0x88] sm:$0xff]  ;;  %v6441_v56 = vld [vmem:[%s6823_s2 + $0x98] sm:$0xff] }
 0xb43   :  { %v3634_v23 = vpop.eup %3633  ;;  %7279 = vst [vmem:[#allocation19_spill] sm:$0xff] %v6435_v7  ;;  %7280 = vst [vmem:[#allocation15_spill] sm:$0xff] %v6441_v56 }
 0xb44   :  { %v2562_v12 = vadd.f32 0.5, %v2561_v33  ;;  %v2569_v32 = vmul.f32 %v3632_v22, %v2558_v21  ;;  %v2566_v30 = vmul.f32 0.5, %v3634_v23  ;;  %v6447_v21 = vld [vmem:[%s6823_s2 + $0x80] sm:$0xff]  ;;  %v6453_v33 = vld [vmem:[%s6823_s2 + $0x90] sm:$0xff]  ;;  %v6459_v22 = vld [vmem:[%s6823_s2 + $0x68] sm:$0xff] }
 0xb45   :  { %7281 = vst [vmem:[#allocation11_spill] sm:$0xff] %v6447_v21  ;;  %7282 = vst [vmem:[#allocation24_spill] sm:$0xff] %v6453_v33  ;;  %v6483_v23 = vld [vmem:[%s6823_s2 + $0x48] sm:$0xff] }
 0xb46   :  { %v2568_v18 = vmul.f32 %v2562_v12, %v6081_v6  ;;  %v2567_v9 = vadd.f32 0.5, %v2566_v30  ;;  %v6243_v6 = vld [vmem:[%s6823_s2 + $0x188] sm:$0xff]  ;;  %7283 = vst [vmem:[#allocation20_spill] sm:$0xff] %v6459_v22  ;;  %v6465_v12 = vld [vmem:[%s6823_s2 + $0x78] sm:$0xff]  ;;  %7287 = vst [vmem:[#allocation18_spill] sm:$0xff] %v6483_v23 }
 0xb47   :  { %7284 = vst [vmem:[#allocation16_spill] sm:$0xff] %v6465_v12  ;;  %v6489_v30 = vld [vmem:[%s6823_s2 + $0x58] sm:$0xff] }
 0xb48   :  { %v6223_v4 = vadd.f32 %v2569_v32, %v2568_v18  ;;  %v6471_v32 = vld [vmem:[%s6823_s2 + $0x60] sm:$0xff]  ;;  %v6477_v18 = vld [vmem:[%s6823_s2 + $0x70] sm:$0xff]  ;;  %7288 = vst [vmem:[#allocation14_spill] sm:$0xff] %v6489_v30 }
 0xb49   :  { %7285 = vst [vmem:[#allocation12_spill] sm:$0xff] %v6471_v32  ;;  %7286 = vst [vmem:[#allocation25_spill] sm:$0xff] %v6477_v18 }
 0xb4a   :  { %3635 = vtanh.f32 %v6223_v4 }
 0xb57   :  { %v3636_v8 = vpop.eup %3635 }
 0xb58   :  { %v6226_v58 = vmul.f32 %v3636_v8, %v2567_v9  ;;  %v6495_v9 = vld [vmem:[%s6823_s2 + $0x40] sm:$0xff]  ;;  %v6501_v8 = vld [vmem:[%s6823_s2 + $0x50] sm:$0xff] }
 0xb59   :  { %7289 = vst [vmem:[#allocation35_spill] sm:$0xff] %v6495_v9  ;;  %7290 = vst [vmem:[#allocation37_spill] sm:$0xff] %v6501_v8 }
 0xb5a   :  { %7277 = vst [vmem:[#allocation10_spill] sm:$0xff] %v6226_v58  ;;  %2646 = vmatmul.mubr.f32.vlgmr.msra.gmra.mxu0 %v6226_v58  ;;  %2717 = vmatmul.mubr.f32.vlgmr.msra.gmra.mxu1 %v6226_v58  ;;  %v6507_v58 = vld [vmem:[%s6823_s2 + $0x28] sm:$0xff] }
 0xb5b   :  { %2754 = vmatpush1.msra.mxu0 %v6091_v59  ;;  %2825 = vmatpush1.msra.mxu1 %v6097_v5  ;;  %7291 = vst [vmem:[#allocation36_spill] sm:$0xff] %v6507_v58 }
 0xb5c   :  { %2755 = vmatprep.subr.mxu0 %v6103_v1  ;;  %2826 = vmatprep.subr.mxu1 %v6109_v20 }
 0xb5d   :  { %2756 = vmatpush1.msra.mxu0 %v6115_v11  ;;  %2827 = vmatpush1.msra.mxu1 %v6121_v62 }
 0xb5e   :  { %2757 = vmatprep.subr.mxu0 %v6127_v31  ;;  %2828 = vmatprep.subr.mxu1 %v6133_v3 }
 0xb5f   :  { %2758 = vmatpush1.msra.mxu0 %v6139_v19  ;;  %2829 = vmatpush1.msra.mxu1 %v6145_v2 }
 0xb60   :  { %2759 = vmatprep.subr.mxu0 %v6243_v6  ;;  %2830 = vmatprep.subr.mxu1 %v6249_v34 }
 0xb61   :  { %2760 = vmatpush1.msra.mxu0 %v6255_v35  ;;  %2831 = vmatpush1.msra.mxu1 %v6261_v36 }
 0xb62   :  { %2761 = vmatprep.subr.mxu0 %v6267_v37  ;;  %2832 = vmatprep.subr.mxu1 %v6273_v38 }
 0xb63   :  { %2762 = vmatpush1.msra.mxu0 %v6279_v39  ;;  %2833 = vmatpush1.msra.mxu1 %v6285_v40 }
 0xb64   :  { %2763 = vmatprep.subr.mxu0 %v6291_v41  ;;  %2834 = vmatprep.subr.mxu1 %v6297_v42 }
 0xb65   :  { %2764 = vmatpush1.msra.mxu0 %v6303_v43  ;;  %2835 = vmatpush1.msra.mxu1 %v6309_v45 }
 0xb66   :  { %2765 = vmatprep.subr.mxu0 %v6315_v50  ;;  %2836 = vmatprep.subr.mxu1 %v6321_v51 }
 0xb67   :  { %2766 = vmatpush1.msra.mxu0 %v6327_v52  ;;  %2837 = vmatpush1.msra.mxu1 %v6333_v54 }
 0xb68   :  { %2767 = vmatprep.subr.mxu0 %v6339_v55  ;;  %2838 = vmatprep.subr.mxu1 %v6345_v14 }
 0xb69   :  { %2768 = vmatpush1.msra.mxu0 %v6351_v10  ;;  %2839 = vmatpush1.msra.mxu1 %v6357_v29 }
 0xb6a   :  { %2769 = vmatprep.subr.mxu0 %v6363_v57  ;;  %2840 = vmatprep.subr.mxu1 %v6369_v25 }
 0xb6b   :  { %2770 = vmatpush1.msra.mxu0 %v6375_v26  ;;  %2841 = vmatpush1.msra.mxu1 %v6381_v60 }
 0xb6c   :  { %2771 = vmatprep.subr.mxu0 %v6387_v0  ;;  %2842 = vmatprep.subr.mxu1 %v6393_v28 }
 0xb6d   :  { %2772 = vmatpush1.msra.mxu0 %v6399_v63  ;;  %2843 = vmatpush1.msra.mxu1 %v6405_v16 }
 0xb6e   :  { %2773 = vmatprep.subr.mxu0 %v6411_v17  ;;  %2844 = vmatprep.subr.mxu1 %v6417_v24 }
 0xb6f   :  { %2774 = vmatpush1.msra.mxu0 %v6423_v13  ;;  %2845 = vmatpush1.msra.mxu1 %v6429_v15 }
 0xb70   :  { %2775 = vmatprep.subr.mxu0 %v6435_v7  ;;  %2846 = vmatprep.subr.mxu1 %v6441_v56 }
 0xb71   :  { %2776 = vmatpush1.msra.mxu0 %v6447_v21  ;;  %2847 = vmatpush1.msra.mxu1 %v6453_v33 }
 0xb72   :  { %2777 = vmatprep.subr.mxu0 %v6459_v22  ;;  %2848 = vmatprep.subr.mxu1 %v6465_v12  ;;  %v7301_v22 = vld [vmem:[#allocation44_spill] sm:$0xff] }
 0xb73   :  { %2778 = vmatpush1.msra.mxu0 %v6471_v32  ;;  %2849 = vmatpush1.msra.mxu1 %v6477_v18  ;;  %v1766_v33 = vadd.f32 %v7301_v22, %v5910_v61 }
 0xb74   :  { %2779 = vmatprep.subr.mxu0 %v6483_v23  ;;  %2850 = vmatprep.subr.mxu1 %v6489_v30 }
 0xb75   :  { %2780 = vmatpush1.msra.mxu0 %v6495_v9  ;;  %2851 = vmatpush1.msra.mxu1 %v6501_v8  ;;  %v6519_v9 = vld [vmem:[%s6823_s2 + $0x20] sm:$0xff]  ;;  %v6525_v8 = vld [vmem:[%s6823_s2 + $0x30] sm:$0xff] }
 0xb76   :  { %2781 = vmatprep.subr.mxu0 %v6507_v58  ;;  %2852 = vmatprep.subr.mxu1 %v6513_v47  ;;  %7293 = vst [vmem:[#allocation21_spill] sm:$0xff] %v6519_v9  ;;  %7294 = vst [vmem:[#allocation8_spill] sm:$0xff] %v6525_v8  ;;  %v6531_v58 = vld [vmem:[%s6823_s2 + $0x8] sm:$0xff]  ;;  %v6537_v47 = vld [vmem:[%s6823_s2 + $0x18] sm:$0xff] }
 0xb77   :  { %2782 = vmatpush1.msra.mxu0 %v6519_v9  ;;  %2853 = vmatpush1.msra.mxu1 %v6525_v8  ;;  %7295 = vst [vmem:[#allocation13_spill] sm:$0xff] %v6531_v58  ;;  %7296 = vst [vmem:[#allocation17_spill] sm:$0xff] %v6537_v47  ;;  %v6543_v9 = vld [vmem:[%s6823_s2] sm:$0xff] }
 0xb78   :  { %2783 = vmatprep.subr.mxu0 %v6531_v58  ;;  %2854 = vmatprep.subr.mxu1 %v6537_v47  ;;  %7297 = vst [vmem:[#allocation26_spill] sm:$0xff] %v6543_v9  ;;  %v6550_v58 = vld [vmem:[%s6823_s2 + $0x10] sm:$0xff]  ;;  %v7299_v47 = vld [vmem:[#allocation43_spill] sm:$0xff] }
 0xb79   :  { %2784 = vmatpush1.msra.mxu0 %v6543_v9  ;;  %2817 = vmatprep.mubr.f32.mxu0 %v7267_v44  ;;  %7298 = vst [vmem:[#allocation27_spill] sm:$0xff] %v6550_v58  ;;  %v1653_v8 = vadd.f32 %v7299_v47, %v7271_v49  ;;  %v7300_v9 = vld [vmem:[#allocation45_spill] sm:$0xff]  ;;  %v7302_v47 = vld [vmem:[#allocation46_spill] sm:$0xff] }
 0xb7a   :  { %2855 = vmatpush1.msra.mxu1 %v6550_v58  ;;  %2888 = vmatprep.mubr.f32.mxu1 %v7267_v44  ;;  %v1655_v23 = vadd.f32 %v7300_v9, %v7273_v53  ;;  %v1768_v49 = vadd.f32 %v7302_v47, %v5914_v27  ;;  %v7311_v47 = vld [vmem:[#allocation12_spill] sm:$0xff] }
 0xb7b   :  { %2925 = vmatprep.subr.mxu0 %v6205_v46  ;;  %2996 = vmatprep.subr.mxu1 %v6211_v48 }
 0xc1a   :  { %v2647_v30 = vpop.f32.mrf.mxu0  ;;  %v2718_v32 = vpop.f32.mrf.mxu1 }
 0xc1b   :  { %v2723_v18 = vadd.f32 %v2647_v30, %v1653_v8  ;;  %v2725_v44 = vadd.f32 %v2718_v32, %v1766_v33  ;;  %v7309_v32 = vld [vmem:[#allocation20_spill] sm:$0xff] }
 0xc1c   :  { %v2649_v12 = vpop.f32.mrf.mxu0  ;;  %v2720_v48 = vpop.f32.mrf.mxu1 }
 0xc1d   :  { %v2727_v58 = vmul.f32 0.5, %v2723_v18  ;;  %v2724_v21 = vadd.f32 %v2649_v12, %v1655_v23  ;;  %v2726_v56 = vadd.f32 %v2720_v48, %v1768_v49  ;;  %v7310_v23 = vld [vmem:[#allocation16_spill] sm:$0xff] }
 0xc1f   :  { %3637 = vtanh.f32 %v2727_v58  ;;  %v2731_v46 = vmul.f32 0.5, %v2724_v21  ;;  %v2736_v7 = vmul.f32 0.5, %v2726_v56  ;;  %v7308_v56 = vld [vmem:[#allocation24_spill] sm:$0xff] }
 0xc21   :  { %3639 = vtanh.f32 %v2731_v46 }
 0xc22   :  { %3641 = vtanh.f32 %v2725_v44 }
 0xc23   :  { %3643 = vtanh.f32 %v2736_v7  ;;  %v7307_v7 = vld [vmem:[#allocation11_spill] sm:$0xff] }
 0xc2c   :  { %v3638_v9 = vpop.eup %3637 }
 0xc2d   :  { %v2729_v30 = vmul.f32 0.5, %v3638_v9  ;;  %v7312_v9 = vld [vmem:[#allocation25_spill] sm:$0xff] }
 0xc2e   :  { %v3640_v8 = vpop.eup %3639 }
 0xc2f   :  { %v2730_v53 = vadd.f32 0.5, %v2729_v30  ;;  %v2733_v15 = vmul.f32 0.5, %v3640_v8  ;;  %v3642_v22 = vpop.eup %3641  ;;  %v7313_v30 = vld [vmem:[#allocation18_spill] sm:$0xff] }
 0xc30   :  { %v3644_v44 = vpop.eup %3643  ;;  %v7314_v8 = vld [vmem:[#allocation14_spill] sm:$0xff] }
 0xc31   :  { %v2734_v18 = vadd.f32 0.5, %v2733_v15  ;;  %v2741_v12 = vmul.f32 %v3642_v22, %v2730_v53  ;;  %v2738_v46 = vmul.f32 0.5, %v3644_v44  ;;  %v7304_v53 = vld [vmem:[#allocation23_spill] sm:$0xff]  ;;  %v7319_v44 = vld [vmem:[#allocation21_spill] sm:$0xff] }
 0xc32   :  { %v7306_v15 = vld [vmem:[#allocation15_spill] sm:$0xff] }
 0xc33   :  { %v2740_v58 = vmul.f32 %v2734_v18, %v6223_v4  ;;  %v2739_v33 = vadd.f32 0.5, %v2738_v46  ;;  %v7305_v4 = vld [vmem:[#allocation19_spill] sm:$0xff]  ;;  %v7316_v18 = vld [vmem:[#allocation37_spill] sm:$0xff]  ;;  %v7320_v46 = vld [vmem:[#allocation8_spill] sm:$0xff] }
 0xc34   :  { %v7315_v22 = vld [vmem:[#allocation35_spill] sm:$0xff] }
 0xc35   :  { %v6565_v21 = vadd.f32 %v2741_v12, %v2740_v58  ;;  %v7317_v12 = vld [vmem:[#allocation36_spill] sm:$0xff]  ;;  %v7318_v58 = vld [vmem:[#allocation38_spill] sm:$0xff] }
 0xc37   :  { %3645 = vtanh.f32 %v6565_v21 }
 0xc44   :  { %v3646_v48 = vpop.eup %3645 }
 0xc45   :  { %v6568_v49 = vmul.f32 %v3646_v48, %v2739_v33  ;;  %v7321_v33 = vld [vmem:[#allocation13_spill] sm:$0xff] }
 0xc46   :  { %v7322_v48 = vld [vmem:[#allocation17_spill] sm:$0xff] }
 0xc47   :  { %7303 = vst [vmem:[#allocation28_spill] sm:$0xff] %v6568_v49  ;;  %2818 = vmatmul.mubr.f32.vlgmr.msra.gmra.mxu0 %v6568_v49  ;;  %2889 = vmatmul.mubr.f32.vlgmr.msra.gmra.mxu1 %v6568_v49  ;;  %v7323_v49 = vld [vmem:[#allocation26_spill] sm:$0xff] }
 0xc48   :  { %2926 = vmatpush1.msra.mxu0 %v6091_v59  ;;  %2997 = vmatpush1.msra.mxu1 %v6097_v5 }
 0xc49   :  { %2927 = vmatprep.subr.mxu0 %v6103_v1  ;;  %2998 = vmatprep.subr.mxu1 %v6109_v20 }
 0xc4a   :  { %2928 = vmatpush1.msra.mxu0 %v6115_v11  ;;  %2999 = vmatpush1.msra.mxu1 %v6121_v62 }
 0xc4b   :  { %2929 = vmatprep.subr.mxu0 %v6127_v31  ;;  %3000 = vmatprep.subr.mxu1 %v6133_v3 }
 0xc4c   :  { %2930 = vmatpush1.msra.mxu0 %v6139_v19  ;;  %3001 = vmatpush1.msra.mxu1 %v6145_v2 }
 0xc4d   :  { %2931 = vmatprep.subr.mxu0 %v6243_v6  ;;  %3002 = vmatprep.subr.mxu1 %v6249_v34 }
 0xc4e   :  { %2932 = vmatpush1.msra.mxu0 %v6255_v35  ;;  %3003 = vmatpush1.msra.mxu1 %v6261_v36 }
 0xc4f   :  { %2933 = vmatprep.subr.mxu0 %v6267_v37  ;;  %3004 = vmatprep.subr.mxu1 %v6273_v38 }
 0xc50   :  { %2934 = vmatpush1.msra.mxu0 %v6279_v39  ;;  %3005 = vmatpush1.msra.mxu1 %v6285_v40 }
 0xc51   :  { %2935 = vmatprep.subr.mxu0 %v6291_v41  ;;  %3006 = vmatprep.subr.mxu1 %v6297_v42 }
 0xc52   :  { %2936 = vmatpush1.msra.mxu0 %v6303_v43  ;;  %3007 = vmatpush1.msra.mxu1 %v6309_v45 }
 0xc53   :  { %2937 = vmatprep.subr.mxu0 %v6315_v50  ;;  %3008 = vmatprep.subr.mxu1 %v6321_v51 }
 0xc54   :  { %2938 = vmatpush1.msra.mxu0 %v6327_v52  ;;  %3009 = vmatpush1.msra.mxu1 %v6333_v54 }
 0xc55   :  { %2939 = vmatprep.subr.mxu0 %v6339_v55  ;;  %3010 = vmatprep.subr.mxu1 %v6345_v14 }
 0xc56   :  { %2940 = vmatpush1.msra.mxu0 %v6351_v10  ;;  %3011 = vmatpush1.msra.mxu1 %v6357_v29 }
 0xc57   :  { %2941 = vmatprep.subr.mxu0 %v6363_v57  ;;  %3012 = vmatprep.subr.mxu1 %v6369_v25 }
 0xc58   :  { %2942 = vmatpush1.msra.mxu0 %v6375_v26  ;;  %3013 = vmatpush1.msra.mxu1 %v6381_v60 }
 0xc59   :  { %2943 = vmatprep.subr.mxu0 %v6387_v0  ;;  %3014 = vmatprep.subr.mxu1 %v6393_v28 }
 0xc5a   :  { %2944 = vmatpush1.msra.mxu0 %v6399_v63  ;;  %3015 = vmatpush1.msra.mxu1 %v6405_v16 }
 0xc5b   :  { %2945 = vmatprep.subr.mxu0 %v6411_v17  ;;  %3016 = vmatprep.subr.mxu1 %v6417_v24 }
 0xc5c   :  { %2946 = vmatpush1.msra.mxu0 %v6423_v13  ;;  %3017 = vmatpush1.msra.mxu1 %v7304_v53 }
 0xc5d   :  { %2947 = vmatprep.subr.mxu0 %v7305_v4  ;;  %3018 = vmatprep.subr.mxu1 %v7306_v15 }
 0xc5e   :  { %2948 = vmatpush1.msra.mxu0 %v7307_v7  ;;  %3019 = vmatpush1.msra.mxu1 %v7308_v56 }
 0xc5f   :  { %2949 = vmatprep.subr.mxu0 %v7309_v32  ;;  %3020 = vmatprep.subr.mxu1 %v7310_v23  ;;  %v7332_v32 = vld [vmem:[#allocation48_spill] sm:$0xff] }
 0xc60   :  { %2950 = vmatpush1.msra.mxu0 %v7311_v47  ;;  %3021 = vmatpush1.msra.mxu1 %v7312_v9  ;;  %v7330_v9 = vld [vmem:[#allocation58_spill] sm:$0xff]  ;;  %v1772_v56 = vadd.f32 %v7332_v32, %v5910_v61 }
 0xc61   :  { %2951 = vmatprep.subr.mxu0 %v7313_v30  ;;  %3022 = vmatprep.subr.mxu1 %v7314_v8  ;;  %v7324_v30 = vmov 0.0   ;;  %v7325_v8 = vld [vmem:[#allocation27_spill] sm:$0xff] }
 0xc62   :  { %2952 = vmatpush1.msra.mxu0 %v7315_v22  ;;  %3023 = vmatpush1.msra.mxu1 %v7316_v18  ;;  %v7326_v18 = vld [vmem:[#allocation32_spill] sm:$0xff] }
 0xc63   :  { %2953 = vmatprep.subr.mxu0 %v7317_v12  ;;  %3024 = vmatprep.subr.mxu1 %v7318_v58  ;;  %v7327_v12 = vld [vmem:[#allocation34_spill] sm:$0xff]  ;;  %v7328_v58 = vld [vmem:[#allocation55_spill] sm:$0xff] }
 0xc64   :  { %2954 = vmatpush1.msra.mxu0 %v7319_v44  ;;  %3025 = vmatpush1.msra.mxu1 %v7320_v46  ;;  %v7329_v44 = vld [vmem:[#allocation47_spill] sm:$0xff] }
 0xc65   :  { %2955 = vmatprep.subr.mxu0 %v7321_v33  ;;  %3026 = vmatprep.subr.mxu1 %v7322_v48  ;;  %v1659_v22 = vadd.f32 %v7329_v44, %v7328_v58  ;;  %v7331_v33 = vld [vmem:[#allocation49_spill] sm:$0xff]  ;;  %v7333_v44 = vld [vmem:[#allocation50_spill] sm:$0xff] }
 0xc66   :  { %2956 = vmatpush1.msra.mxu0 %v7323_v49  ;;  %2989 = vmatprep.mubr.f32.mxu0 %v7324_v30  ;;  %v1661_v47 = vadd.f32 %v7331_v33, %v7330_v9  ;;  %v1774_v58 = vadd.f32 %v7333_v44, %v5914_v27 }
 0xc67   :  { %3027 = vmatpush1.msra.mxu1 %v7325_v8  ;;  %3060 = vmatprep.mubr.f32.mxu1 %v7324_v30 }
 0xc68   :  { %3097 = vmatprep.subr.mxu0 %v7326_v18  ;;  %3168 = vmatprep.subr.mxu1 %v7327_v12 }
 0xd07   :  { %v2819_v46 = vpop.f32.mrf.mxu0  ;;  %v2890_v23 = vpop.f32.mrf.mxu1 }
 0xd08   :  { %v2895_v48 = vadd.f32 %v2819_v46, %v1659_v22  ;;  %v2897_v30 = vadd.f32 %v2890_v23, %v1772_v56 }
 0xd09   :  { %v2821_v49 = vpop.f32.mrf.mxu0  ;;  %v2892_v12 = vpop.f32.mrf.mxu1 }
 0xd0a   :  { %v2899_v8 = vmul.f32 0.5, %v2895_v48  ;;  %v2896_v7 = vadd.f32 %v2821_v49, %v1661_v47  ;;  %v2898_v15 = vadd.f32 %v2892_v12, %v1774_v58 }
 0xd0c   :  { %3647 = vtanh.f32 %v2899_v8  ;;  %v2903_v18 = vmul.f32 0.5, %v2896_v7  ;;  %v2908_v4 = vmul.f32 0.5, %v2898_v15 }
 0xd0e   :  { %3649 = vtanh.f32 %v2903_v18 }
 0xd0f   :  { %3651 = vtanh.f32 %v2897_v30 }
 0xd10   :  { %3653 = vtanh.f32 %v2908_v4 }
 0xd19   :  { %v3648_v33 = vpop.eup %3647 }
 0xd1a   :  { %v2901_v22 = vmul.f32 0.5, %v3648_v33 }
 0xd1b   :  { %v3650_v46 = vpop.eup %3649 }
 0xd1c   :  { %v2902_v9 = vadd.f32 0.5, %v2901_v22  ;;  %v2905_v53 = vmul.f32 0.5, %v3650_v46  ;;  %v3652_v32 = vpop.eup %3651 }
 0xd1d   :  { %v3654_v23 = vpop.eup %3653 }
 0xd1e   :  { %v2906_v48 = vadd.f32 0.5, %v2905_v53  ;;  %v2913_v49 = vmul.f32 %v3652_v32, %v2902_v9  ;;  %v2910_v47 = vmul.f32 0.5, %v3654_v23 }
 0xd20   :  { %v2912_v56 = vmul.f32 %v2906_v48, %v6565_v21  ;;  %v2911_v30 = vadd.f32 0.5, %v2910_v47 }
 0xd22   :  { %v6647_v7 = vadd.f32 %v2913_v49, %v2912_v56 }
 0xd24   :  { %3655 = vtanh.f32 %v6647_v7 }
 0xd31   :  { %v3656_v8 = vpop.eup %3655 }
 0xd32   :  { %v6650_v15 = vmul.f32 %v3656_v8, %v2911_v30  ;;  %v3286_v8 = vld [vmem:[%s6825_s5 + $0x70] sm:$0xff] }
 0xd34   :  { %2990 = vmatmul.mubr.f32.vlgmr.msra.gmra.mxu0 %v6650_v15  ;;  %3061 = vmatmul.mubr.f32.vlgmr.msra.gmra.mxu1 %v6650_v15 }
 0xd35   :  { %3098 = vmatpush1.msra.mxu0 %v6091_v59  ;;  %3169 = vmatpush1.msra.mxu1 %v6097_v5  ;;  %v7334_v59 = vld [vmem:[#allocation23_spill] sm:$0xff] }
 0xd36   :  { %3099 = vmatprep.subr.mxu0 %v6103_v1  ;;  %3170 = vmatprep.subr.mxu1 %v6109_v20  ;;  %v7335_v5 = vld [vmem:[#allocation19_spill] sm:$0xff] }
 0xd37   :  { %3100 = vmatpush1.msra.mxu0 %v6115_v11  ;;  %3171 = vmatpush1.msra.mxu1 %v6121_v62  ;;  %v7336_v1 = vld [vmem:[#allocation15_spill] sm:$0xff]  ;;  %v7338_v11 = vld [vmem:[#allocation24_spill] sm:$0xff] }
 0xd38   :  { %3101 = vmatprep.subr.mxu0 %v6127_v31  ;;  %3172 = vmatprep.subr.mxu1 %v6133_v3  ;;  %v7337_v20 = vld [vmem:[#allocation11_spill] sm:$0xff]  ;;  %v7339_v62 = vld [vmem:[#allocation20_spill] sm:$0xff] }
 0xd39   :  { %3102 = vmatpush1.msra.mxu0 %v6139_v19  ;;  %3173 = vmatpush1.msra.mxu1 %v6145_v2  ;;  %v7340_v31 = vld [vmem:[#allocation16_spill] sm:$0xff]  ;;  %v7342_v19 = vld [vmem:[#allocation25_spill] sm:$0xff]  ;;  %v7343_v2 = vld [vmem:[#allocation18_spill] sm:$0xff] }
 0xd3a   :  { %3103 = vmatprep.subr.mxu0 %v6243_v6  ;;  %3174 = vmatprep.subr.mxu1 %v6249_v34  ;;  %v7341_v3 = vld [vmem:[#allocation12_spill] sm:$0xff]  ;;  %v7344_v6 = vld [vmem:[#allocation14_spill] sm:$0xff]  ;;  %v7345_v34 = vld [vmem:[#allocation35_spill] sm:$0xff] }
 0xd3b   :  { %3104 = vmatpush1.msra.mxu0 %v6255_v35  ;;  %3175 = vmatpush1.msra.mxu1 %v6261_v36  ;;  %v7346_v35 = vld [vmem:[#allocation37_spill] sm:$0xff]  ;;  %v7347_v36 = vld [vmem:[#allocation36_spill] sm:$0xff] }
 0xd3c   :  { %3105 = vmatprep.subr.mxu0 %v6267_v37  ;;  %3176 = vmatprep.subr.mxu1 %v6273_v38  ;;  %v7348_v37 = vld [vmem:[#allocation38_spill] sm:$0xff]  ;;  %v7349_v38 = vld [vmem:[#allocation21_spill] sm:$0xff] }
 0xd3d   :  { %3106 = vmatpush1.msra.mxu0 %v6279_v39  ;;  %3177 = vmatpush1.msra.mxu1 %v6285_v40  ;;  %v7350_v39 = vld [vmem:[#allocation8_spill] sm:$0xff]  ;;  %v7351_v40 = vld [vmem:[#allocation13_spill] sm:$0xff] }
 0xd3e   :  { %3107 = vmatprep.subr.mxu0 %v6291_v41  ;;  %3178 = vmatprep.subr.mxu1 %v6297_v42  ;;  %v7352_v41 = vld [vmem:[#allocation17_spill] sm:$0xff]  ;;  %v7353_v42 = vld [vmem:[#allocation26_spill] sm:$0xff] }
 0xd3f   :  { %3108 = vmatpush1.msra.mxu0 %v6303_v43  ;;  %3179 = vmatpush1.msra.mxu1 %v6309_v45  ;;  %v7354_v43 = vmov 0.0   ;;  %v7355_v45 = vld [vmem:[#allocation27_spill] sm:$0xff] }
 0xd40   :  { %3109 = vmatprep.subr.mxu0 %v6315_v50  ;;  %3180 = vmatprep.subr.mxu1 %v6321_v51  ;;  %v3287_v50 = vld [vmem:[%s6825_s5 + $0x78] sm:$0xff] }
 0xd41   :  { %3110 = vmatpush1.msra.mxu0 %v6327_v52  ;;  %3181 = vmatpush1.msra.mxu1 %v6333_v54  ;;  %v7356_v51 = vld [vmem:[#allocation55_spill] sm:$0xff] }
 0xd42   :  { %3111 = vmatprep.subr.mxu0 %v6339_v55  ;;  %3182 = vmatprep.subr.mxu1 %v6345_v14  ;;  %v7357_v52 = vld [vmem:[#allocation51_spill] sm:$0xff]  ;;  %v7358_v14 = vld [vmem:[#allocation58_spill] sm:$0xff] }
 0xd43   :  { %3112 = vmatpush1.msra.mxu0 %v6351_v10  ;;  %3183 = vmatpush1.msra.mxu1 %v6357_v29  ;;  %v1665_v54 = vadd.f32 %v7357_v52, %v7356_v51  ;;  %v7359_v10 = vld [vmem:[#allocation53_spill] sm:$0xff] }
 0xd44   :  { %3113 = vmatprep.subr.mxu0 %v6363_v57  ;;  %3184 = vmatprep.subr.mxu1 %v6369_v25  ;;  %v1667_v29 = vadd.f32 %v7359_v10, %v7358_v14  ;;  %v7369_v10 = vld [vmem:[#allocation57_spill] sm:$0xff] }
 0xd45   :  { %3114 = vmatpush1.msra.mxu0 %v6375_v26  ;;  %3185 = vmatpush1.msra.mxu1 %v6381_v60  ;;  %v7360_v60 = vld [vmem:[#allocation52_spill] sm:$0xff] }
 0xd46   :  { %3115 = vmatprep.subr.mxu0 %v6387_v0  ;;  %3186 = vmatprep.subr.mxu1 %v6393_v28  ;;  %v1778_v0 = vadd.f32 %v7360_v60, %v5910_v61 }
 0xd47   :  { %3116 = vmatpush1.msra.mxu0 %v6399_v63  ;;  %3187 = vmatpush1.msra.mxu1 %v6405_v16 }
 0xd48   :  { %3117 = vmatprep.subr.mxu0 %v6411_v17  ;;  %3188 = vmatprep.subr.mxu1 %v6417_v24 }
 0xd49   :  { %3118 = vmatpush1.msra.mxu0 %v6423_v13  ;;  %3189 = vmatpush1.msra.mxu1 %v7334_v59  ;;  %v7361_v13 = vld [vmem:[#allocation54_spill] sm:$0xff]  ;;  %v7362_v59 = vld [vmem:[#allocation61_spill] sm:$0xff] }
 0xd4a   :  { %3119 = vmatprep.subr.mxu0 %v7335_v5  ;;  %3190 = vmatprep.subr.mxu1 %v7336_v1  ;;  %v1780_v21 = vadd.f32 %v7361_v13, %v5914_v27  ;;  %v3284_v5 = vld [vmem:[%s6825_s5 + $0x60] sm:$0xff]  ;;  %v3283_v1 = vld [vmem:[%s6825_s5 + $0x58] sm:$0xff] }
 0xd4b   :  { %3120 = vmatpush1.msra.mxu0 %v7337_v20  ;;  %3191 = vmatpush1.msra.mxu1 %v7338_v11  ;;  %v3282_v20 = vld [vmem:[%s6825_s5 + $0x50] sm:$0xff]  ;;  %v3281_v11 = vld [vmem:[%s6825_s5 + $0x48] sm:$0xff] }
 0xd4c   :  { %3121 = vmatprep.subr.mxu0 %v7339_v62  ;;  %3192 = vmatprep.subr.mxu1 %v7340_v31  ;;  %v3280_v62 = vld [vmem:[%s6825_s5 + $0x40] sm:$0xff]  ;;  %v3279_v31 = vld [vmem:[%s6825_s5 + $0x38] sm:$0xff] }
 0xd4d   :  { %3122 = vmatpush1.msra.mxu0 %v7341_v3  ;;  %3193 = vmatpush1.msra.mxu1 %v7342_v19  ;;  %v3278_v3 = vld [vmem:[%s6825_s5 + $0x30] sm:$0xff]  ;;  %v3277_v19 = vld [vmem:[%s6825_s5 + $0x28] sm:$0xff] }
 0xd4e   :  { %3123 = vmatprep.subr.mxu0 %v7343_v2  ;;  %3194 = vmatprep.subr.mxu1 %v7344_v6  ;;  %v3276_v2 = vld [vmem:[%s6825_s5 + $0x20] sm:$0xff]  ;;  %v3275_v6 = vld [vmem:[%s6825_s5 + $0x18] sm:$0xff] }
 0xd4f   :  { %3124 = vmatpush1.msra.mxu0 %v7345_v34  ;;  %3195 = vmatpush1.msra.mxu1 %v7346_v35  ;;  %v3274_v34 = vld [vmem:[%s6825_s5 + $0x10] sm:$0xff]  ;;  %v3273_v35 = vld [vmem:[%s6825_s5 + $0x8] sm:$0xff] }
 0xd50   :  { %3125 = vmatprep.subr.mxu0 %v7347_v36  ;;  %3196 = vmatprep.subr.mxu1 %v7348_v37  ;;  %v3272_v36 = vld [vmem:[%s6825_s5] sm:$0xff]  ;;  %v7363_v37 = vld [vmem:[#allocation31_spill] sm:$0xff] }
 0xd51   :  { %3126 = vmatpush1.msra.mxu0 %v7349_v38  ;;  %3197 = vmatpush1.msra.mxu1 %v7350_v39  ;;  %v7364_v38 = vld [vmem:[#allocation33_spill] sm:$0xff]  ;;  %v7365_v39 = vld [vmem:[#allocation10_spill] sm:$0xff] }
 0xd52   :  { %3127 = vmatprep.subr.mxu0 %v7351_v40  ;;  %3198 = vmatprep.subr.mxu1 %v7352_v41  ;;  %v7366_v40 = vld [vmem:[#allocation28_spill] sm:$0xff] }
 0xd53   :  { %3128 = vmatpush1.msra.mxu0 %v7353_v42  ;;  %3161 = vmatprep.mubr.f32.mxu0 %v7354_v43  ;;  %v7367_v41 = vld [vmem:[#allocation56_spill] sm:$0xff] }
 0xd54   :  { %3199 = vmatpush1.msra.mxu1 %v7355_v45  ;;  %3232 = vmatprep.mubr.f32.mxu1 %v7354_v43  ;;  %v1671_v42 = vadd.f32 %v7367_v41, %v7356_v51  ;;  %v7368_v45 = vld [vmem:[#allocation59_spill] sm:$0xff]  ;;  %v7370_v51 = vld [vmem:[#allocation60_spill] sm:$0xff] }
 0xd55   :  { %3472 = vmatprep.subr.mxu0 %v3287_v50 }
 0xdf4   :  { %v2991_v55 = vpop.f32.mrf.mxu0  ;;  %v3062_v25 = vpop.f32.mrf.mxu1 }
 0xdf5   :  { %v3067_v57 = vadd.f32 %v2991_v55, %v1665_v54  ;;  %v3069_v16 = vadd.f32 %v3062_v25, %v1778_v0  ;;  %v1786_v0 = vadd.f32 %v7370_v51, %v5914_v27 }
 0xdf6   :  { %v2993_v26 = vpop.f32.mrf.mxu0  ;;  %v3064_v24 = vpop.f32.mrf.mxu1 }
 0xdf7   :  { %v3071_v28 = vmul.f32 0.5, %v3067_v57  ;;  %v3068_v63 = vadd.f32 %v2993_v26, %v1667_v29  ;;  %v3070_v53 = vadd.f32 %v3064_v24, %v1780_v21  ;;  %v1784_v29 = vadd.f32 %v7369_v10, %v5910_v61 }
 0xdf9   :  { %3657 = vtanh.f32 %v3071_v28  ;;  %v3075_v17 = vmul.f32 0.5, %v3068_v63  ;;  %v3080_v4 = vmul.f32 0.5, %v3070_v53 }
 0xdfb   :  { %3659 = vtanh.f32 %v3075_v17 }
 0xdfc   :  { %3661 = vtanh.f32 %v3069_v16 }
 0xdfd   :  { %3663 = vtanh.f32 %v3080_v4 }
 0xe06   :  { %v3658_v9 = vpop.eup %3657 }
 0xe07   :  { %v3073_v58 = vmul.f32 0.5, %v3658_v9 }
 0xe08   :  { %v3660_v18 = vpop.eup %3659 }
 0xe09   :  { %v3074_v12 = vadd.f32 0.5, %v3073_v58  ;;  %v3077_v44 = vmul.f32 0.5, %v3660_v18  ;;  %v3662_v33 = vpop.eup %3661  ;;  %v3447_v58 = vld [vmem:[%s6826_s6] ss:$0 sm:$0xff] }
 0xe0a   :  { %v3664_v49 = vpop.eup %3663 }
 0xe0b   :  { %v3078_v22 = vadd.f32 0.5, %v3077_v44  ;;  %v3085_v46 = vmul.f32 %v3662_v33, %v3074_v12  ;;  %v3082_v56 = vmul.f32 0.5, %v3664_v49 }
 0xe0d   :  { %v3084_v32 = vmul.f32 %v3078_v22, %v6647_v7  ;;  %v3083_v23 = vadd.f32 0.5, %v3082_v56  ;;  %v3285_v7 = vld [vmem:[%s6825_s5 + $0x68] sm:$0xff] }
 0xe0f   :  { %v6730_v48 = vadd.f32 %v3085_v46, %v3084_v32 }
 0xe11   :  { %3665 = vtanh.f32 %v6730_v48 }
 0xe1e   :  { %v3666_v47 = vpop.eup %3665 }
 0xe1f   :  { %v3088_v30 = vmul.f32 %v3666_v47, %v3083_v23 }
 0xe21   :  { %3162 = vmatmul.mubr.f32.vlgmr.msra.gmra.mxu0 %v3088_v30  ;;  %3233 = vmatmul.mubr.f32.vlgmr.msra.gmra.mxu1 %v3088_v30 }
 0xe22   :  { %3473 = vmatpush3.msra.mxu0 %v3287_v50  ;;  %3504 = vmatprep.mubr.f32.mxu0 %v7362_v59  ;;  %v1673_v50 = vadd.f32 %v7368_v45, %v7358_v14 }
 0xe23   :  { %3474 = vmatprep.subr.mxu0 %v3286_v8 }
 0xe24   :  { %3475 = vmatpush3.msra.mxu0 %v3286_v8 }
 0xe25   :  { %3476 = vmatprep.subr.mxu0 %v3285_v7 }
 0xe26   :  { %3477 = vmatpush3.msra.mxu0 %v3285_v7 }
 0xe27   :  { %3478 = vmatprep.subr.mxu0 %v3284_v5 }
 0xe28   :  { %3479 = vmatpush3.msra.mxu0 %v3284_v5 }
 0xe29   :  { %3480 = vmatprep.subr.mxu0 %v3283_v1 }
 0xe2a   :  { %3481 = vmatpush3.msra.mxu0 %v3283_v1 }
 0xe2b   :  { %3482 = vmatprep.subr.mxu0 %v3282_v20 }
 0xe2c   :  { %3483 = vmatpush3.msra.mxu0 %v3282_v20 }
 0xe2d   :  { %3484 = vmatprep.subr.mxu0 %v3281_v11 }
 0xe2e   :  { %3485 = vmatpush3.msra.mxu0 %v3281_v11 }
 0xe2f   :  { %3486 = vmatprep.subr.mxu0 %v3280_v62 }
 0xe30   :  { %3487 = vmatpush3.msra.mxu0 %v3280_v62 }
 0xe31   :  { %3488 = vmatprep.subr.mxu0 %v3279_v31 }
 0xe32   :  { %3489 = vmatpush3.msra.mxu0 %v3279_v31 }
 0xe33   :  { %3490 = vmatprep.subr.mxu0 %v3278_v3 }
 0xe34   :  { %3491 = vmatpush3.msra.mxu0 %v3278_v3 }
 0xe35   :  { %3492 = vmatprep.subr.mxu0 %v3277_v19 }
 0xe36   :  { %3493 = vmatpush3.msra.mxu0 %v3277_v19 }
 0xe37   :  { %3494 = vmatprep.subr.mxu0 %v3276_v2 }
 0xe38   :  { %3495 = vmatpush3.msra.mxu0 %v3276_v2 }
 0xe39   :  { %3496 = vmatprep.subr.mxu0 %v3275_v6 }
 0xe3a   :  { %3497 = vmatpush3.msra.mxu0 %v3275_v6 }
 0xe3b   :  { %3498 = vmatprep.subr.mxu0 %v3274_v34 }
 0xe3c   :  { %3499 = vmatpush3.msra.mxu0 %v3274_v34 }
 0xe3d   :  { %3500 = vmatprep.subr.mxu0 %v3273_v35 }
 0xe3e   :  { %3501 = vmatpush3.msra.mxu0 %v3273_v35 }
 0xe3f   :  { %3502 = vmatprep.subr.mxu0 %v3272_v36 }
 0xe40   :  { %3503 = vmatpush3.msra.mxu0 %v3272_v36 }
 0xe41   :  { %3505 = vmatmul.mubr.f32.vlgmr.msra.gmra.mxu0 %v7363_v37 }
 0xe42   :  { %3507 = vmatprep.mubr.f32.mxu0 %v7364_v38 }
 0xe45   :  { %3508 = vmatmul.mubr.f32.gmra.mxu0 %v7365_v39 }
 0xe46   :  { %3510 = vmatprep.mubr.f32.mxu0 %v7366_v40 }
 0xe49   :  { %3511 = vmatmul.mubr.f32.gmra.mxu0 %v6650_v15 }
 0xe4a   :  { %3513 = vmatprep.mubr.f32.mxu0 %v3088_v30 }
 0xee1   :  { %v3163_v43 = vpop.f32.mrf.mxu0  ;;  %v3234_v54 = vpop.f32.mrf.mxu1 }
 0xee2   :  { %v3239_v52 = vadd.f32 %v3163_v43, %v1671_v42  ;;  %v3241_v26 = vadd.f32 %v3234_v54, %v1784_v29 }
 0xee3   :  { %v3165_v55 = vpop.f32.mrf.mxu0  ;;  %v3236_v15 = vpop.f32.mrf.mxu1 }
 0xee4   :  { %v3243_v57 = vmul.f32 0.5, %v3239_v52  ;;  %v3240_v25 = vadd.f32 %v3165_v55, %v1673_v50  ;;  %v3242_v28 = vadd.f32 %v3236_v15, %v1786_v0 }
 0xee6   :  { %3667 = vtanh.f32 %v3243_v57  ;;  %v3247_v60 = vmul.f32 0.5, %v3240_v25  ;;  %v3252_v63 = vmul.f32 0.5, %v3242_v28 }
 0xee8   :  { %3669 = vtanh.f32 %v3247_v60 }
 0xee9   :  { %3671 = vtanh.f32 %v3241_v26 }
 0xeea   :  { %3673 = vtanh.f32 %v3252_v63 }
 0xef3   :  { %v3668_v14 = vpop.eup %3667 }
 0xef4   :  { %v3245_v16 = vmul.f32 0.5, %v3668_v14 }
 0xef5   :  { %v3670_v17 = vpop.eup %3669 }
 0xef6   :  { %v3246_v24 = vadd.f32 0.5, %v3245_v16  ;;  %v3249_v13 = vmul.f32 0.5, %v3670_v17  ;;  %v3672_v61 = vpop.eup %3671 }
 0xef7   :  { %v3674_v12 = vpop.eup %3673 }
 0xef8   :  { %v3250_v21 = vadd.f32 0.5, %v3249_v13  ;;  %v3257_v53 = vmul.f32 %v3672_v61, %v3246_v24  ;;  %v3254_v46 = vmul.f32 0.5, %v3674_v12 }
 0xefa   :  { %v3256_v4 = vmul.f32 %v3250_v21, %v6730_v48  ;;  %v3255_v23 = vadd.f32 0.5, %v3254_v46 }
 0xefc   :  { %v3258_v9 = vadd.f32 %v3257_v53, %v3256_v4 }
 0xefe   :  { %3675 = vtanh.f32 %v3258_v9 }
 0xf01   :  { %v3506_v27 = vpop.f32.mrf.mxu0 }
 0xf02   :  { %v3367_v18 = vadd.f32 %v3506_v27, %v3447_v58 }
 0xf03   :  { %v3361_v44 = vpop.f32.mrf.mxu0 }
 0xf04   :  { %3401 = vst [vmem:[%s6827_s7 + $0x8] sm:$0xff] %v3367_v18  ;;  %v3362_v33 = vadd.f32 %v3447_v58, %v3361_v44 }
 0xf05   :  { %v3509_v22 = vpop.f32.mrf.mxu0 }
 0xf06   :  { %3400 = vst [vmem:[%s6827_s7] sm:$0xff] %v3362_v33  ;;  %v3377_v32 = vadd.f32 %v3509_v22, %v3447_v58 }
 0xf07   :  { %v3371_v48 = vpop.f32.mrf.mxu0 }
 0xf08   :  { %3403 = vst [vmem:[%s6827_s7 + $0x18] sm:$0xff] %v3377_v32  ;;  %v3372_v49 = vadd.f32 %v3447_v58, %v3371_v48 }
 0xf09   :  { %v3512_v56 = vpop.f32.mrf.mxu0 }
 0xf0a   :  { %3402 = vst [vmem:[%s6827_s7 + $0x10] sm:$0xff] %v3372_v49  ;;  %v3387_v47 = vadd.f32 %v3512_v56, %v3447_v58 }
 0xf0b   :  { %v3676_v30 = vpop.eup %3675  ;;  %v3381_v8 = vpop.f32.mrf.mxu0 }
 0xf0c   :  { %3405 = vst [vmem:[%s6827_s7 + $0x28] sm:$0xff] %v3387_v47  ;;  %v3382_v59 = vadd.f32 %v3447_v58, %v3381_v8  ;;  %v3260_v7 = vmul.f32 %v3676_v30, %v3255_v23 }
 0xf0e   :  { %3404 = vst [vmem:[%s6827_s7 + $0x20] sm:$0xff] %v3382_v59  ;;  %3514 = vmatmul.mubr.f32.gmra.mxu0 %v3260_v7 }
 0xfce   :  { %v3515_v5 = vpop.f32.mrf.mxu0 }
 0xfcf   :  { %v3397_v1 = vadd.f32 %v3515_v5, %v3447_v58 }
 0xfd0   :  { %v3391_v20 = vpop.f32.mrf.mxu0 }
 0xfd1   :  { %3407 = vst [vmem:[%s6827_s7 + $0x38] sm:$0xff] %v3397_v1  ;;  %v3392_v11 = vadd.f32 %v3447_v58, %v3391_v20 }
 0xfd3   :  { %3406 = vst [vmem:[%s6827_s7 + $0x30] sm:$0xff] %v3392_v11 }

</bundles_post_ra>
